<compile_context>
chip_gen: v7x
topology: tpu7x:2x2x1
jax: 0.10.0
libtpu: 0.0.40
codegen_flags: <defaults>
</compile_context>

<pallas_src>
import jax
import jax.numpy as jnp
from jax import lax
from jax.experimental import pallas as pl
from jax.experimental.pallas import tpu as pltpu

NEG_SLOPE = 0.01
BN_EPS = 1e-5
VMEM_LIMIT = 48 * 1024 * 1024


# ------------------------------ helpers -------------------------------------

def fold_bn(bn):
    """Inference-mode BatchNorm folded into a per-channel affine."""
    scale = bn["gamma"] / jnp.sqrt(bn["var"] + BN_EPS)
    shift = bn["beta"] - bn["mean"] * scale
    return scale, shift


def _interp_matrix(n_in, n_out):
    """Row-stochastic interpolation matrix for align_corners=True bilinear.

    Rows summing to 1 is what makes '1x1 conv + BN before the upsample' exact
    (the BN shift commutes).  Do not replace with a non-row-stochastic resize.
    """
    src = jnp.arange(n_out, dtype=jnp.float32) * (n_in - 1) / (n_out - 1)
    i0 = jnp.clip(jnp.floor(src).astype(jnp.int32), 0, n_in - 2)
    frac = src - i0.astype(jnp.float32)
    m = jnp.zeros((n_out, n_in), jnp.float32)
    m = m.at[jnp.arange(n_out), i0].add(1.0 - frac)
    m = m.at[jnp.arange(n_out), i0 + 1].add(frac)
    return m


def _col_masks(H, W):
    """(1, H*W) bf16 masks killing the row-wrap columns of a flat lane shift."""
    col = jnp.arange(H * W, dtype=jnp.int32) % W
    keep_l = (col != 0).astype(jnp.bfloat16).reshape(1, H * W)      # for dx = -1
    keep_r = (col != W - 1).astype(jnp.bfloat16).reshape(1, H * W)  # for dx = +1
    return keep_l, keep_r


def _tap_weights_planar(w_oihw):
    """OIHW (Cout, Cin, 3, 3) -> tap-major planar (9, Cout, Cin) bf16."""
    cout, cin = w_oihw.shape[0], w_oihw.shape[1]
    return jnp.transpose(w_oihw, (2, 3, 0, 1)).reshape(9, cout, cin).astype(
        jnp.bfloat16)


# --------------------- stage 1: 1x1 conv + BN + upsample ---------------------

def _make_upconv_kernel(H, W, Ho, Wo):
    def kernel(x_ref, w0_ref, scale_ref, shift_ref, uxt_ref, uy_ref, o_ref):
        cout = o_ref.shape[1]
        # 1x1 conv + folded BN at LOW resolution (one big matmul).
        x = x_ref[0].astype(jnp.bfloat16)                                # (Cin, H*W)
        y = jnp.dot(w0_ref[...], x, preferred_element_type=jnp.float32)  # (Cout, H*W)
        y = y * scale_ref[...] + shift_ref[...]
        # (Cout, H*W) -> (Cout, H, W) via static lane slices (no lane-crossing
        # reshape), then ONE wide W-pass matmul over all channel planes.
        y3 = jnp.stack([y[:, h * W:(h + 1) * W] for h in range(H)], axis=1)
        t = jnp.dot(y3.reshape(cout * H, W).astype(jnp.bfloat16), uxt_ref[...],
                    preferred_element_type=jnp.float32)                  # (Cout*H, Wo)
        # H-pass as a single batched matmul over the channel planes.
        t3 = t.reshape(cout, H, Wo).astype(jnp.bfloat16)
        uy_b = jnp.broadcast_to(uy_ref[...], (cout, Ho, H))
        up = lax.dot_general(uy_b, t3,
                             dimension_numbers=(((2,), (1,)), ((0,), (0,))),
                             preferred_element_type=jnp.float32)         # (Cout, Ho, Wo)
        up = jnp.where(up >= 0, up, NEG_SLOPE * up)                      # LeakyReLU
        o_ref[0] = up.astype(o_ref.dtype)
    return kernel


def upconv_bn_lrelu(x_nchw, w0, bn):
    """Fused 1x1 conv + folded BN (low-res) -> bilinear x2 (align_corners=True)
    -> LeakyReLU.  Emits planar bf16 (N, Cout, 2H, 2W)."""
    N, Cin, H, W = x_nchw.shape
    Cout = w0.shape[0]
    Ho, Wo = 2 * H, 2 * W
    scale, shift = fold_bn(bn)
    x_flat = x_nchw.reshape(N, Cin, H * W)                 # free reshape (no HBM pass)
    w0m = w0.reshape(Cout, Cin).astype(jnp.bfloat16)
    uxt = _interp_matrix(W, Wo).T.astype(jnp.bfloat16)     # (W, Wo)
    uy = _interp_matrix(H, Ho).astype(jnp.bfloat16)        # (Ho, H)
    return pl.pallas_call(
        _make_upconv_kernel(H, W, Ho, Wo),
        out_shape=jax.ShapeDtypeStruct((N, Cout, Ho, Wo), jnp.bfloat16),
        grid=(N,),
        in_specs=[
            pl.BlockSpec((1, Cin, H * W), lambda n: (n, 0, 0)),
            pl.BlockSpec((Cout, Cin), lambda n: (0, 0)),
            pl.BlockSpec((Cout, 1), lambda n: (0, 0)),
            pl.BlockSpec((Cout, 1), lambda n: (0, 0)),
            pl.BlockSpec((W, Wo), lambda n: (0, 0)),
            pl.BlockSpec((Ho, H), lambda n: (0, 0)),
        ],
        out_specs=pl.BlockSpec((1, Cout, Ho, Wo), lambda n: (n, 0, 0, 0)),
        compiler_params=pltpu.CompilerParams(
            dimension_semantics=("parallel",),
            vmem_limit_bytes=VMEM_LIMIT),
    )(x_flat, w0m,
      scale.reshape(Cout, 1).astype(jnp.float32),
      shift.reshape(Cout, 1).astype(jnp.float32),
      uxt, uy)


# ------------------------ 3x3 conv + BN + LeakyReLU --------------------------

def _make_conv3x3_kernel(n_inputs, H, W):
    HW = H * W

    def kernel(*refs):
        x_refs = refs[:n_inputs]
        w_refs = refs[n_inputs:2 * n_inputs]
        keep_l_ref, keep_r_ref, scale_ref, shift_ref = refs[2 * n_inputs:
                                                            2 * n_inputs + 4]
        o_ref = refs[2 * n_inputs + 4]

        keep_l = keep_l_ref[...]
        keep_r = keep_r_ref[...]
        acc = None
        for x_ref, w_ref in zip(x_refs, w_refs):
            c_in = x_ref.shape[1]
            x2 = x_ref[0].astype(jnp.bfloat16)                   # (Ci, HW) in-kernel cast
            zpad = jnp.zeros((c_in, W + 1), jnp.bfloat16)
            xe = jnp.concatenate([zpad, x2, zpad], axis=1)       # in-VMEM halo, no HBM pad
            for t in range(9):
                ky, kx = divmod(t, 3)
                dy, dx = ky - 1, kx - 1
                start = (W + 1) + dy * W + dx
                patch = xe[:, start:start + HW]                  # static lane-shifted slice
                if dx == -1:
                    patch = patch * keep_l
                elif dx == 1:
                    patch = patch * keep_r
                contrib = jnp.dot(w_ref[t], patch,
                                  preferred_element_type=jnp.float32)  # (Cout, HW)
                acc = contrib if acc is None else acc + contrib
        y = acc * scale_ref[...] + shift_ref[...]
        y = jnp.where(y >= 0, y, NEG_SLOPE * y)
        o_ref[0] = y.astype(o_ref.dtype)                          # lane-dense (Cout, HW) store

    return kernel


def conv3x3_bn_lrelu(inputs_flat, weights, bn, H, W, out_dtype):
    """Direct 3x3 conv (stride 1, pad 1, no bias) + folded BN + LeakyReLU.

    inputs_flat: list of planar-flat (N, Ci, H*W) tensors whose channel concat
                 is the conv input (the concat itself is never materialized).
    weights:     matching list of (9, Cout, Ci) bf16 tap-major weight slices.
    Returns (N, Cout, H*W) planar-flat NCHW in `out_dtype`.
    """
    n_in = len(inputs_flat)
    N = inputs_flat[0].shape[0]
    HW = H * W
    Cout = weights[0].shape[1]
    scale, shift = fold_bn(bn)
    keep_l, keep_r = _col_masks(H, W)

    # TODO(synk): add a parallel row-block grid axis with a 1-row halo (manual
    # make_async_copy into VMEM scratch) plus Cout tiling for large images.
    in_specs = (
        [pl.BlockSpec((1, a.shape[1], HW), lambda n: (n, 0, 0))
         for a in inputs_flat]
        + [pl.BlockSpec(w.shape, lambda n: (0, 0, 0)) for w in weights]
        + [pl.BlockSpec((1, HW), lambda n: (0, 0)),
           pl.BlockSpec((1, HW), lambda n: (0, 0)),
           pl.BlockSpec((Cout, 1), lambda n: (0, 0)),
           pl.BlockSpec((Cout, 1), lambda n: (0, 0))]
    )
    return pl.pallas_call(
        _make_conv3x3_kernel(n_in, H, W),
        out_shape=jax.ShapeDtypeStruct((N, Cout, HW), out_dtype),
        grid=(N,),
        in_specs=in_specs,
        out_specs=pl.BlockSpec((1, Cout, HW), lambda n: (n, 0, 0)),
        compiler_params=pltpu.CompilerParams(
            dimension_semantics=("parallel",),
            vmem_limit_bytes=VMEM_LIMIT),
    )(*inputs_flat, *weights, keep_l, keep_r,
      scale.reshape(Cout, 1).astype(jnp.float32),
      shift.reshape(Cout, 1).astype(jnp.float32))


# ------------------------------ forward pass ---------------------------------

def decoder_forward(params, x, skip):
    N, Cin, H, W = x.shape
    Cout = params["w0"].shape[0]
    Cskip = skip.shape[1]
    assert Cskip == Cin - Cout, "skip channels must complete the concat"
    Ho, Wo = 2 * H, 2 * W

    # Stage 1 (fused kernel): 1x1 conv + BN at low res -> x2 upsample -> LeakyReLU.
    x1 = upconv_bn_lrelu(x, params["w0"], params["bn0"])     # (N, Cout, Ho, Wo) bf16
    x1_flat = x1.reshape(N, Cout, Ho * Wo)                   # free
    skip_flat = skip.reshape(N, Cskip, Ho * Wo)              # free (f32; cast in-kernel)

    # Stage 2: first 3x3 conv of the ConvBlock; the [x1, skip] channel concat
    # is folded into two weight slices accumulated in-kernel.
    w1t = _tap_weights_planar(params["w1"])                  # (9, Cout, Cin)
    y1 = conv3x3_bn_lrelu([x1_flat, skip_flat],
                          [w1t[:, :, :Cout], w1t[:, :, Cout:]],
                          params["bn1"], Ho, Wo, jnp.bfloat16)

    # Stage 3: second 3x3 conv of the ConvBlock; output already NCHW-flat f32.
    w2t = _tap_weights_planar(params["w2"])                  # (9, Cout, Cout)
    y2 = conv3x3_bn_lrelu([y1], [w2t], params["bn2"], Ho, Wo, jnp.float32)

    return y2.reshape(N, Cout, Ho, Wo)                       # free reshape, already NCHW


# ------------------------------ parameters -----------------------------------

def init_params(key, in_channels, out_channels):
    ks = jax.random.split(key, 6)

    def conv_w(k, cout, cin, ksz):
        fan_in = cin * ksz * ksz
        bound = 1.0 / (fan_in ** 0.5)
        return jax.random.uniform(k, (cout, cin, ksz, ksz), jnp.float32,
                                  -bound, bound)

    def bn_p(k, c):
        k1, k2, k3, k4 = jax.random.split(k, 4)
        return dict(
            gamma=1.0 + 0.1 * jax.random.normal(k1, (c,), jnp.float32),
            beta=0.1 * jax.random.normal(k2, (c,), jnp.float32),
            mean=0.05 * jax.random.normal(k3, (c,), jnp.float32),
            var=1.0 + 0.1 * jnp.abs(jax.random.normal(k4, (c,), jnp.float32)),
        )

    return dict(
        w0=conv_w(ks[0], out_channels, in_channels, 1),
        bn0=bn_p(ks[1], out_channels),
        w1=conv_w(ks[2], out_channels, in_channels, 3),
        bn1=bn_p(ks[3], out_channels),
        w2=conv_w(ks[4], out_channels, out_channels, 3),
        bn2=bn_p(ks[5], out_channels),
    )


# ----------------------------- pure-JAX reference ----------------------------

def _upsample_ref(x):
    N, C, H, W = x.shape
    Ho, Wo = 2 * H, 2 * W
    ys = jnp.arange(Ho) * (H - 1) / (Ho - 1)
    xs = jnp.arange(Wo) * (W - 1) / (Wo - 1)
    y0 = jnp.clip(jnp.floor(ys).astype(jnp.int32), 0, H - 2); wy = ys - y0
    x0 = jnp.clip(jnp.floor(xs).astype(jnp.int32), 0, W - 2); wx = xs - x0
    top, bot = x[:, :, y0, :], x[:, :, y0 + 1, :]
    rows = top * (1 - wy)[None, None, :, None] + bot * wy[None, None, :, None]
    left, right = rows[:, :, :, x0], rows[:, :, :, x0 + 1]
    return left * (1 - wx) + right * wx


def _conv_bn_lrelu_ref(x, w, bn, pad):
    y = lax.conv_general_dilated(x, w, (1, 1), [(pad, pad), (pad, pad)],
                                 dimension_numbers=("NCHW", "OIHW", "NCHW"))
    scale, shift = fold_bn(bn)
    y = y * scale[None, :, None, None] + shift[None, :, None, None]
    return jnp.where(y >= 0, y, NEG_SLOPE * y)


def decoder_reference(params, x, skip):
    xu = _upsample_ref(x)
    x1 = _conv_bn_lrelu_ref(xu, params["w0"], params["bn0"], 0)
    xc = jnp.concatenate([x1, skip], axis=1)
    y = _conv_bn_lrelu_ref(xc, params["w1"], params["bn1"], 1)
    y = _conv_bn_lrelu_ref(y, params["w2"], params["bn2"], 1)
    return y


# ----------------------------------- main ------------------------------------

if __name__ == "__main__":
    in_channels, out_channels = 4, 2
    N, H, W = 2, 16, 16

    key = jax.random.PRNGKey(0)
    kx, ksk, kp = jax.random.split(key, 3)
    x = jax.random.normal(kx, (N, in_channels, H, W), jnp.float32)
    # skip comes from the encoder at the upsampled resolution; its channel count
    # completes the concat to in_channels (UNet convention).
    skip = jax.random.normal(ksk, (N, in_channels - out_channels, 2 * H, 2 * W),
                             jnp.float32)
    params = init_params(kp, in_channels, out_channels)

    fwd = jax.jit(decoder_forward)
    out = jax.block_until_ready(fwd(params, x, skip))
    assert out.shape == (N, out_channels, 2 * H, 2 * W)

    ref = decoder_reference(params, x, skip)
    # bf16 activations / weights / interp matrices on every MXU path (f32
    # accumulate + f32 epilogue) -> tolerance loosened vs. the pure-f32 ref.
    err = float(jnp.max(jnp.abs(out - ref)))
    assert jnp.allclose(out, ref, atol=3e-2, rtol=3e-2), f"max abs err {err}"
    print("KERNEL_OK")
</pallas_src>

<mosaic_0001>
module attributes {stable_mosaic.version = 11 : i64} {
  func.func private @main(%arg0: i32) attributes {dimension_semantics = [#tpu.dimension_semantics<core_parallel>], iteration_bounds = array<i64: 2>, tpu.core_type = #tpu.core_type<sc_scalar_subcore>, window_params = []} {
    return
  }
}

module attributes {stable_mosaic.version = 11 : i64} {
  func.func private @main(%arg0: i32) attributes {dimension_semantics = [#tpu.dimension_semantics<core_parallel>], iteration_bounds = array<i64: 2>, tpu.core_type = #tpu.core_type<sc_scalar_subcore>, window_params = []} {
    return
  }
}

module attributes {stable_mosaic.version = 11 : i64} {
  func.func @kernel(%arg0: i32, %arg1: memref<1x2x1024xbf16, #tpu.memory_space<vmem>>, %arg2: memref<1x2x1024xf32, #tpu.memory_space<vmem>>, %arg3: memref<9x2x2xbf16, #tpu.memory_space<vmem>>, %arg4: memref<9x2x2xbf16, #tpu.memory_space<vmem>>, %arg5: memref<1x1024xbf16, #tpu.memory_space<vmem>>, %arg6: memref<1x1024xbf16, #tpu.memory_space<vmem>>, %arg7: memref<2x1xf32, #tpu.memory_space<vmem>>, %arg8: memref<2x1xf32, #tpu.memory_space<vmem>>, %arg9: memref<1x2x1024xbf16, #tpu.memory_space<vmem>>) attributes {dimension_semantics = [#tpu.dimension_semantics<parallel>], iteration_bounds = array<i64: 2>, scalar_prefetch = 0 : i64, scratch_operands = 0 : i64, tpu.core_type = #tpu.core_type<tc>, window_params = [{transform_indices = @transform_0, window_bounds = array<i64: 1, 2, 1024>}, {transform_indices = @transform_1, window_bounds = array<i64: 1, 2, 1024>}, {pipeline_mode = #tpu.pipeline_mode<synchronous>, transform_indices = @transform_2, window_bounds = array<i64: 9, 2, 2>}, {pipeline_mode = #tpu.pipeline_mode<synchronous>, transform_indices = @transform_3, window_bounds = array<i64: 9, 2, 2>}, {pipeline_mode = #tpu.pipeline_mode<synchronous>, transform_indices = @transform_4, window_bounds = array<i64: 1, 1024>}, {pipeline_mode = #tpu.pipeline_mode<synchronous>, transform_indices = @transform_5, window_bounds = array<i64: 1, 1024>}, {pipeline_mode = #tpu.pipeline_mode<synchronous>, transform_indices = @transform_6, window_bounds = array<i64: 2, 1>}, {pipeline_mode = #tpu.pipeline_mode<synchronous>, transform_indices = @transform_7, window_bounds = array<i64: 2, 1>}, {transform_indices = @transform_8, window_bounds = array<i64: 1, 2, 1024>}]} {
    %c0 = arith.constant 0 : index
    %c0_0 = arith.constant 0 : index
    %0 = vector.load %arg5[%c0, %c0_0] : memref<1x1024xbf16, #tpu.memory_space<vmem>>, vector<1x1024xbf16>
    %c0_1 = arith.constant 0 : index
    %c0_2 = arith.constant 0 : index
    %1 = vector.load %arg6[%c0_1, %c0_2] : memref<1x1024xbf16, #tpu.memory_space<vmem>>, vector<1x1024xbf16>
    %c0_3 = arith.constant 0 : index
    %c0_4 = arith.constant 0 : index
    %c0_5 = arith.constant 0 : index
    %2 = vector.load %arg1[%c0_3, %c0_4, %c0_5] : memref<1x2x1024xbf16, #tpu.memory_space<vmem>>, vector<1x2x1024xbf16>
    %3 = vector.shape_cast %2 : vector<1x2x1024xbf16> to vector<2x1024xbf16>
    %cst = arith.constant 0.000000e+00 : bf16
    %4 = vector.broadcast %cst : bf16 to vector<2x33xbf16>
    %5 = tpu.concatenate %4, %3, %4 in 1 : vector<2x33xbf16>, vector<2x1024xbf16>, vector<2x33xbf16> -> vector<2x1090xbf16>
    %6 = vector.extract_strided_slice %5 {offsets = [0, 0], sizes = [2, 1024], strides = [1, 1]} : vector<2x1090xbf16> to vector<2x1024xbf16>
    %7 = vector.broadcast %0 : vector<1x1024xbf16> to vector<2x1024xbf16>
    %8 = arith.mulf %6, %7 : vector<2x1024xbf16>
    %c0_6 = arith.constant 0 : index
    %c0_7 = arith.constant 0 : index
    %c0_8 = arith.constant 0 : index
    %9 = vector.load %arg3[%c0_6, %c0_7, %c0_8] : memref<9x2x2xbf16, #tpu.memory_space<vmem>>, vector<1x2x2xbf16>
    %10 = vector.shape_cast %9 : vector<1x2x2xbf16> to vector<2x2xbf16>
    %cst_9 = arith.constant dense<0.000000e+00> : vector<2x1024xf32>
    %11 = tpu.matmul %10, %8, %cst_9 {dimension_numbers = #tpu.dot_dimension_numbers<[1], [0], [0], [1], [0, 0, 1, 1], [], []>} : vector<2x2xbf16>, vector<2x1024xbf16>, vector<2x1024xf32> -> vector<2x1024xf32>
    %12 = vector.extract_strided_slice %5 {offsets = [0, 1], sizes = [2, 1024], strides = [1, 1]} : vector<2x1090xbf16> to vector<2x1024xbf16>
    %c1 = arith.constant 1 : index
    %c0_10 = arith.constant 0 : index
    %c0_11 = arith.constant 0 : index
    %13 = vector.load %arg3[%c1, %c0_10, %c0_11] : memref<9x2x2xbf16, #tpu.memory_space<vmem>>, vector<1x2x2xbf16>
    %14 = vector.shape_cast %13 : vector<1x2x2xbf16> to vector<2x2xbf16>
    %cst_12 = arith.constant dense<0.000000e+00> : vector<2x1024xf32>
    %15 = tpu.matmul %14, %12, %cst_12 {dimension_numbers = #tpu.dot_dimension_numbers<[1], [0], [0], [1], [0, 0, 1, 1], [], []>} : vector<2x2xbf16>, vector<2x1024xbf16>, vector<2x1024xf32> -> vector<2x1024xf32>
    %16 = arith.addf %11, %15 : vector<2x1024xf32>
    %17 = vector.extract_strided_slice %5 {offsets = [0, 2], sizes = [2, 1024], strides = [1, 1]} : vector<2x1090xbf16> to vector<2x1024xbf16>
    %18 = vector.broadcast %1 : vector<1x1024xbf16> to vector<2x1024xbf16>
    %19 = arith.mulf %17, %18 : vector<2x1024xbf16>
    %c2 = arith.constant 2 : index
    %c0_13 = arith.constant 0 : index
    %c0_14 = arith.constant 0 : index
    %20 = vector.load %arg3[%c2, %c0_13, %c0_14] : memref<9x2x2xbf16, #tpu.memory_space<vmem>>, vector<1x2x2xbf16>
    %21 = vector.shape_cast %20 : vector<1x2x2xbf16> to vector<2x2xbf16>
    %cst_15 = arith.constant dense<0.000000e+00> : vector<2x1024xf32>
    %22 = tpu.matmul %21, %19, %cst_15 {dimension_numbers = #tpu.dot_dimension_numbers<[1], [0], [0], [1], [0, 0, 1, 1], [], []>} : vector<2x2xbf16>, vector<2x1024xbf16>, vector<2x1024xf32> -> vector<2x1024xf32>
    %23 = arith.addf %16, %22 : vector<2x1024xf32>
    %24 = vector.extract_strided_slice %5 {offsets = [0, 32], sizes = [2, 1024], strides = [1, 1]} : vector<2x1090xbf16> to vector<2x1024xbf16>
    %25 = vector.broadcast %0 : vector<1x1024xbf16> to vector<2x1024xbf16>
    %26 = arith.mulf %24, %25 : vector<2x1024xbf16>
    %c3 = arith.constant 3 : index
    %c0_16 = arith.constant 0 : index
    %c0_17 = arith.constant 0 : index
    %27 = vector.load %arg3[%c3, %c0_16, %c0_17] : memref<9x2x2xbf16, #tpu.memory_space<vmem>>, vector<1x2x2xbf16>
    %28 = vector.shape_cast %27 : vector<1x2x2xbf16> to vector<2x2xbf16>
    %cst_18 = arith.constant dense<0.000000e+00> : vector<2x1024xf32>
    %29 = tpu.matmul %28, %26, %cst_18 {dimension_numbers = #tpu.dot_dimension_numbers<[1], [0], [0], [1], [0, 0, 1, 1], [], []>} : vector<2x2xbf16>, vector<2x1024xbf16>, vector<2x1024xf32> -> vector<2x1024xf32>
    %30 = arith.addf %23, %29 : vector<2x1024xf32>
    %31 = vector.extract_strided_slice %5 {offsets = [0, 33], sizes = [2, 1024], strides = [1, 1]} : vector<2x1090xbf16> to vector<2x1024xbf16>
    %c4 = arith.constant 4 : index
    %c0_19 = arith.constant 0 : index
    %c0_20 = arith.constant 0 : index
    %32 = vector.load %arg3[%c4, %c0_19, %c0_20] : memref<9x2x2xbf16, #tpu.memory_space<vmem>>, vector<1x2x2xbf16>
    %33 = vector.shape_cast %32 : vector<1x2x2xbf16> to vector<2x2xbf16>
    %cst_21 = arith.constant dense<0.000000e+00> : vector<2x1024xf32>
    %34 = tpu.matmul %33, %31, %cst_21 {dimension_numbers = #tpu.dot_dimension_numbers<[1], [0], [0], [1], [0, 0, 1, 1], [], []>} : vector<2x2xbf16>, vector<2x1024xbf16>, vector<2x1024xf32> -> vector<2x1024xf32>
    %35 = arith.addf %30, %34 : vector<2x1024xf32>
    %36 = vector.extract_strided_slice %5 {offsets = [0, 34], sizes = [2, 1024], strides = [1, 1]} : vector<2x1090xbf16> to vector<2x1024xbf16>
    %37 = vector.broadcast %1 : vector<1x1024xbf16> to vector<2x1024xbf16>
    %38 = arith.mulf %36, %37 : vector<2x1024xbf16>
    %c5 = arith.constant 5 : index
    %c0_22 = arith.constant 0 : index
    %c0_23 = arith.constant 0 : index
    %39 = vector.load %arg3[%c5, %c0_22, %c0_23] : memref<9x2x2xbf16, #tpu.memory_space<vmem>>, vector<1x2x2xbf16>
    %40 = vector.shape_cast %39 : vector<1x2x2xbf16> to vector<2x2xbf16>
    %cst_24 = arith.constant dense<0.000000e+00> : vector<2x1024xf32>
    %41 = tpu.matmul %40, %38, %cst_24 {dimension_numbers = #tpu.dot_dimension_numbers<[1], [0], [0], [1], [0, 0, 1, 1], [], []>} : vector<2x2xbf16>, vector<2x1024xbf16>, vector<2x1024xf32> -> vector<2x1024xf32>
    %42 = arith.addf %35, %41 : vector<2x1024xf32>
    %43 = vector.extract_strided_slice %5 {offsets = [0, 64], sizes = [2, 1024], strides = [1, 1]} : vector<2x1090xbf16> to vector<2x1024xbf16>
    %44 = vector.broadcast %0 : vector<1x1024xbf16> to vector<2x1024xbf16>
    %45 = arith.mulf %43, %44 : vector<2x1024xbf16>
    %c6 = arith.constant 6 : index
    %c0_25 = arith.constant 0 : index
    %c0_26 = arith.constant 0 : index
    %46 = vector.load %arg3[%c6, %c0_25, %c0_26] : memref<9x2x2xbf16, #tpu.memory_space<vmem>>, vector<1x2x2xbf16>
    %47 = vector.shape_cast %46 : vector<1x2x2xbf16> to vector<2x2xbf16>
    %cst_27 = arith.constant dense<0.000000e+00> : vector<2x1024xf32>
    %48 = tpu.matmul %47, %45, %cst_27 {dimension_numbers = #tpu.dot_dimension_numbers<[1], [0], [0], [1], [0, 0, 1, 1], [], []>} : vector<2x2xbf16>, vector<2x1024xbf16>, vector<2x1024xf32> -> vector<2x1024xf32>
    %49 = arith.addf %42, %48 : vector<2x1024xf32>
    %50 = vector.extract_strided_slice %5 {offsets = [0, 65], sizes = [2, 1024], strides = [1, 1]} : vector<2x1090xbf16> to vector<2x1024xbf16>
    %c7 = arith.constant 7 : index
    %c0_28 = arith.constant 0 : index
    %c0_29 = arith.constant 0 : index
    %51 = vector.load %arg3[%c7, %c0_28, %c0_29] : memref<9x2x2xbf16, #tpu.memory_space<vmem>>, vector<1x2x2xbf16>
    %52 = vector.shape_cast %51 : vector<1x2x2xbf16> to vector<2x2xbf16>
    %cst_30 = arith.constant dense<0.000000e+00> : vector<2x1024xf32>
    %53 = tpu.matmul %52, %50, %cst_30 {dimension_numbers = #tpu.dot_dimension_numbers<[1], [0], [0], [1], [0, 0, 1, 1], [], []>} : vector<2x2xbf16>, vector<2x1024xbf16>, vector<2x1024xf32> -> vector<2x1024xf32>
    %54 = arith.addf %49, %53 : vector<2x1024xf32>
    %55 = vector.extract_strided_slice %5 {offsets = [0, 66], sizes = [2, 1024], strides = [1, 1]} : vector<2x1090xbf16> to vector<2x1024xbf16>
    %56 = vector.broadcast %1 : vector<1x1024xbf16> to vector<2x1024xbf16>
    %57 = arith.mulf %55, %56 : vector<2x1024xbf16>
    %c8 = arith.constant 8 : index
    %c0_31 = arith.constant 0 : index
    %c0_32 = arith.constant 0 : index
    %58 = vector.load %arg3[%c8, %c0_31, %c0_32] : memref<9x2x2xbf16, #tpu.memory_space<vmem>>, vector<1x2x2xbf16>
    %59 = vector.shape_cast %58 : vector<1x2x2xbf16> to vector<2x2xbf16>
    %cst_33 = arith.constant dense<0.000000e+00> : vector<2x1024xf32>
    %60 = tpu.matmul %59, %57, %cst_33 {dimension_numbers = #tpu.dot_dimension_numbers<[1], [0], [0], [1], [0, 0, 1, 1], [], []>} : vector<2x2xbf16>, vector<2x1024xbf16>, vector<2x1024xf32> -> vector<2x1024xf32>
    %61 = arith.addf %54, %60 : vector<2x1024xf32>
    %c0_34 = arith.constant 0 : index
    %c0_35 = arith.constant 0 : index
    %c0_36 = arith.constant 0 : index
    %62 = vector.load %arg2[%c0_34, %c0_35, %c0_36] : memref<1x2x1024xf32, #tpu.memory_space<vmem>>, vector<1x2x1024xf32>
    %63 = vector.shape_cast %62 : vector<1x2x1024xf32> to vector<2x1024xf32>
    %64 = arith.truncf %63 : vector<2x1024xf32> to vector<2x1024xbf16>
    %cst_37 = arith.constant 0.000000e+00 : bf16
    %65 = vector.broadcast %cst_37 : bf16 to vector<2x33xbf16>
    %66 = tpu.concatenate %65, %64, %65 in 1 : vector<2x33xbf16>, vector<2x1024xbf16>, vector<2x33xbf16> -> vector<2x1090xbf16>
    %67 = vector.extract_strided_slice %66 {offsets = [0, 0], sizes = [2, 1024], strides = [1, 1]} : vector<2x1090xbf16> to vector<2x1024xbf16>
    %68 = vector.broadcast %0 : vector<1x1024xbf16> to vector<2x1024xbf16>
    %69 = arith.mulf %67, %68 : vector<2x1024xbf16>
    %c0_38 = arith.constant 0 : index
    %c0_39 = arith.constant 0 : index
    %c0_40 = arith.constant 0 : index
    %70 = vector.load %arg4[%c0_38, %c0_39, %c0_40] : memref<9x2x2xbf16, #tpu.memory_space<vmem>>, vector<1x2x2xbf16>
    %71 = vector.shape_cast %70 : vector<1x2x2xbf16> to vector<2x2xbf16>
    %cst_41 = arith.constant dense<0.000000e+00> : vector<2x1024xf32>
    %72 = tpu.matmul %71, %69, %cst_41 {dimension_numbers = #tpu.dot_dimension_numbers<[1], [0], [0], [1], [0, 0, 1, 1], [], []>} : vector<2x2xbf16>, vector<2x1024xbf16>, vector<2x1024xf32> -> vector<2x1024xf32>
    %73 = arith.addf %61, %72 : vector<2x1024xf32>
    %74 = vector.extract_strided_slice %66 {offsets = [0, 1], sizes = [2, 1024], strides = [1, 1]} : vector<2x1090xbf16> to vector<2x1024xbf16>
    %c1_42 = arith.constant 1 : index
    %c0_43 = arith.constant 0 : index
    %c0_44 = arith.constant 0 : index
    %75 = vector.load %arg4[%c1_42, %c0_43, %c0_44] : memref<9x2x2xbf16, #tpu.memory_space<vmem>>, vector<1x2x2xbf16>
    %76 = vector.shape_cast %75 : vector<1x2x2xbf16> to vector<2x2xbf16>
    %cst_45 = arith.constant dense<0.000000e+00> : vector<2x1024xf32>
    %77 = tpu.matmul %76, %74, %cst_45 {dimension_numbers = #tpu.dot_dimension_numbers<[1], [0], [0], [1], [0, 0, 1, 1], [], []>} : vector<2x2xbf16>, vector<2x1024xbf16>, vector<2x1024xf32> -> vector<2x1024xf32>
    %78 = arith.addf %73, %77 : vector<2x1024xf32>
    %79 = vector.extract_strided_slice %66 {offsets = [0, 2], sizes = [2, 1024], strides = [1, 1]} : vector<2x1090xbf16> to vector<2x1024xbf16>
    %80 = vector.broadcast %1 : vector<1x1024xbf16> to vector<2x1024xbf16>
    %81 = arith.mulf %79, %80 : vector<2x1024xbf16>
    %c2_46 = arith.constant 2 : index
    %c0_47 = arith.constant 0 : index
    %c0_48 = arith.constant 0 : index
    %82 = vector.load %arg4[%c2_46, %c0_47, %c0_48] : memref<9x2x2xbf16, #tpu.memory_space<vmem>>, vector<1x2x2xbf16>
    %83 = vector.shape_cast %82 : vector<1x2x2xbf16> to vector<2x2xbf16>
    %cst_49 = arith.constant dense<0.000000e+00> : vector<2x1024xf32>
    %84 = tpu.matmul %83, %81, %cst_49 {dimension_numbers = #tpu.dot_dimension_numbers<[1], [0], [0], [1], [0, 0, 1, 1], [], []>} : vector<2x2xbf16>, vector<2x1024xbf16>, vector<2x1024xf32> -> vector<2x1024xf32>
    %85 = arith.addf %78, %84 : vector<2x1024xf32>
    %86 = vector.extract_strided_slice %66 {offsets = [0, 32], sizes = [2, 1024], strides = [1, 1]} : vector<2x1090xbf16> to vector<2x1024xbf16>
    %87 = vector.broadcast %0 : vector<1x1024xbf16> to vector<2x1024xbf16>
    %88 = arith.mulf %86, %87 : vector<2x1024xbf16>
    %c3_50 = arith.constant 3 : index
    %c0_51 = arith.constant 0 : index
    %c0_52 = arith.constant 0 : index
    %89 = vector.load %arg4[%c3_50, %c0_51, %c0_52] : memref<9x2x2xbf16, #tpu.memory_space<vmem>>, vector<1x2x2xbf16>
    %90 = vector.shape_cast %89 : vector<1x2x2xbf16> to vector<2x2xbf16>
    %cst_53 = arith.constant dense<0.000000e+00> : vector<2x1024xf32>
    %91 = tpu.matmul %90, %88, %cst_53 {dimension_numbers = #tpu.dot_dimension_numbers<[1], [0], [0], [1], [0, 0, 1, 1], [], []>} : vector<2x2xbf16>, vector<2x1024xbf16>, vector<2x1024xf32> -> vector<2x1024xf32>
    %92 = arith.addf %85, %91 : vector<2x1024xf32>
    %93 = vector.extract_strided_slice %66 {offsets = [0, 33], sizes = [2, 1024], strides = [1, 1]} : vector<2x1090xbf16> to vector<2x1024xbf16>
    %c4_54 = arith.constant 4 : index
    %c0_55 = arith.constant 0 : index
    %c0_56 = arith.constant 0 : index
    %94 = vector.load %arg4[%c4_54, %c0_55, %c0_56] : memref<9x2x2xbf16, #tpu.memory_space<vmem>>, vector<1x2x2xbf16>
    %95 = vector.shape_cast %94 : vector<1x2x2xbf16> to vector<2x2xbf16>
    %cst_57 = arith.constant dense<0.000000e+00> : vector<2x1024xf32>
    %96 = tpu.matmul %95, %93, %cst_57 {dimension_numbers = #tpu.dot_dimension_numbers<[1], [0], [0], [1], [0, 0, 1, 1], [], []>} : vector<2x2xbf16>, vector<2x1024xbf16>, vector<2x1024xf32> -> vector<2x1024xf32>
    %97 = arith.addf %92, %96 : vector<2x1024xf32>
    %98 = vector.extract_strided_slice %66 {offsets = [0, 34], sizes = [2, 1024], strides = [1, 1]} : vector<2x1090xbf16> to vector<2x1024xbf16>
    %99 = vector.broadcast %1 : vector<1x1024xbf16> to vector<2x1024xbf16>
    %100 = arith.mulf %98, %99 : vector<2x1024xbf16>
    %c5_58 = arith.constant 5 : index
    %c0_59 = arith.constant 0 : index
    %c0_60 = arith.constant 0 : index
    %101 = vector.load %arg4[%c5_58, %c0_59, %c0_60] : memref<9x2x2xbf16, #tpu.memory_space<vmem>>, vector<1x2x2xbf16>
    %102 = vector.shape_cast %101 : vector<1x2x2xbf16> to vector<2x2xbf16>
    %cst_61 = arith.constant dense<0.000000e+00> : vector<2x1024xf32>
    %103 = tpu.matmul %102, %100, %cst_61 {dimension_numbers = #tpu.dot_dimension_numbers<[1], [0], [0], [1], [0, 0, 1, 1], [], []>} : vector<2x2xbf16>, vector<2x1024xbf16>, vector<2x1024xf32> -> vector<2x1024xf32>
    %104 = arith.addf %97, %103 : vector<2x1024xf32>
    %105 = vector.extract_strided_slice %66 {offsets = [0, 64], sizes = [2, 1024], strides = [1, 1]} : vector<2x1090xbf16> to vector<2x1024xbf16>
    %106 = vector.broadcast %0 : vector<1x1024xbf16> to vector<2x1024xbf16>
    %107 = arith.mulf %105, %106 : vector<2x1024xbf16>
    %c6_62 = arith.constant 6 : index
    %c0_63 = arith.constant 0 : index
    %c0_64 = arith.constant 0 : index
    %108 = vector.load %arg4[%c6_62, %c0_63, %c0_64] : memref<9x2x2xbf16, #tpu.memory_space<vmem>>, vector<1x2x2xbf16>
    %109 = vector.shape_cast %108 : vector<1x2x2xbf16> to vector<2x2xbf16>
    %cst_65 = arith.constant dense<0.000000e+00> : vector<2x1024xf32>
    %110 = tpu.matmul %109, %107, %cst_65 {dimension_numbers = #tpu.dot_dimension_numbers<[1], [0], [0], [1], [0, 0, 1, 1], [], []>} : vector<2x2xbf16>, vector<2x1024xbf16>, vector<2x1024xf32> -> vector<2x1024xf32>
    %111 = arith.addf %104, %110 : vector<2x1024xf32>
    %112 = vector.extract_strided_slice %66 {offsets = [0, 65], sizes = [2, 1024], strides = [1, 1]} : vector<2x1090xbf16> to vector<2x1024xbf16>
    %c7_66 = arith.constant 7 : index
    %c0_67 = arith.constant 0 : index
    %c0_68 = arith.constant 0 : index
    %113 = vector.load %arg4[%c7_66, %c0_67, %c0_68] : memref<9x2x2xbf16, #tpu.memory_space<vmem>>, vector<1x2x2xbf16>
    %114 = vector.shape_cast %113 : vector<1x2x2xbf16> to vector<2x2xbf16>
    %cst_69 = arith.constant dense<0.000000e+00> : vector<2x1024xf32>
    %115 = tpu.matmul %114, %112, %cst_69 {dimension_numbers = #tpu.dot_dimension_numbers<[1], [0], [0], [1], [0, 0, 1, 1], [], []>} : vector<2x2xbf16>, vector<2x1024xbf16>, vector<2x1024xf32> -> vector<2x1024xf32>
    %116 = arith.addf %111, %115 : vector<2x1024xf32>
    %117 = vector.extract_strided_slice %66 {offsets = [0, 66], sizes = [2, 1024], strides = [1, 1]} : vector<2x1090xbf16> to vector<2x1024xbf16>
    %118 = vector.broadcast %1 : vector<1x1024xbf16> to vector<2x1024xbf16>
    %119 = arith.mulf %117, %118 : vector<2x1024xbf16>
    %c8_70 = arith.constant 8 : index
    %c0_71 = arith.constant 0 : index
    %c0_72 = arith.constant 0 : index
    %120 = vector.load %arg4[%c8_70, %c0_71, %c0_72] : memref<9x2x2xbf16, #tpu.memory_space<vmem>>, vector<1x2x2xbf16>
    %121 = vector.shape_cast %120 : vector<1x2x2xbf16> to vector<2x2xbf16>
    %cst_73 = arith.constant dense<0.000000e+00> : vector<2x1024xf32>
    %122 = tpu.matmul %121, %119, %cst_73 {dimension_numbers = #tpu.dot_dimension_numbers<[1], [0], [0], [1], [0, 0, 1, 1], [], []>} : vector<2x2xbf16>, vector<2x1024xbf16>, vector<2x1024xf32> -> vector<2x1024xf32>
    %123 = arith.addf %116, %122 : vector<2x1024xf32>
    %c0_74 = arith.constant 0 : index
    %c0_75 = arith.constant 0 : index
    %124 = vector.load %arg7[%c0_74, %c0_75] : memref<2x1xf32, #tpu.memory_space<vmem>>, vector<2x1xf32>
    %125 = vector.broadcast %124 : vector<2x1xf32> to vector<2x1024xf32>
    %126 = arith.mulf %123, %125 : vector<2x1024xf32>
    %c0_76 = arith.constant 0 : index
    %c0_77 = arith.constant 0 : index
    %127 = vector.load %arg8[%c0_76, %c0_77] : memref<2x1xf32, #tpu.memory_space<vmem>>, vector<2x1xf32>
    %128 = vector.broadcast %127 : vector<2x1xf32> to vector<2x1024xf32>
    %129 = arith.addf %126, %128 : vector<2x1024xf32>
    %cst_78 = arith.constant 0.000000e+00 : f32
    %130 = vector.broadcast %cst_78 : f32 to vector<2x1024xf32>
    %131 = arith.cmpf oge, %129, %130 : vector<2x1024xf32>
    %cst_79 = arith.constant 0.00999999977 : f32
    %132 = vector.broadcast %cst_79 : f32 to vector<2x1024xf32>
    %133 = arith.mulf %132, %129 : vector<2x1024xf32>
    %134 = arith.select %131, %129, %133 : vector<2x1024xi1>, vector<2x1024xf32>
    %135 = arith.truncf %134 : vector<2x1024xf32> to vector<2x1024xbf16>
    %c0_80 = arith.constant 0 : index
    %c0_81 = arith.constant 0 : index
    %c0_82 = arith.constant 0 : index
    %136 = vector.load %arg9[%c0_80, %c0_81, %c0_82] : memref<1x2x1024xbf16, #tpu.memory_space<vmem>>, vector<1x2x1024xbf16>
    %137 = vector.shape_cast %136 : vector<1x2x1024xbf16> to vector<2x1024xbf16>
    %138 = vector.shape_cast %135 : vector<2x1024xbf16> to vector<1x2x1024xbf16>
    tpu.vector_store %arg9[%c0_80, %c0_81, %c0_82], %138 {strides = array<i32>} : memref<1x2x1024xbf16, #tpu.memory_space<vmem>>, vector<1x2x1024xbf16>,
    return
  }
  func.func @transform_0(%arg0: i32) -> (i32, i32, i32) {
    %c0_i32 = arith.constant 0 : i32
    %c0_i32_0 = arith.constant 0 : i32
    %c0_i32_1 = arith.constant 0 : i32
    return %arg0, %c0_i32, %c0_i32_0 : i32, i32, i32
  }
  func.func @transform_1(%arg0: i32) -> (i32, i32, i32) {
    %c0_i32 = arith.constant 0 : i32
    %c0_i32_0 = arith.constant 0 : i32
    %c0_i32_1 = arith.constant 0 : i32
    return %arg0, %c0_i32, %c0_i32_0 : i32, i32, i32
  }
  func.func @transform_2(%arg0: i32) -> (i32, i32, i32) {
    %c0_i32 = arith.constant 0 : i32
    %c0_i32_0 = arith.constant 0 : i32
    %c0_i32_1 = arith.constant 0 : i32
    %c0_i32_2 = arith.constant 0 : i32
    return %c0_i32, %c0_i32_0, %c0_i32_1 : i32, i32, i32
  }
  func.func @transform_3(%arg0: i32) -> (i32, i32, i32) {
    %c0_i32 = arith.constant 0 : i32
    %c0_i32_0 = arith.constant 0 : i32
    %c0_i32_1 = arith.constant 0 : i32
    %c0_i32_2 = arith.constant 0 : i32
    return %c0_i32, %c0_i32_0, %c0_i32_1 : i32, i32, i32
  }
  func.func @transform_4(%arg0: i32) -> (i32, i32) {
    %c0_i32 = arith.constant 0 : i32
    %c0_i32_0 = arith.constant 0 : i32
    %c0_i32_1 = arith.constant 0 : i32
    return %c0_i32, %c0_i32_0 : i32, i32
  }
  func.func @transform_5(%arg0: i32) -> (i32, i32) {
    %c0_i32 = arith.constant 0 : i32
    %c0_i32_0 = arith.constant 0 : i32
    %c0_i32_1 = arith.constant 0 : i32
    return %c0_i32, %c0_i32_0 : i32, i32
  }
  func.func @transform_6(%arg0: i32) -> (i32, i32) {
    %c0_i32 = arith.constant 0 : i32
    %c0_i32_0 = arith.constant 0 : i32
    %c0_i32_1 = arith.constant 0 : i32
    return %c0_i32, %c0_i32_0 : i32, i32
  }
  func.func @transform_7(%arg0: i32) -> (i32, i32) {
    %c0_i32 = arith.constant 0 : i32
    %c0_i32_0 = arith.constant 0 : i32
    %c0_i32_1 = arith.constant 0 : i32
    return %c0_i32, %c0_i32_0 : i32, i32
  }
  func.func @transform_8(%arg0: i32) -> (i32, i32, i32) {
    %c0_i32 = arith.constant 0 : i32
    %c0_i32_0 = arith.constant 0 : i32
    %c0_i32_1 = arith.constant 0 : i32
    return %arg0, %c0_i32, %c0_i32_0 : i32, i32, i32
  }
}

module attributes {stable_mosaic.version = 11 : i64} {
  func.func @kernel(%arg0: i32, %arg1: memref<1x2x1024xbf16, #tpu.memory_space<vmem>>, %arg2: memref<9x2x2xbf16, #tpu.memory_space<vmem>>, %arg3: memref<1x1024xbf16, #tpu.memory_space<vmem>>, %arg4: memref<1x1024xbf16, #tpu.memory_space<vmem>>, %arg5: memref<2x1xf32, #tpu.memory_space<vmem>>, %arg6: memref<2x1xf32, #tpu.memory_space<vmem>>, %arg7: memref<1x2x1024xf32, #tpu.memory_space<vmem>>) attributes {dimension_semantics = [#tpu.dimension_semantics<parallel>], iteration_bounds = array<i64: 2>, scalar_prefetch = 0 : i64, scratch_operands = 0 : i64, tpu.core_type = #tpu.core_type<tc>, window_params = [{transform_indices = @transform_0, window_bounds = array<i64: 1, 2, 1024>}, {pipeline_mode = #tpu.pipeline_mode<synchronous>, transform_indices = @transform_1, window_bounds = array<i64: 9, 2, 2>}, {pipeline_mode = #tpu.pipeline_mode<synchronous>, transform_indices = @transform_2, window_bounds = array<i64: 1, 1024>}, {pipeline_mode = #tpu.pipeline_mode<synchronous>, transform_indices = @transform_3, window_bounds = array<i64: 1, 1024>}, {pipeline_mode = #tpu.pipeline_mode<synchronous>, transform_indices = @transform_4, window_bounds = array<i64: 2, 1>}, {pipeline_mode = #tpu.pipeline_mode<synchronous>, transform_indices = @transform_5, window_bounds = array<i64: 2, 1>}, {transform_indices = @transform_6, window_bounds = array<i64: 1, 2, 1024>}]} {
    %c0 = arith.constant 0 : index
    %c0_0 = arith.constant 0 : index
    %0 = vector.load %arg3[%c0, %c0_0] : memref<1x1024xbf16, #tpu.memory_space<vmem>>, vector<1x1024xbf16>
    %c0_1 = arith.constant 0 : index
    %c0_2 = arith.constant 0 : index
    %1 = vector.load %arg4[%c0_1, %c0_2] : memref<1x1024xbf16, #tpu.memory_space<vmem>>, vector<1x1024xbf16>
    %c0_3 = arith.constant 0 : index
    %c0_4 = arith.constant 0 : index
    %c0_5 = arith.constant 0 : index
    %2 = vector.load %arg1[%c0_3, %c0_4, %c0_5] : memref<1x2x1024xbf16, #tpu.memory_space<vmem>>, vector<1x2x1024xbf16>
    %3 = vector.shape_cast %2 : vector<1x2x1024xbf16> to vector<2x1024xbf16>
    %cst = arith.constant 0.000000e+00 : bf16
    %4 = vector.broadcast %cst : bf16 to vector<2x33xbf16>
    %5 = tpu.concatenate %4, %3, %4 in 1 : vector<2x33xbf16>, vector<2x1024xbf16>, vector<2x33xbf16> -> vector<2x1090xbf16>
    %6 = vector.extract_strided_slice %5 {offsets = [0, 0], sizes = [2, 1024], strides = [1, 1]} : vector<2x1090xbf16> to vector<2x1024xbf16>
    %7 = vector.broadcast %0 : vector<1x1024xbf16> to vector<2x1024xbf16>
    %8 = arith.mulf %6, %7 : vector<2x1024xbf16>
    %c0_6 = arith.constant 0 : index
    %c0_7 = arith.constant 0 : index
    %c0_8 = arith.constant 0 : index
    %9 = vector.load %arg2[%c0_6, %c0_7, %c0_8] : memref<9x2x2xbf16, #tpu.memory_space<vmem>>, vector<1x2x2xbf16>
    %10 = vector.shape_cast %9 : vector<1x2x2xbf16> to vector<2x2xbf16>
    %cst_9 = arith.constant dense<0.000000e+00> : vector<2x1024xf32>
    %11 = tpu.matmul %10, %8, %cst_9 {dimension_numbers = #tpu.dot_dimension_numbers<[1], [0], [0], [1], [0, 0, 1, 1], [], []>} : vector<2x2xbf16>, vector<2x1024xbf16>, vector<2x1024xf32> -> vector<2x1024xf32>
    %12 = vector.extract_strided_slice %5 {offsets = [0, 1], sizes = [2, 1024], strides = [1, 1]} : vector<2x1090xbf16> to vector<2x1024xbf16>
    %c1 = arith.constant 1 : index
    %c0_10 = arith.constant 0 : index
    %c0_11 = arith.constant 0 : index
    %13 = vector.load %arg2[%c1, %c0_10, %c0_11] : memref<9x2x2xbf16, #tpu.memory_space<vmem>>, vector<1x2x2xbf16>
    %14 = vector.shape_cast %13 : vector<1x2x2xbf16> to vector<2x2xbf16>
    %cst_12 = arith.constant dense<0.000000e+00> : vector<2x1024xf32>
    %15 = tpu.matmul %14, %12, %cst_12 {dimension_numbers = #tpu.dot_dimension_numbers<[1], [0], [0], [1], [0, 0, 1, 1], [], []>} : vector<2x2xbf16>, vector<2x1024xbf16>, vector<2x1024xf32> -> vector<2x1024xf32>
    %16 = arith.addf %11, %15 : vector<2x1024xf32>
    %17 = vector.extract_strided_slice %5 {offsets = [0, 2], sizes = [2, 1024], strides = [1, 1]} : vector<2x1090xbf16> to vector<2x1024xbf16>
    %18 = vector.broadcast %1 : vector<1x1024xbf16> to vector<2x1024xbf16>
    %19 = arith.mulf %17, %18 : vector<2x1024xbf16>
    %c2 = arith.constant 2 : index
    %c0_13 = arith.constant 0 : index
    %c0_14 = arith.constant 0 : index
    %20 = vector.load %arg2[%c2, %c0_13, %c0_14] : memref<9x2x2xbf16, #tpu.memory_space<vmem>>, vector<1x2x2xbf16>
    %21 = vector.shape_cast %20 : vector<1x2x2xbf16> to vector<2x2xbf16>
    %cst_15 = arith.constant dense<0.000000e+00> : vector<2x1024xf32>
    %22 = tpu.matmul %21, %19, %cst_15 {dimension_numbers = #tpu.dot_dimension_numbers<[1], [0], [0], [1], [0, 0, 1, 1], [], []>} : vector<2x2xbf16>, vector<2x1024xbf16>, vector<2x1024xf32> -> vector<2x1024xf32>
    %23 = arith.addf %16, %22 : vector<2x1024xf32>
    %24 = vector.extract_strided_slice %5 {offsets = [0, 32], sizes = [2, 1024], strides = [1, 1]} : vector<2x1090xbf16> to vector<2x1024xbf16>
    %25 = vector.broadcast %0 : vector<1x1024xbf16> to vector<2x1024xbf16>
    %26 = arith.mulf %24, %25 : vector<2x1024xbf16>
    %c3 = arith.constant 3 : index
    %c0_16 = arith.constant 0 : index
    %c0_17 = arith.constant 0 : index
    %27 = vector.load %arg2[%c3, %c0_16, %c0_17] : memref<9x2x2xbf16, #tpu.memory_space<vmem>>, vector<1x2x2xbf16>
    %28 = vector.shape_cast %27 : vector<1x2x2xbf16> to vector<2x2xbf16>
    %cst_18 = arith.constant dense<0.000000e+00> : vector<2x1024xf32>
    %29 = tpu.matmul %28, %26, %cst_18 {dimension_numbers = #tpu.dot_dimension_numbers<[1], [0], [0], [1], [0, 0, 1, 1], [], []>} : vector<2x2xbf16>, vector<2x1024xbf16>, vector<2x1024xf32> -> vector<2x1024xf32>
    %30 = arith.addf %23, %29 : vector<2x1024xf32>
    %31 = vector.extract_strided_slice %5 {offsets = [0, 33], sizes = [2, 1024], strides = [1, 1]} : vector<2x1090xbf16> to vector<2x1024xbf16>
    %c4 = arith.constant 4 : index
    %c0_19 = arith.constant 0 : index
    %c0_20 = arith.constant 0 : index
    %32 = vector.load %arg2[%c4, %c0_19, %c0_20] : memref<9x2x2xbf16, #tpu.memory_space<vmem>>, vector<1x2x2xbf16>
    %33 = vector.shape_cast %32 : vector<1x2x2xbf16> to vector<2x2xbf16>
    %cst_21 = arith.constant dense<0.000000e+00> : vector<2x1024xf32>
    %34 = tpu.matmul %33, %31, %cst_21 {dimension_numbers = #tpu.dot_dimension_numbers<[1], [0], [0], [1], [0, 0, 1, 1], [], []>} : vector<2x2xbf16>, vector<2x1024xbf16>, vector<2x1024xf32> -> vector<2x1024xf32>
    %35 = arith.addf %30, %34 : vector<2x1024xf32>
    %36 = vector.extract_strided_slice %5 {offsets = [0, 34], sizes = [2, 1024], strides = [1, 1]} : vector<2x1090xbf16> to vector<2x1024xbf16>
    %37 = vector.broadcast %1 : vector<1x1024xbf16> to vector<2x1024xbf16>
    %38 = arith.mulf %36, %37 : vector<2x1024xbf16>
    %c5 = arith.constant 5 : index
    %c0_22 = arith.constant 0 : index
    %c0_23 = arith.constant 0 : index
    %39 = vector.load %arg2[%c5, %c0_22, %c0_23] : memref<9x2x2xbf16, #tpu.memory_space<vmem>>, vector<1x2x2xbf16>
    %40 = vector.shape_cast %39 : vector<1x2x2xbf16> to vector<2x2xbf16>
    %cst_24 = arith.constant dense<0.000000e+00> : vector<2x1024xf32>
    %41 = tpu.matmul %40, %38, %cst_24 {dimension_numbers = #tpu.dot_dimension_numbers<[1], [0], [0], [1], [0, 0, 1, 1], [], []>} : vector<2x2xbf16>, vector<2x1024xbf16>, vector<2x1024xf32> -> vector<2x1024xf32>
    %42 = arith.addf %35, %41 : vector<2x1024xf32>
    %43 = vector.extract_strided_slice %5 {offsets = [0, 64], sizes = [2, 1024], strides = [1, 1]} : vector<2x1090xbf16> to vector<2x1024xbf16>
    %44 = vector.broadcast %0 : vector<1x1024xbf16> to vector<2x1024xbf16>
    %45 = arith.mulf %43, %44 : vector<2x1024xbf16>
    %c6 = arith.constant 6 : index
    %c0_25 = arith.constant 0 : index
    %c0_26 = arith.constant 0 : index
    %46 = vector.load %arg2[%c6, %c0_25, %c0_26] : memref<9x2x2xbf16, #tpu.memory_space<vmem>>, vector<1x2x2xbf16>
    %47 = vector.shape_cast %46 : vector<1x2x2xbf16> to vector<2x2xbf16>
    %cst_27 = arith.constant dense<0.000000e+00> : vector<2x1024xf32>
    %48 = tpu.matmul %47, %45, %cst_27 {dimension_numbers = #tpu.dot_dimension_numbers<[1], [0], [0], [1], [0, 0, 1, 1], [], []>} : vector<2x2xbf16>, vector<2x1024xbf16>, vector<2x1024xf32> -> vector<2x1024xf32>
    %49 = arith.addf %42, %48 : vector<2x1024xf32>
    %50 = vector.extract_strided_slice %5 {offsets = [0, 65], sizes = [2, 1024], strides = [1, 1]} : vector<2x1090xbf16> to vector<2x1024xbf16>
    %c7 = arith.constant 7 : index
    %c0_28 = arith.constant 0 : index
    %c0_29 = arith.constant 0 : index
    %51 = vector.load %arg2[%c7, %c0_28, %c0_29] : memref<9x2x2xbf16, #tpu.memory_space<vmem>>, vector<1x2x2xbf16>
    %52 = vector.shape_cast %51 : vector<1x2x2xbf16> to vector<2x2xbf16>
    %cst_30 = arith.constant dense<0.000000e+00> : vector<2x1024xf32>
    %53 = tpu.matmul %52, %50, %cst_30 {dimension_numbers = #tpu.dot_dimension_numbers<[1], [0], [0], [1], [0, 0, 1, 1], [], []>} : vector<2x2xbf16>, vector<2x1024xbf16>, vector<2x1024xf32> -> vector<2x1024xf32>
    %54 = arith.addf %49, %53 : vector<2x1024xf32>
    %55 = vector.extract_strided_slice %5 {offsets = [0, 66], sizes = [2, 1024], strides = [1, 1]} : vector<2x1090xbf16> to vector<2x1024xbf16>
    %56 = vector.broadcast %1 : vector<1x1024xbf16> to vector<2x1024xbf16>
    %57 = arith.mulf %55, %56 : vector<2x1024xbf16>
    %c8 = arith.constant 8 : index
    %c0_31 = arith.constant 0 : index
    %c0_32 = arith.constant 0 : index
    %58 = vector.load %arg2[%c8, %c0_31, %c0_32] : memref<9x2x2xbf16, #tpu.memory_space<vmem>>, vector<1x2x2xbf16>
    %59 = vector.shape_cast %58 : vector<1x2x2xbf16> to vector<2x2xbf16>
    %cst_33 = arith.constant dense<0.000000e+00> : vector<2x1024xf32>
    %60 = tpu.matmul %59, %57, %cst_33 {dimension_numbers = #tpu.dot_dimension_numbers<[1], [0], [0], [1], [0, 0, 1, 1], [], []>} : vector<2x2xbf16>, vector<2x1024xbf16>, vector<2x1024xf32> -> vector<2x1024xf32>
    %61 = arith.addf %54, %60 : vector<2x1024xf32>
    %c0_34 = arith.constant 0 : index
    %c0_35 = arith.constant 0 : index
    %62 = vector.load %arg5[%c0_34, %c0_35] : memref<2x1xf32, #tpu.memory_space<vmem>>, vector<2x1xf32>
    %63 = vector.broadcast %62 : vector<2x1xf32> to vector<2x1024xf32>
    %64 = arith.mulf %61, %63 : vector<2x1024xf32>
    %c0_36 = arith.constant 0 : index
    %c0_37 = arith.constant 0 : index
    %65 = vector.load %arg6[%c0_36, %c0_37] : memref<2x1xf32, #tpu.memory_space<vmem>>, vector<2x1xf32>
    %66 = vector.broadcast %65 : vector<2x1xf32> to vector<2x1024xf32>
    %67 = arith.addf %64, %66 : vector<2x1024xf32>
    %cst_38 = arith.constant 0.000000e+00 : f32
    %68 = vector.broadcast %cst_38 : f32 to vector<2x1024xf32>
    %69 = arith.cmpf oge, %67, %68 : vector<2x1024xf32>
    %cst_39 = arith.constant 0.00999999977 : f32
    %70 = vector.broadcast %cst_39 : f32 to vector<2x1024xf32>
    %71 = arith.mulf %70, %67 : vector<2x1024xf32>
    %72 = arith.select %69, %67, %71 : vector<2x1024xi1>, vector<2x1024xf32>
    %c0_40 = arith.constant 0 : index
    %c0_41 = arith.constant 0 : index
    %c0_42 = arith.constant 0 : index
    %73 = vector.load %arg7[%c0_40, %c0_41, %c0_42] : memref<1x2x1024xf32, #tpu.memory_space<vmem>>, vector<1x2x1024xf32>
    %74 = vector.shape_cast %73 : vector<1x2x1024xf32> to vector<2x1024xf32>
    %75 = vector.shape_cast %72 : vector<2x1024xf32> to vector<1x2x1024xf32>
    tpu.vector_store %arg7[%c0_40, %c0_41, %c0_42], %75 {strides = array<i32>} : memref<1x2x1024xf32, #tpu.memory_space<vmem>>, vector<1x2x1024xf32>,
    return
  }
  func.func @transform_0(%arg0: i32) -> (i32, i32, i32) {
    %c0_i32 = arith.constant 0 : i32
    %c0_i32_0 = arith.constant 0 : i32
    %c0_i32_1 = arith.constant 0 : i32
    return %arg0, %c0_i32, %c0_i32_0 : i32, i32, i32
  }
  func.func @transform_1(%arg0: i32) -> (i32, i32, i32) {
    %c0_i32 = arith.constant 0 : i32
    %c0_i32_0 = arith.constant 0 : i32
    %c0_i32_1 = arith.constant 0 : i32
    %c0_i32_2 = arith.constant 0 : i32
    return %c0_i32, %c0_i32_0, %c0_i32_1 : i32, i32, i32
  }
  func.func @transform_2(%arg0: i32) -> (i32, i32) {
    %c0_i32 = arith.constant 0 : i32
    %c0_i32_0 = arith.constant 0 : i32
    %c0_i32_1 = arith.constant 0 : i32
    return %c0_i32, %c0_i32_0 : i32, i32
  }
  func.func @transform_3(%arg0: i32) -> (i32, i32) {
    %c0_i32 = arith.constant 0 : i32
    %c0_i32_0 = arith.constant 0 : i32
    %c0_i32_1 = arith.constant 0 : i32
    return %c0_i32, %c0_i32_0 : i32, i32
  }
  func.func @transform_4(%arg0: i32) -> (i32, i32) {
    %c0_i32 = arith.constant 0 : i32
    %c0_i32_0 = arith.constant 0 : i32
    %c0_i32_1 = arith.constant 0 : i32
    return %c0_i32, %c0_i32_0 : i32, i32
  }
  func.func @transform_5(%arg0: i32) -> (i32, i32) {
    %c0_i32 = arith.constant 0 : i32
    %c0_i32_0 = arith.constant 0 : i32
    %c0_i32_1 = arith.constant 0 : i32
    return %c0_i32, %c0_i32_0 : i32, i32
  }
  func.func @transform_6(%arg0: i32) -> (i32, i32, i32) {
    %c0_i32 = arith.constant 0 : i32
    %c0_i32_0 = arith.constant 0 : i32
    %c0_i32_1 = arith.constant 0 : i32
    return %arg0, %c0_i32, %c0_i32_0 : i32, i32, i32
  }
}

module attributes {stable_mosaic.version = 11 : i64} {
  func.func @kernel(%arg0: i32, %arg1: memref<1x4x256xf32, #tpu.memory_space<vmem>>, %arg2: memref<2x4xbf16, #tpu.memory_space<vmem>>, %arg3: memref<2x1xf32, #tpu.memory_space<vmem>>, %arg4: memref<2x1xf32, #tpu.memory_space<vmem>>, %arg5: memref<16x32xbf16, #tpu.memory_space<vmem>>, %arg6: memref<32x16xbf16, #tpu.memory_space<vmem>>, %arg7: memref<1x2x32x32xbf16, #tpu.memory_space<vmem>>) attributes {dimension_semantics = [#tpu.dimension_semantics<parallel>], iteration_bounds = array<i64: 2>, scalar_prefetch = 0 : i64, scratch_operands = 0 : i64, tpu.core_type = #tpu.core_type<tc>, window_params = [{transform_indices = @transform_0, window_bounds = array<i64: 1, 4, 256>}, {pipeline_mode = #tpu.pipeline_mode<synchronous>, transform_indices = @transform_1, window_bounds = array<i64: 2, 4>}, {pipeline_mode = #tpu.pipeline_mode<synchronous>, transform_indices = @transform_2, window_bounds = array<i64: 2, 1>}, {pipeline_mode = #tpu.pipeline_mode<synchronous>, transform_indices = @transform_3, window_bounds = array<i64: 2, 1>}, {pipeline_mode = #tpu.pipeline_mode<synchronous>, transform_indices = @transform_4, window_bounds = array<i64: 16, 32>}, {pipeline_mode = #tpu.pipeline_mode<synchronous>, transform_indices = @transform_5, window_bounds = array<i64: 32, 16>}, {transform_indices = @transform_6, window_bounds = array<i64: 1, 2, 32, 32>}]} {
    %c0 = arith.constant 0 : index
    %c0_0 = arith.constant 0 : index
    %c0_1 = arith.constant 0 : index
    %0 = vector.load %arg1[%c0, %c0_0, %c0_1] : memref<1x4x256xf32, #tpu.memory_space<vmem>>, vector<1x4x256xf32>
    %1 = vector.shape_cast %0 : vector<1x4x256xf32> to vector<4x256xf32>
    %2 = arith.truncf %1 : vector<4x256xf32> to vector<4x256xbf16>
    %c0_2 = arith.constant 0 : index
    %c0_3 = arith.constant 0 : index
    %3 = vector.load %arg2[%c0_2, %c0_3] : memref<2x4xbf16, #tpu.memory_space<vmem>>, vector<2x4xbf16>
    %cst = arith.constant dense<0.000000e+00> : vector<2x256xf32>
    %4 = tpu.matmul %3, %2, %cst {dimension_numbers = #tpu.dot_dimension_numbers<[1], [0], [0], [1], [0, 0, 1, 1], [], []>} : vector<2x4xbf16>, vector<4x256xbf16>, vector<2x256xf32> -> vector<2x256xf32>
    %c0_4 = arith.constant 0 : index
    %c0_5 = arith.constant 0 : index
    %5 = vector.load %arg3[%c0_4, %c0_5] : memref<2x1xf32, #tpu.memory_space<vmem>>, vector<2x1xf32>
    %6 = vector.broadcast %5 : vector<2x1xf32> to vector<2x256xf32>
    %7 = arith.mulf %4, %6 : vector<2x256xf32>
    %c0_6 = arith.constant 0 : index
    %c0_7 = arith.constant 0 : index
    %8 = vector.load %arg4[%c0_6, %c0_7] : memref<2x1xf32, #tpu.memory_space<vmem>>, vector<2x1xf32>
    %9 = vector.broadcast %8 : vector<2x1xf32> to vector<2x256xf32>
    %10 = arith.addf %7, %9 : vector<2x256xf32>
    %11 = vector.extract_strided_slice %10 {offsets = [0, 0], sizes = [2, 16], strides = [1, 1]} : vector<2x256xf32> to vector<2x16xf32>
    %12 = vector.extract_strided_slice %10 {offsets = [0, 16], sizes = [2, 16], strides = [1, 1]} : vector<2x256xf32> to vector<2x16xf32>
    %13 = vector.extract_strided_slice %10 {offsets = [0, 32], sizes = [2, 16], strides = [1, 1]} : vector<2x256xf32> to vector<2x16xf32>
    %14 = vector.extract_strided_slice %10 {offsets = [0, 48], sizes = [2, 16], strides = [1, 1]} : vector<2x256xf32> to vector<2x16xf32>
    %15 = vector.extract_strided_slice %10 {offsets = [0, 64], sizes = [2, 16], strides = [1, 1]} : vector<2x256xf32> to vector<2x16xf32>
    %16 = vector.extract_strided_slice %10 {offsets = [0, 80], sizes = [2, 16], strides = [1, 1]} : vector<2x256xf32> to vector<2x16xf32>
    %17 = vector.extract_strided_slice %10 {offsets = [0, 96], sizes = [2, 16], strides = [1, 1]} : vector<2x256xf32> to vector<2x16xf32>
    %18 = vector.extract_strided_slice %10 {offsets = [0, 112], sizes = [2, 16], strides = [1, 1]} : vector<2x256xf32> to vector<2x16xf32>
    %19 = vector.extract_strided_slice %10 {offsets = [0, 128], sizes = [2, 16], strides = [1, 1]} : vector<2x256xf32> to vector<2x16xf32>
    %20 = vector.extract_strided_slice %10 {offsets = [0, 144], sizes = [2, 16], strides = [1, 1]} : vector<2x256xf32> to vector<2x16xf32>
    %21 = vector.extract_strided_slice %10 {offsets = [0, 160], sizes = [2, 16], strides = [1, 1]} : vector<2x256xf32> to vector<2x16xf32>
    %22 = vector.extract_strided_slice %10 {offsets = [0, 176], sizes = [2, 16], strides = [1, 1]} : vector<2x256xf32> to vector<2x16xf32>
    %23 = vector.extract_strided_slice %10 {offsets = [0, 192], sizes = [2, 16], strides = [1, 1]} : vector<2x256xf32> to vector<2x16xf32>
    %24 = vector.extract_strided_slice %10 {offsets = [0, 208], sizes = [2, 16], strides = [1, 1]} : vector<2x256xf32> to vector<2x16xf32>
    %25 = vector.extract_strided_slice %10 {offsets = [0, 224], sizes = [2, 16], strides = [1, 1]} : vector<2x256xf32> to vector<2x16xf32>
    %26 = vector.extract_strided_slice %10 {offsets = [0, 240], sizes = [2, 16], strides = [1, 1]} : vector<2x256xf32> to vector<2x16xf32>
    %27 = vector.shape_cast %11 : vector<2x16xf32> to vector<2x1x16xf32>
    %28 = vector.shape_cast %12 : vector<2x16xf32> to vector<2x1x16xf32>
    %29 = vector.shape_cast %13 : vector<2x16xf32> to vector<2x1x16xf32>
    %30 = vector.shape_cast %14 : vector<2x16xf32> to vector<2x1x16xf32>
    %31 = vector.shape_cast %15 : vector<2x16xf32> to vector<2x1x16xf32>
    %32 = vector.shape_cast %16 : vector<2x16xf32> to vector<2x1x16xf32>
    %33 = vector.shape_cast %17 : vector<2x16xf32> to vector<2x1x16xf32>
    %34 = vector.shape_cast %18 : vector<2x16xf32> to vector<2x1x16xf32>
    %35 = vector.shape_cast %19 : vector<2x16xf32> to vector<2x1x16xf32>
    %36 = vector.shape_cast %20 : vector<2x16xf32> to vector<2x1x16xf32>
    %37 = vector.shape_cast %21 : vector<2x16xf32> to vector<2x1x16xf32>
    %38 = vector.shape_cast %22 : vector<2x16xf32> to vector<2x1x16xf32>
    %39 = vector.shape_cast %23 : vector<2x16xf32> to vector<2x1x16xf32>
    %40 = vector.shape_cast %24 : vector<2x16xf32> to vector<2x1x16xf32>
    %41 = vector.shape_cast %25 : vector<2x16xf32> to vector<2x1x16xf32>
    %42 = vector.shape_cast %26 : vector<2x16xf32> to vector<2x1x16xf32>
    %43 = tpu.concatenate %27, %28, %29, %30, %31, %32, %33, %34, %35, %36, %37, %38, %39, %40, %41, %42 in 1 : vector<2x1x16xf32>, vector<2x1x16xf32>, vector<2x1x16xf32>, vector<2x1x16xf32>, vector<2x1x16xf32>, vector<2x1x16xf32>, vector<2x1x16xf32>, vector<2x1x16xf32>, vector<2x1x16xf32>, vector<2x1x16xf32>, vector<2x1x16xf32>, vector<2x1x16xf32>, vector<2x1x16xf32>, vector<2x1x16xf32>, vector<2x1x16xf32>, vector<2x1x16xf32> -> vector<2x16x16xf32>
    %44 = vector.shape_cast %43 : vector<2x16x16xf32> to vector<32x16xf32>
    %45 = arith.truncf %44 : vector<32x16xf32> to vector<32x16xbf16>
    %c0_8 = arith.constant 0 : index
    %c0_9 = arith.constant 0 : index
    %46 = vector.load %arg5[%c0_8, %c0_9] : memref<16x32xbf16, #tpu.memory_space<vmem>>, vector<16x32xbf16>
    %cst_10 = arith.constant dense<0.000000e+00> : vector<32x32xf32>
    %47 = tpu.matmul %45, %46, %cst_10 {dimension_numbers = #tpu.dot_dimension_numbers<[1], [0], [0], [1], [0, 0, 1, 1], [], []>} : vector<32x16xbf16>, vector<16x32xbf16>, vector<32x32xf32> -> vector<32x32xf32>
    %48 = vector.shape_cast %47 : vector<32x32xf32> to vector<2x16x32xf32>
    %49 = arith.truncf %48 : vector<2x16x32xf32> to vector<2x16x32xbf16>
    %c0_11 = arith.constant 0 : index
    %c0_12 = arith.constant 0 : index
    %50 = vector.load %arg6[%c0_11, %c0_12] : memref<32x16xbf16, #tpu.memory_space<vmem>>, vector<32x16xbf16>
    %51 = vector.shape_cast %50 : vector<32x16xbf16> to vector<1x32x16xbf16>
    %52 = vector.broadcast %51 : vector<1x32x16xbf16> to vector<2x32x16xbf16>
    %cst_13 = arith.constant dense<0.000000e+00> : vector<2x32x32xf32>
    %53 = tpu.matmul %52, %49, %cst_13 {dimension_numbers = #tpu.dot_dimension_numbers<[2], [1], [1], [2], [0, 0, 0, 1, 1, 2], [0], [0]>} : vector<2x32x16xbf16>, vector<2x16x32xbf16>, vector<2x32x32xf32> -> vector<2x32x32xf32>
    %cst_14 = arith.constant 0.000000e+00 : f32
    %54 = vector.broadcast %cst_14 : f32 to vector<2x32x32xf32>
    %55 = arith.cmpf oge, %53, %54 : vector<2x32x32xf32>
    %cst_15 = arith.constant 0.00999999977 : f32
    %56 = vector.broadcast %cst_15 : f32 to vector<2x32x32xf32>
    %57 = arith.mulf %56, %53 : vector<2x32x32xf32>
    %58 = arith.select %55, %53, %57 : vector<2x32x32xi1>, vector<2x32x32xf32>
    %59 = arith.truncf %58 : vector<2x32x32xf32> to vector<2x32x32xbf16>
    %c0_16 = arith.constant 0 : index
    %c0_17 = arith.constant 0 : index
    %c0_18 = arith.constant 0 : index
    %c0_19 = arith.constant 0 : index
    %60 = vector.load %arg7[%c0_16, %c0_17, %c0_18, %c0_19] : memref<1x2x32x32xbf16, #tpu.memory_space<vmem>>, vector<1x2x32x32xbf16>
    %61 = vector.shape_cast %60 : vector<1x2x32x32xbf16> to vector<2x32x32xbf16>
    %62 = vector.shape_cast %59 : vector<2x32x32xbf16> to vector<1x2x32x32xbf16>
    tpu.vector_store %arg7[%c0_16, %c0_17, %c0_18, %c0_19], %62 {strides = array<i32>} : memref<1x2x32x32xbf16, #tpu.memory_space<vmem>>, vector<1x2x32x32xbf16>,
    return
  }
  func.func @transform_0(%arg0: i32) -> (i32, i32, i32) {
    %c0_i32 = arith.constant 0 : i32
    %c0_i32_0 = arith.constant 0 : i32
    %c0_i32_1 = arith.constant 0 : i32
    return %arg0, %c0_i32, %c0_i32_0 : i32, i32, i32
  }
  func.func @transform_1(%arg0: i32) -> (i32, i32) {
    %c0_i32 = arith.constant 0 : i32
    %c0_i32_0 = arith.constant 0 : i32
    %c0_i32_1 = arith.constant 0 : i32
    return %c0_i32, %c0_i32_0 : i32, i32
  }
  func.func @transform_2(%arg0: i32) -> (i32, i32) {
    %c0_i32 = arith.constant 0 : i32
    %c0_i32_0 = arith.constant 0 : i32
    %c0_i32_1 = arith.constant 0 : i32
    return %c0_i32, %c0_i32_0 : i32, i32
  }
  func.func @transform_3(%arg0: i32) -> (i32, i32) {
    %c0_i32 = arith.constant 0 : i32
    %c0_i32_0 = arith.constant 0 : i32
    %c0_i32_1 = arith.constant 0 : i32
    return %c0_i32, %c0_i32_0 : i32, i32
  }
  func.func @transform_4(%arg0: i32) -> (i32, i32) {
    %c0_i32 = arith.constant 0 : i32
    %c0_i32_0 = arith.constant 0 : i32
    %c0_i32_1 = arith.constant 0 : i32
    return %c0_i32, %c0_i32_0 : i32, i32
  }
  func.func @transform_5(%arg0: i32) -> (i32, i32) {
    %c0_i32 = arith.constant 0 : i32
    %c0_i32_0 = arith.constant 0 : i32
    %c0_i32_1 = arith.constant 0 : i32
    return %c0_i32, %c0_i32_0 : i32, i32
  }
  func.func @transform_6(%arg0: i32) -> (i32, i32, i32, i32) {
    %c0_i32 = arith.constant 0 : i32
    %c0_i32_0 = arith.constant 0 : i32
    %c0_i32_1 = arith.constant 0 : i32
    %c0_i32_2 = arith.constant 0 : i32
    return %arg0, %c0_i32, %c0_i32_0, %c0_i32_1 : i32, i32, i32, i32
  }
}

</mosaic_0001>

<bundles_post_ra>
// kernel: decoder_forward.3
= control target key start
LH: loop header
LB: loop body
LE: loop exit
PB: predicated region body
PF: predicated region fallthrough
CT: control target
= control target key end

     0   :  { %s1029_s21 = smov 0   ;;  %s1131_s0 = inlined_call_operand.vmem [shape: f32[2,4,256], index: 0, kind: input, shape index: {}]   ;;  %s1132_s1 = inlined_call_operand.vmem [shape: bf16[2,4], index: 1, kind: input, shape index: {}]   ;;  %s1133_s2 = inlined_call_operand.vmem [shape: f32[2,1], index: 2, kind: input, shape index: {}]   ;;  %s1134_s3 = inlined_call_operand.vmem [shape: f32[2,1], index: 3, kind: input, shape index: {}]   ;;  %s1135_s4 = inlined_call_operand.vmem [shape: bf16[16,32], index: 4, kind: input, shape index: {}]   ;;  %s1136_s5 = inlined_call_operand.vmem [shape: bf16[32,16], index: 5, kind: input, shape index: {}]   ;;  %s1137_s6 = inlined_call_operand.vmem [shape: bf16[2,2,32,32], index: 6, kind: output, shape index: {}]  }
   0x1 LB: > { %s818_s22 = sadd.s32 4294967295, %s983_s21   ;;  %p822_p0 = scmp.ge.s32.totalorder %s983_s21, 1  ;;  %s983_s21 = sphi %s1029_s21, %s16_s21  }
   0x2   : > { %p212_p1 = scmp.lt.s32.totalorder %s983_s21, 3 }
   0x4   : > { %p213_p2 = pnand %p822_p0, %p212_p1 }
   0x5   : > { %p242_p3 = scmp.lt.s32.totalorder (!%p213_p2), %s818_s22, 1  ;;  %v985_v0 = vmov (!%p213_p2), 0   ;;  %v312_v1 = vld [vmem:[%s1133_s2] sm:$0x3] (!%p213_p2)  ;;  %vm264_vm0 = vcmask (!%p213_p2), 1041408   ;;  %vm260_vm1 = vcmask (!%p213_p2), 31744   ;;  %v332_v11 = vlaneseq (!%p213_p2) }
   0x6   : > { %216 = sbr.rel (%p213_p2) target bundleno = 843 (0x34b), region = 44  ;;  %303 = vmatprep.mubr.bf16.mxu0 (!%p213_p2), %v985_v0  ;;  %902 = vset.pattern.permute.xlu0 (!%p213_p2), %v985_v0  ;;  %v320_v2 = vld [vmem:[%s1134_s3] sm:$0x3] (!%p213_p2)  ;;  %v986_v9 = vmov (!%p213_p2), 1966171168   ;;  %s987_s9 = smov (!%p213_p2), 96  }
   0x7   : > { %315 = vperm.xlu0 (!%p213_p2), %902, %v312_v1   ;;  %v259_v8 = vld [vmem:[%s1132_s1] sm:$0x1] (!%p213_p2)  ;;  %v330_v10 = vunpack.c.l.s4 (!%p213_p2), %v986_v9  ;;  %v333_v14 = vshrl.u32 (!%p213_p2), %v332_v11, 7  ;;  %s988_s10 = smov (!%p213_p2), 112   ;;  %s989_s11 = smov (!%p213_p2), 80   ;;  %vm478_vm2 = vcmask (!%p213_p2), 1040384  }
   0x8   : > { %s990_s12 = smov (!%p213_p2), 64   ;;  %s991_s13 = smov (!%p213_p2), 48   ;;  %v974_v40 = vld [vmem:[%s1135_s4] sm:$0xff] (!%p213_p2)   ;;  %vm483_vm3 = vcmask (!%p213_p2), 1042432   ;;  %vm486_vm4 = vcmask (!%p213_p2), 1043456   ;;  %vm489_vm5 = vcmask (!%p213_p2), 1044480  }
   0x9   : > { %v331_v13 = vunpack.c.0.s8 (!%p213_p2), %v330_v10  ;;  %v380_v26 = vsub.s32 (!%p213_p2), 0, %v333_v14  ;;  %s992_s16 = smov (!%p213_p2), 32   ;;  %867 = vmatprep.subr.bf16.mxu1 (!%p213_p2), %v974_v40  ;;  %s993_s17 = smov (!%p213_p2), 16   ;;  %vm492_vm6 = vcmask (!%p213_p2), 1045504   ;;  %vm495_vm7 = vcmask (!%p213_p2), 1046528  }
   0xa   : > { %868 = vmatpush3.bf16.msra.mxu1 (!%p213_p2), %v974_v40  ;;  %vm522_vm8 = vcmask (!%p213_p2), 130048   ;;  %vm754_vm9 = vcmask (!%p213_p2), 257024  }
   0xb   : > { %323 = vperm.xlu0 (!%p213_p2), %902, %v320_v2   ;;  %v334_v17 = vsub.s32 (!%p213_p2), %v331_v13, %v333_v14 }
   0xd   : > { %s1139_s22 = smov (!%p242_p3, %s818_s22), 1 }
   0xe   : > { %s848_s27 = sshll.u32 %s1139_s22, 3  ;;  %s849_s24 = sshll.u32 %s1139_s22, 5 }
   0xf   : > { %s246_s30 = scalar_lea.vmem %s1131_s0, %s848_s27  ;;  %s1109_s27 = scalar_lea.vmem %s1137_s6, %s849_s24 }
  0x10   : > { %v253_v3 = vld [vmem:[%s246_s30] sm:$0xff] }
  0x11   : > { %v255_v4 = vcombine.high %v253_v3, %v253_v3  ;;  %v257_v5 = vpack.c.bf16 %v253_v3, %v253_v3 }
  0x13   : > { %v258_v6 = vpack.c.bf16 %v255_v4, %v255_v4  ;;  %v266_v7 = vsel %vm264_vm0, %v257_v5, 0 }
  0x15   : > { %827 = vmatprep.subr.msk.bf16.mxu0 %vm264_vm0, %v258_v6 }
  0x16   : > { %272 = vmatpush1.bf16.msra.mxu0 %v266_v7 }
  0x19   : > { %828 = vmatmul.mubr.msk.bf16.vlgmr.msra.gmra.mrb[0].mxu0 %vm260_vm1, %v259_v8 }
  0x86   : > { %v316_v12 = vpop.permute.xlu0 %315 }
  0x8a   : > { %v324_v19 = vpop.permute.xlu0 %323 }
  0xec   : > { %v305_v15 = vpop.f32.mrb[0].mxu0 }
  0xed   : > { %v318_v16 = vmul.f32 %v316_v12, %v305_v15  ;;  %v307_v18 = vpop.f32.mrb[1].mxu0 }
  0xee   : > { %v319_v20 = vmul.f32 %v316_v12, %v307_v18  ;;  %v309_v21 = vpop.f32.mrb[2].mxu0 }
  0xef   : > { %v326_v22 = vadd.f32 %v324_v19, %v318_v16  ;;  %v310_v23 = vpop.f32.mrb[3].mxu0 }
  0xf0   : > { %v327_v24 = vadd.f32 %v324_v19, %v319_v20 }
  0xf1   : > { %v335_v25 = vrot.slane %v326_v22, %v334_v17 }
  0xf2   : > { %v360_v27 = vrot.slane %v327_v24, %v334_v17 }
  0xf3   : > { %v336_v28 = vcombine.high %v335_v25, %v335_v25  ;;  %v343_v29 = vrot.slane %v335_v25, %v334_v17 }
  0xf4   : > { %v361_v30 = vcombine.high %v360_v27, %v360_v27  ;;  %v368_v31 = vrot.slane %v360_v27, %v334_v17 }
  0xf5   : > { %v1054_v32 = vrot.slane %v336_v28, %v334_v17  ;;  %v381_v33 = vrot.slane %v343_v29, %v380_v26 }
  0xf6   : > { %v1056_v34 = vrot.slane %v361_v30, %v334_v17  ;;  %v431_v35 = vrot.slane %v368_v31, %v380_v26 }
  0xf7   : > { %v385_v36 = vrot.slane %v1054_v32, %v380_v26 }
  0xf8   : > { %v435_v37 = vrot.slane %v1056_v34, %v380_v26  ;;  %v908_v38 = vpack.i.bf16 %v431_v35, %v381_v33 }
  0xfa   : > { %909 = vrot.lane.b32.xlu0 %v908_v38, %s987_s9  ;;  %904 = vrot.lane.b32.xlu1 %v908_v38, %s988_s10  ;;  %v933_v39 = vpack.i.bf16 %v435_v37, %v385_v36 }
  0xfe   : > { %914 = vrot.lane.b32.xlu0 %v908_v38, %s989_s11  ;;  %934 = vrot.lane.b32.xlu1 %v933_v39, %s988_s10 }
 0x102   : > { %919 = vrot.lane.b32.xlu0 %v908_v38, %s990_s12  ;;  %939 = vrot.lane.b32.xlu1 %v933_v39, %s987_s9 }
 0x106   : > { %924 = vrot.lane.b32.xlu0 %v908_v38, %s991_s13  ;;  %944 = vrot.lane.b32.xlu1 %v933_v39, %s989_s11 }
 0x10a   : > { %929 = vrot.lane.b32.xlu0 %v908_v38, %s992_s16  ;;  %949 = vrot.lane.b32.xlu1 %v933_v39, %s990_s12 }
 0x10e   : > { %964 = vrot.lane.b32.xlu0 %v908_v38, %s993_s17  ;;  %954 = vrot.lane.b32.xlu1 %v933_v39, %s991_s13 }
 0x112   : > { %959 = vrot.lane.b32.xlu1 %v933_v39, %s992_s16 }
 0x116   : > { %969 = vrot.lane.b32.xlu1 %v933_v39, %s993_s17 }
 0x16c   : > { %v910_v41 = vpop.permute.xlu0 %909  ;;  %v905_v42 = vpop.permute.xlu1 %904 }
 0x16d   : > { %v907_v47 = vunpack.i.h.bf16 %v905_v42  ;;  %v906_v48 = vunpack.i.l.bf16 %v905_v42  ;;  %v912_v51 = vunpack.i.h.bf16 %v910_v41  ;;  %v911_v52 = vunpack.i.l.bf16 %v910_v41 }
 0x16f   : > { %v498_v53 = vsel %vm478_vm2, %v368_v31, %v907_v47  ;;  %v479_v54 = vsel %vm478_vm2, %v343_v29, %v906_v48 }
 0x170   : > { %v915_v43 = vpop.permute.xlu0 %914  ;;  %v935_v44 = vpop.permute.xlu1 %934  ;;  %v481_v63 = vsel %vm264_vm0, %v479_v54, %v911_v52  ;;  %v500_v0 = vsel %vm264_vm0, %v498_v53, %v912_v51 }
 0x171   : > { %v917_v55 = vunpack.i.h.bf16 %v915_v43  ;;  %v916_v56 = vunpack.i.l.bf16 %v915_v43  ;;  %v937_v5 = vunpack.i.h.bf16 %v935_v44  ;;  %v936_v6 = vunpack.i.l.bf16 %v935_v44 }
 0x173   : > { %v484_v3 = vsel %vm483_vm3, %v481_v63, %v916_v56  ;;  %v502_v4 = vsel %vm483_vm3, %v500_v0, %v917_v55  ;;  %v499_v27 = vsel %vm478_vm2, %v1056_v34, %v937_v5  ;;  %v480_v28 = vsel %vm478_vm2, %v1054_v32, %v936_v6  ;;  %v976_v56 = vld [vmem:[%s1136_s5 + $0x8] sm:$0xff]  }
 0x174   : > { %v920_v45 = vpop.permute.xlu0 %919  ;;  %v940_v46 = vpop.permute.xlu1 %939 }
 0x175   : > { %v922_v57 = vunpack.i.h.bf16 %v920_v45  ;;  %v921_v58 = vunpack.i.l.bf16 %v920_v45  ;;  %v942_v15 = vunpack.i.h.bf16 %v940_v46  ;;  %v941_v16 = vunpack.i.l.bf16 %v940_v46 }
 0x177   : > { %v487_v7 = vsel %vm486_vm4, %v484_v3, %v921_v58  ;;  %v504_v8 = vsel %vm486_vm4, %v502_v4, %v922_v57  ;;  %v482_v31 = vsel %vm264_vm0, %v480_v28, %v941_v16  ;;  %v501_v33 = vsel %vm264_vm0, %v499_v27, %v942_v15 }
 0x178   : > { %v925_v49 = vpop.permute.xlu0 %924  ;;  %v945_v50 = vpop.permute.xlu1 %944 }
 0x179   : > { %v927_v61 = vunpack.i.h.bf16 %v925_v49  ;;  %v926_v62 = vunpack.i.l.bf16 %v925_v49  ;;  %v947_v19 = vunpack.i.h.bf16 %v945_v50  ;;  %v946_v20 = vunpack.i.l.bf16 %v945_v50  ;;  %v975_v49 = vld [vmem:[%s1136_s5] sm:$0xff]  }
 0x17a   : > { %875 = vmatprep.mubr.msk.bf16.mxu0 %vm522_vm8, %v975_v49 }
 0x17b   : > { %v490_v11 = vsel %vm489_vm5, %v487_v7, %v926_v62  ;;  %v506_v12 = vsel %vm489_vm5, %v504_v8, %v927_v61  ;;  %v485_v37 = vsel %vm483_vm3, %v482_v31, %v946_v20  ;;  %v503_v38 = vsel %vm483_vm3, %v501_v33, %v947_v19 }
 0x17c   : > { %v930_v59 = vpop.permute.xlu0 %929  ;;  %v950_v60 = vpop.permute.xlu1 %949 }
 0x17d   : > { %v932_v1 = vunpack.i.h.bf16 %v930_v59  ;;  %v931_v2 = vunpack.i.l.bf16 %v930_v59  ;;  %v952_v23 = vunpack.i.h.bf16 %v950_v60  ;;  %v951_v24 = vunpack.i.l.bf16 %v950_v60 }
 0x17f   : > { %v493_v17 = vsel %vm492_vm6, %v490_v11, %v931_v2  ;;  %v508_v18 = vsel %vm492_vm6, %v506_v12, %v932_v1  ;;  %v488_v39 = vsel %vm486_vm4, %v485_v37, %v951_v24  ;;  %v505_v34 = vsel %vm486_vm4, %v503_v38, %v952_v23 }
 0x180   : > { %v965_v9 = vpop.permute.xlu0 %964  ;;  %v955_v10 = vpop.permute.xlu1 %954 }
 0x181   : > { %v967_v13 = vunpack.i.h.bf16 %v965_v9  ;;  %v966_v14 = vunpack.i.l.bf16 %v965_v9  ;;  %v957_v29 = vunpack.i.h.bf16 %v955_v10  ;;  %v956_v30 = vunpack.i.l.bf16 %v955_v10 }
 0x183   : > { %v496_v21 = vsel %vm495_vm7, %v493_v17, %v966_v14  ;;  %v510_v22 = vsel %vm495_vm7, %v508_v18, %v967_v13  ;;  %v491_v32 = vsel %vm489_vm5, %v488_v39, %v956_v30  ;;  %v507_v41 = vsel %vm489_vm5, %v505_v34, %v957_v29 }
 0x184   : > { %v960_v25 = vpop.permute.xlu1 %959  ;;  %v512_v26 = vpack.c.bf16 %v510_v22, %v496_v21 }
 0x185   : > { %v962_v35 = vunpack.i.h.bf16 %v960_v25  ;;  %v961_v36 = vunpack.i.l.bf16 %v960_v25 }
 0x186   : > { %869 = vmatprep.mubr.msk.bf16.mxu1 %vm522_vm8, %v512_v26 }
 0x187   : > { %v494_v44 = vsel %vm492_vm6, %v491_v32, %v961_v36  ;;  %v509_v45 = vsel %vm492_vm6, %v507_v41, %v962_v35 }
 0x188   : > { %v970_v40 = vpop.permute.xlu1 %969 }
 0x189   : > { %v972_v42 = vunpack.i.h.bf16 %v970_v40  ;;  %v971_v43 = vunpack.i.l.bf16 %v970_v40 }
 0x18b   : > { %v497_v46 = vsel %vm495_vm7, %v494_v44, %v971_v43  ;;  %v511_v47 = vsel %vm495_vm7, %v509_v45, %v972_v42 }
 0x18c   : > { %v513_v48 = vpack.c.bf16 %v511_v47, %v497_v46 }
 0x18e   : > { %870 = vmatmul.mubr.msk.bf16.vlgmr.msra.gmra.mrb[0].mxu1 %vm522_vm8, %v513_v48 }
 0x18f   : > { %881 = vmatprep.mubr.msk.bf16.mxu1 %vm522_vm8, %v975_v49 }
 0x261   : > { %v871_v50 = vpop.f32.mrb[0].mxu1 }
 0x262   : > { %v563_v51 = vpop.f32.mrb[1].mxu1 }
 0x263   : > { %v872_v52 = vpop.f32.mrb[2].mxu1 }
 0x264   : > { %v579_v53 = vpack.c.bf16 %v872_v52, %v871_v50  ;;  %v566_v54 = vpop.f32.mrb[3].mxu1 }
 0x265   : > { %v578_v55 = vpack.c.bf16 %v566_v54, %v563_v51 }
 0x266   : > { %879 = vmatprep.subr.bf16.mxu1 %v579_v53 }
 0x267   : > { %873 = vmatprep.subr.bf16.mxu0 %v578_v55  ;;  %880 = vmatpush3.bf16.msra.mxu1 %v579_v53 }
 0x268   : > { %874 = vmatpush3.bf16.msra.mxu0 %v578_v55 }
 0x26a   : > { %882 = vmatmul.mubr.msk.bf16.vlgmr.msra.gmra.mrb[4].mxu1 %vm522_vm8, %v976_v56 }
 0x26b   : > { %876 = vmatmul.mubr.msk.bf16.vlgmr.msra.gmra.mrb[4].mxu0 %vm522_vm8, %v976_v56 }
 0x33d   : > { %v883_v57 = vpop.f32.mrb[4].mxu1 }
 0x33e   : > { %v877_v58 = vpop.f32.mrb[4].mxu0  ;;  %vm704_vm10 = vcmp.ge.f32.partialorder %v883_v57, 0.0  ;;  %v712_v59 = vmul.f32 0.01, %v883_v57  ;;  %v683_v60 = vpop.f32.mrb[5].mxu1 }
 0x33f   : > { %vm700_vm11 = vcmp.ge.f32.partialorder %v877_v58, 0.0  ;;  %v708_v61 = vmul.f32 0.01, %v877_v58  ;;  %v634_v62 = vpop.f32.mrb[5].mxu0  ;;  %vm702_vm12 = vcmp.ge.f32.partialorder %v683_v60, 0.0  ;;  %v884_v63 = vpop.f32.mrb[6].mxu1 }
 0x340   : > { %v720_v0 = vsel %vm704_vm10, %v883_v57, %v712_v59  ;;  %vm698_vm13 = vcmp.ge.f32.partialorder %v634_v62, 0.0  ;;  %v706_v1 = vmul.f32 0.01, %v634_v62  ;;  %v710_v2 = vmul.f32 0.01, %v683_v60  ;;  %v878_v3 = vpop.f32.mrb[6].mxu0 }
 0x341   : > { %v716_v4 = vsel %vm700_vm11, %v877_v58, %v708_v61  ;;  %v856_v5 = vpack.c.bf16 %v720_v0, %v720_v0  ;;  %vm701_vm14 = vcmp.ge.f32.partialorder %v878_v3, 0.0  ;;  %v709_v6 = vmul.f32 0.01, %v878_v3  ;;  %v637_v7 = vpop.f32.mrb[7].mxu0  ;;  %v686_v8 = vpop.f32.mrb[7].mxu1 }
 0x342   : > { %v852_v9 = vpack.c.bf16 %v716_v4, %v716_v4  ;;  %v714_v10 = vsel %vm698_vm13, %v634_v62, %v706_v1  ;;  %v718_v11 = vsel %vm702_vm12, %v683_v60, %v710_v2  ;;  %vm705_vm15 = vcmp.ge.f32.partialorder %v884_v63, 0.0 }
 0x343   : > { %761 = vst.msk [vmem:[%s1109_s27 + $0x18] sm:$0xf] %vm754_vm9, %v856_v5  ;;  %v850_v12 = vpack.c.bf16 %v714_v10, %v714_v10  ;;  %v854_v13 = vpack.c.bf16 %v718_v11, %v718_v11  ;;  %v717_v14 = vsel %vm701_vm14, %v878_v3, %v709_v6  ;;  %v713_v15 = vmul.f32 0.01, %v884_v63 }
 0x344   : > { %757 = vst.msk [vmem:[%s1109_s27 + $0x8] sm:$0xf] %vm754_vm9, %v852_v9  ;;  %v853_v16 = vpack.c.bf16 %v717_v14, %v717_v14  ;;  %vm699_vm0 = vcmp.ge.f32.partialorder %v637_v7, 0.0  ;;  %v707_v17 = vmul.f32 0.01, %v637_v7  ;;  %vm703_vm1 = vcmp.ge.f32.partialorder %v686_v8, 0.0 }
 0x345   : > { %755 = vst.msk [vmem:[%s1109_s27] sm:$0xf] %vm754_vm9, %v850_v12  ;;  %759 = vst.msk [vmem:[%s1109_s27 + $0x10] sm:$0xf] %vm754_vm9, %v854_v13  ;;  %v721_v18 = vsel %vm705_vm15, %v884_v63, %v713_v15  ;;  %v711_v19 = vmul.f32 0.01, %v686_v8 }
 0x346   : > { %758 = vst.msk [vmem:[%s1109_s27 + $0xc] sm:$0xf] %vm754_vm9, %v853_v16  ;;  %v857_v20 = vpack.c.bf16 %v721_v18, %v721_v18  ;;  %v715_v21 = vsel %vm699_vm0, %v637_v7, %v707_v17 }
 0x347   : > { %v851_v22 = vpack.c.bf16 %v715_v21, %v715_v21  ;;  %v719_v23 = vsel %vm703_vm1, %v686_v8, %v711_v19 }
 0x348   : > { %762 = vst.msk [vmem:[%s1109_s27 + $0x1c] sm:$0xf] %vm754_vm9, %v857_v20  ;;  %v855_v24 = vpack.c.bf16 %v719_v23, %v719_v23 }
 0x349   : > { %756 = vst.msk [vmem:[%s1109_s27 + $0x4] sm:$0xf] %vm754_vm9, %v851_v22 }
 0x34a   : > { %760 = vst.msk [vmem:[%s1109_s27 + $0x14] sm:$0xf] %vm754_vm9, %v855_v24 }
 0x34b PF: > { %s16_s21 = sadd.s32 1, %s983_s21  }
 0x34c   : > { %p13_p4 = scmp.ge.s32.totalorder %s16_s21, 4  }
 0x34e   :  { %15 = sbr.rel (!%p13_p4) target bundleno = 1 (0x1), region = 74 }

// kernel: decoder_forward.4
= control target key start
LH: loop header
LB: loop body
LE: loop exit
PB: predicated region body
PF: predicated region fallthrough
CT: control target
= control target key end

     0   :  { %s5862_s27 = smov 0   ;;  %s7215_s0 = inlined_call_operand.vmem [shape: bf16[2,2,1024], index: 0, kind: input, shape index: {}]   ;;  %s7216_s1 = inlined_call_operand.vmem [shape: f32[2,2,1024], index: 1, kind: input, shape index: {}]   ;;  %s7217_s2 = inlined_call_operand.vmem [shape: bf16[9,2,2], index: 2, kind: input, shape index: {}]   ;;  %s7218_s3 = inlined_call_operand.vmem [shape: bf16[9,2,2], index: 3, kind: input, shape index: {}]   ;;  %s7219_s4 = inlined_call_operand.vmem [shape: bf16[1,1024], index: 4, kind: input, shape index: {}]   ;;  %s7220_s5 = inlined_call_operand.vmem [shape: bf16[1,1024], index: 5, kind: input, shape index: {}]   ;;  %s7221_s6 = inlined_call_operand.vmem [shape: f32[2,1], index: 6, kind: input, shape index: {}]   ;;  %s7222_s7 = inlined_call_operand.vmem [shape: f32[2,1], index: 7, kind: input, shape index: {}]   ;;  %s7223_s8 = inlined_call_operand.vmem [shape: bf16[2,2,1024], index: 8, kind: output, shape index: {}]  }
   0x1 LB: > { %s5314_s28 = sadd.s32 4294967295, %s5799_s27   ;;  %p5318_p0 = scmp.ge.s32.totalorder %s5799_s27, 1  ;;  %s5799_s27 = sphi %s5862_s27, %s18_s27  }
   0x2   : > { %p271_p1 = scmp.lt.s32.totalorder %s5799_s27, 3 }
   0x4   : > { %p272_p2 = pnand %p5318_p0, %p271_p1 }
   0x6   : > { %275 = sbr.rel (%p272_p2) target bundleno = 884 (0x374), region = 52 }
   0xd   : > { %p308_p3 = scmp.lt.s32.totalorder %s5314_s28, 1  ;;  %v330_v0 = vlaneseq  ;;  %v5801_v1 = vmov 1966171168   ;;  %v323_v7 = vld [vmem:[%s7220_s5] sm:$0xff]  ;;  %s5802_s13 = smov 33   ;;  %vm391_vm0 = vcmask 269312  }
   0xe   : > { %v328_v2 = vunpack.c.l.s4 %v5801_v1  ;;  %v945_v19 = vcombine.high %v323_v7, %v323_v7  ;;  %v322_v33 = vld [vmem:[%s7219_s4] sm:$0xff]  ;;  %s5803_s16 = smov 2   ;;  %s5804_s17 = smov 32   ;;  %vm560_vm1 = vcmask 15360   ;;  %vm1361_vm2 = vcmask 261120  }
   0xf   : > { %s7280_s28 = smov (!%p308_p3, %s5314_s28), 1  ;;  %v5872_v3 = vshrl.u32 %v330_v0, 7  ;;  %v415_v44 = vcombine.high %v322_v33, %v322_v33  ;;  %s5805_s18 = smov 34   ;;  %vm1868_vm3 = vcmask 277504   ;;  %vm2147_vm4 = vcmask 523264  }
  0x10   : > { %v329_v4 = vunpack.c.0.s8 %v328_v2  ;;  %s5319_s29 = sshll.u32 %s7280_s28, 3  ;;  %s5806_s19 = smov 64   ;;  %vm551_vm5 = vcmask 1039360   ;;  %vm564_vm6 = vcmask 1040384   ;;  %vm1129_vm7 = vcmask 1031168  }
  0x11   : > { %s311_s10 = scalar_lea.vmem %s7215_s0, %s5319_s29  ;;  %v5902_v26 = vsub.s32 0, %v5872_v3  ;;  %s5808_s20 = smov 127   ;;  %vm1416_vm8 = vcmask 785408   ;;  %vm1644_vm9 = vcmask 777216   ;;  %vm2653_vm10 = vcmask 539648  }
  0x12   : > { %v5881_v5 = vsub.s32 %v329_v4, %v5872_v3  ;;  %v324_v6 = vld [vmem:[%s311_s10] sm:$0xff]  ;;  %s5809_s21 = smov 95   ;;  %s5810_s22 = smov 126   ;;  %vm1923_vm11 = vcmask 769024   ;;  %vm2429_vm12 = vcmask 515072   ;;  %vm2708_vm13 = vcmask 506880  }
  0x13   : > { %v326_v9 = vcombine.high %v324_v6, %v324_v6  ;;  %s5811_s23 = smov 96   ;;  %s5812_s24 = smov 66  }
  0x14   : > { %7244 = vst [vmem:[#allocation2_spill] sm:$0xff] %v5881_v5  ;;  %v333_v8 = vrot.slane %v324_v6, %v5881_v5  ;;  %v952_v13 = vrot.slane %v323_v7, %v5881_v5  ;;  %v959_v24 = vrot.slane %v945_v19, %v5881_v5  ;;  %v422_v40 = vrot.slane %v322_v33, %v5881_v5  ;;  %s5813_s25 = smov 94   ;;  %s5489_s26 = sshll.u32 %s7280_s28, 4 }
  0x15   : > { %v340_v12 = vrot.slane %v326_v9, %v5881_v5  ;;  %v429_v55 = vrot.slane %v415_v44, %v5881_v5  ;;  %s6248_s10 = scalar_lea.vmem %s7216_s1, %s5489_s26  ;;  %s5816_s26 = smov 62  }
  0x16   : > { %v349_v10 = vrot.slane %v333_v8, %v5881_v5  ;;  %v341_v11 = vcombine.high %v333_v8, %v333_v8  ;;  %v960_v18 = vcombine.high %v952_v13, %v952_v13  ;;  %v968_v21 = vrot.slane %v952_v13, %v5881_v5 }
  0x17   : > { %v342_v17 = vcombine.high %v340_v12, %v340_v12  ;;  %v356_v20 = vrot.slane %v340_v12, %v5881_v5  ;;  %v961_v32 = vcombine.high %v959_v24, %v959_v24  ;;  %v975_v36 = vrot.slane %v959_v24, %v5881_v5 }
  0x18   : > { %375 = vrot.lane.b32.xlu0 %v349_v10, %s5802_s13  ;;  %v371_v14 = vcombine.high %v349_v10, %v349_v10  ;;  %v363_v15 = vrot.slane %v341_v11, %v5881_v5  ;;  %v982_v23 = vrot.slane %v960_v18, %v5881_v5  ;;  %v995_v27 = vpack.i.b16 %v968_v21, %v968_v21 }
  0x19   : > { %v370_v22 = vrot.slane %v342_v17, %v5881_v5  ;;  %v372_v25 = vcombine.high %v356_v20, %v356_v20  ;;  %v990_v28 = vcombine.high %v968_v21, %v968_v21  ;;  %v989_v39 = vrot.slane %v961_v32, %v5881_v5 }
  0x1a   : > { %379 = vrot.lane.b32.xlu1 %v371_v14, %s5802_s13  ;;  %v373_v16 = vcombine.high %v363_v15, %v363_v15  ;;  %v1002_v30 = vpack.i.b16 %v982_v23, %v982_v23  ;;  %v992_v31 = vcombine.high %v982_v23, %v982_v23  ;;  %v5910_v34 = vrot.slane %v995_v27, %v5902_v26 }
  0x1b   : > { %v374_v29 = vcombine.high %v370_v22, %v370_v22  ;;  %v1009_v35 = vpack.i.b16 %v990_v28, %v990_v28  ;;  %v1023_v42 = vpack.i.b16 %v975_v36, %v975_v36  ;;  %v991_v43 = vcombine.high %v975_v36, %v975_v36 }
  0x1c   : > { %377 = vrot.lane.b32.xlu0 %v363_v15, %s5802_s13  ;;  %v5915_v37 = vrot.slane %v1002_v30, %v5902_v26  ;;  %v1016_v38 = vpack.i.b16 %v992_v31, %v992_v31  ;;  %v1030_v46 = vpack.i.b16 %v989_v39, %v989_v39  ;;  %v993_v47 = vcombine.high %v989_v39, %v989_v39 }
  0x1d   : > { %v5922_v41 = vrot.slane %v1009_v35, %v5902_v26  ;;  %v430_v48 = vcombine.high %v422_v40, %v422_v40  ;;  %v5932_v49 = vrot.slane %v1023_v42, %v5902_v26  ;;  %v1037_v50 = vpack.i.b16 %v991_v43, %v991_v43 }
  0x1e   : > { %381 = vrot.lane.b32.xlu1 %v373_v16, %s5802_s13  ;;  %v5927_v45 = vrot.slane %v1016_v38, %v5902_v26  ;;  %v438_v51 = vrot.slane %v422_v40, %v5881_v5  ;;  %v5938_v52 = vrot.slane %v1030_v46, %v5902_v26  ;;  %v1044_v53 = vpack.i.b16 %v993_v47, %v993_v47 }
  0x1f   : > { %v452_v54 = vrot.slane %v430_v48, %v5881_v5  ;;  %v5945_v56 = vrot.slane %v1037_v50, %v5902_v26  ;;  %v431_v62 = vcombine.high %v429_v55, %v429_v55  ;;  %v445_v1 = vrot.slane %v429_v55, %v5881_v5 }
  0x20   : > { %383 = vrot.lane.b32.xlu0 %v356_v20, %s5802_s13  ;;  %v465_v57 = vpack.i.b16 %v438_v51, %v438_v51  ;;  %v460_v58 = vcombine.high %v438_v51, %v438_v51  ;;  %v5950_v59 = vrot.slane %v1044_v53, %v5902_v26  ;;  %v7224_v21 = vmov 0  }
  0x21   : > { %v472_v60 = vpack.i.b16 %v452_v54, %v452_v54  ;;  %v462_v61 = vcombine.high %v452_v54, %v452_v54  ;;  %v459_v6 = vrot.slane %v431_v62, %v5881_v5  ;;  %v493_v8 = vpack.i.b16 %v445_v1, %v445_v1  ;;  %621 = vmatprep.mubr.bf16.mxu0 %v7224_v21 }
  0x22   : > { %385 = vrot.lane.b32.xlu1 %v370_v22, %s5802_s13  ;;  %v5955_v63 = vrot.slane %v465_v57, %v5902_v26  ;;  %v479_v0 = vpack.i.b16 %v460_v58, %v460_v58  ;;  %v461_v9 = vcombine.high %v445_v1, %v445_v1  ;;  %662 = vmatprep.mubr.bf16.mxu1 %v7224_v21 }
  0x23   : > { %v5961_v2 = vrot.slane %v472_v60, %v5902_v26  ;;  %v486_v4 = vpack.i.b16 %v462_v61, %v462_v61  ;;  %v500_v11 = vpack.i.b16 %v459_v6, %v459_v6  ;;  %v463_v12 = vcombine.high %v459_v6, %v459_v6  ;;  %5786 = vset.pattern.permute.xlu0 %v7224_v21 }
  0x24   : > { %387 = vrot.lane.b32.xlu0 %v372_v25, %s5802_s13  ;;  %v5966_v7 = vrot.slane %v479_v0, %v5902_v26  ;;  %v5974_v13 = vrot.slane %v493_v8, %v5902_v26  ;;  %v507_v14 = vpack.i.b16 %v461_v9, %v461_v9  ;;  %5787 = vset.pattern.permute.xlu1 %v7224_v21 }
  0x25   : > { %v5970_v10 = vrot.slane %v486_v4, %v5902_v26  ;;  %v5978_v15 = vrot.slane %v500_v11, %v5902_v26  ;;  %v514_v16 = vpack.i.b16 %v463_v12, %v463_v12 }
  0x26   : > { %389 = vrot.lane.b32.xlu1 %v374_v29, %s5802_s13  ;;  %v5982_v17 = vrot.slane %v507_v14, %v5902_v26 }
  0x27   : > { %v5986_v18 = vrot.slane %v514_v16, %v5902_v26 }
  0x28   : > { %1058 = vrot.lane.b32.xlu0 %v5910_v34, %s5803_s16  ;;  %7245 = vst [vmem:[#allocation3_spill] sm:$0xff] %v5982_v17 }
  0x2a   : > { %1060 = vrot.lane.b32.xlu1 %v5915_v37, %s5803_s16 }
  0x2c   : > { %1062 = vrot.lane.b32.xlu0 %v5922_v41, %s5803_s16 }
  0x2e   : > { %1064 = vrot.lane.b32.xlu1 %v5927_v45, %s5803_s16 }
  0x30   : > { %1066 = vrot.lane.b32.xlu0 %v5932_v49, %s5803_s16 }
  0x32   : > { %1068 = vrot.lane.b32.xlu1 %v5938_v52, %s5803_s16 }
  0x34   : > { %1070 = vrot.lane.b32.xlu0 %v5945_v56, %s5803_s16 }
  0x36   : > { %1072 = vrot.lane.b32.xlu1 %v5950_v59, %s5803_s16  ;;  %s5815_s16 = smov 63  }
  0x38   : > { %1345 = vrot.lane.b32.xlu0 %v5955_v63, %s5804_s17 }
  0x3a   : > { %1347 = vrot.lane.b32.xlu1 %v5961_v2, %s5804_s17 }
  0x3c   : > { %1349 = vrot.lane.b32.xlu0 %v5966_v7, %s5804_s17 }
  0x3e   : > { %1351 = vrot.lane.b32.xlu1 %v5970_v10, %s5804_s17 }
  0x40   : > { %1353 = vrot.lane.b32.xlu0 %v5974_v13, %s5804_s17 }
  0x42   : > { %1355 = vrot.lane.b32.xlu1 %v5978_v15, %s5804_s17 }
  0x44   : > { %1357 = vrot.lane.b32.xlu0 %v5982_v17, %s5804_s17 }
  0x46   : > { %1359 = vrot.lane.b32.xlu1 %v5986_v18, %s5804_s17  ;;  %s320_s17 = scalar_lea.vmem %s7223_s8, %s5319_s29 }
  0x48   : > { %1854 = vrot.lane.b32.xlu0 %v5915_v37, %s5805_s18 }
  0x4a   : > { %1852 = vrot.lane.b32.xlu1 %v5910_v34, %s5805_s18 }
  0x4c   : > { %1858 = vrot.lane.b32.xlu0 %v5927_v45, %s5805_s18 }
  0x4e   : > { %1856 = vrot.lane.b32.xlu1 %v5922_v41, %s5805_s18 }
  0x50   : > { %1862 = vrot.lane.b32.xlu0 %v5938_v52, %s5805_s18 }
  0x52   : > { %1860 = vrot.lane.b32.xlu1 %v5932_v49, %s5805_s18 }
  0x54   : > { %1866 = vrot.lane.b32.xlu0 %v5950_v59, %s5805_s18 }
  0x56   : > { %1864 = vrot.lane.b32.xlu1 %v5945_v56, %s5805_s18 }
  0x58   : > { %2131 = vrot.lane.b32.xlu0 %v5955_v63, %s5806_s19 }
  0x5a   : > { %2133 = vrot.lane.b32.xlu1 %v5961_v2, %s5806_s19 }
  0x5c   : > { %2135 = vrot.lane.b32.xlu0 %v5966_v7, %s5806_s19 }
  0x5e   : > { %2137 = vrot.lane.b32.xlu1 %v5970_v10, %s5806_s19 }
  0x60   : > { %2139 = vrot.lane.b32.xlu0 %v5974_v13, %s5806_s19 }
  0x62   : > { %2141 = vrot.lane.b32.xlu1 %v5978_v15, %s5806_s19 }
  0x64   : > { %2143 = vrot.lane.b32.xlu0 %v5982_v17, %s5806_s19 }
  0x66   : > { %2145 = vrot.lane.b32.xlu1 %v5986_v18, %s5806_s19 }
  0x8a   : > { %v376_v19 = vpop.permute.xlu0 %375 }
  0x8b   : > { %v6015_v20 = vsel %vm391_vm0, 0, %v376_v19 }
  0x8c   : > { %v380_v22 = vpop.permute.xlu1 %379  ;;  %533 = vrot.lane.b32.xlu0 %v6015_v20, %s5808_s20  ;;  %1626 = vrot.lane.b32.xlu1 %v6015_v20, %s5809_s21 }
  0x8e   : > { %v378_v23 = vpop.permute.xlu0 %377 }
  0x8f   : > { %v6026_v24 = vsel %vm391_vm0, %v376_v19, %v378_v23  ;;  %v6029_v25 = vsel %vm391_vm0, %v378_v23, %v380_v22 }
  0x90   : > { %v382_v26 = vpop.permute.xlu1 %381  ;;  %537 = vrot.lane.b32.xlu0 %v6029_v25, %s5808_s20  ;;  %535 = vrot.lane.b32.xlu1 %v6026_v24, %s5808_s20 }
  0x91   : > { %v6040_v29 = vsel %vm391_vm0, %v380_v22, %v382_v26 }
  0x92   : > { %v384_v27 = vpop.permute.xlu0 %383 }
  0x93   : > { %v6043_v31 = vsel %vm391_vm0, %v382_v26, %v384_v27 }
  0x94   : > { %1628 = vrot.lane.b32.xlu0 %v6026_v24, %s5809_s21  ;;  %v386_v28 = vpop.permute.xlu1 %385  ;;  %1630 = vrot.lane.b32.xlu1 %v6029_v25, %s5809_s21 }
  0x95   : > { %v6052_v35 = vsel %vm391_vm0, %v384_v27, %v386_v28 }
  0x96   : > { %v388_v30 = vpop.permute.xlu0 %387 }
  0x97   : > { %v6055_v36 = vsel %vm391_vm0, %v386_v28, %v388_v30 }
  0x98   : > { %541 = vrot.lane.b32.xlu0 %v6043_v31, %s5808_s20  ;;  %539 = vrot.lane.b32.xlu1 %v6040_v29, %s5808_s20  ;;  %v390_v32 = vpop.permute.xlu1 %389 }
  0x99   : > { %v6067_v44 = vsel %vm391_vm0, %v388_v30, %v390_v32  ;;  %v6098_v0 = vsel %vm391_vm0, %v390_v32, 0 }
  0x9a   : > { %v6049_v33 = vpop.permute.xlu0 %1058 }
  0x9b   : > { %v1091_v40 = vmul.bf16 %v6049_v33, %v6015_v20 }
  0x9c   : > { %545 = vrot.lane.b32.xlu0 %v6055_v36, %s5808_s20  ;;  %543 = vrot.lane.b32.xlu1 %v6052_v35, %s5808_s20  ;;  %v1061_v38 = vpop.permute.xlu1 %1060 }
  0x9d   : > { %v6102_v1 = vsel %vm560_vm1, %v6049_v33, %v1061_v38 }
  0x9e   : > { %v6061_v39 = vpop.permute.xlu0 %1062  ;;  %v1092_v8 = vmul.bf16 %v6102_v1, %v6026_v24 }
  0x9f   : > { %v6071_v46 = vsel %vm560_vm1, %v1061_v38, %v6061_v39 }
  0xa0   : > { %1111 = vrot.lane.b32.xlu1 %v1091_v40, %s5810_s22  ;;  %v1065_v42 = vpop.permute.xlu1 %1064  ;;  %v1093_v50 = vmul.bf16 %v6071_v46, %v6029_v25 }
  0xa2   : > { %v1067_v43 = vpop.permute.xlu0 %1066 }
  0xa3   : > { %v6119_v16 = vsel %vm560_vm1, %v1065_v42, %v1067_v43 }
  0xa4   : > { %547 = vrot.lane.b32.xlu1 %v6067_v44, %s5808_s20  ;;  %v1069_v47 = vpop.permute.xlu1 %1068  ;;  %v1095_v26 = vmul.bf16 %v6119_v16, %v6043_v31 }
  0xa5   : > { %v6078_v51 = vsel %vm560_vm1, %v1067_v43, %v1069_v47 }
  0xa6   : > { %v1071_v48 = vpop.permute.xlu0 %1070  ;;  %v1096_v55 = vmul.bf16 %v6078_v51, %v6052_v35 }
  0xa7   : > { %v6110_v9 = vsel %vm560_vm1, %v1069_v47, %v1071_v48 }
  0xa8   : > { %1115 = vrot.lane.b32.xlu1 %v1093_v50, %s5810_s22  ;;  %v6081_v53 = vpop.permute.xlu1 %1072  ;;  %v1097_v19 = vmul.bf16 %v6110_v9, %v6055_v36 }
  0xa9   : > { %v6134_v28 = vsel %vm560_vm1, %v1071_v48, %v6081_v53  ;;  %v1099_v48 = vmul.bf16 %v6081_v53, %v6098_v0 }
  0xaa   : > { %v6083_v54 = vpop.permute.xlu0 %1345  ;;  %v1098_v32 = vmul.bf16 %v6134_v28, %v6067_v44 }
  0xab   : > { %v1378_v57 = vmul.bf16 %v6083_v54, %v6015_v20 }
  0xac   : > { %1121 = vrot.lane.b32.xlu1 %v1096_v55, %s5810_s22  ;;  %v1348_v58 = vpop.permute.xlu1 %1347 }
  0xad   : > { %v6092_v60 = vsel %vm1361_vm2, %v6083_v54, %v1348_v58  ;;  %1398 = vrot.lane.b32.xlu0 %v1378_v57, %s5811_s23 }
  0xae   : > { %v1350_v61 = vpop.permute.xlu0 %1349  ;;  %v1379_v62 = vmul.bf16 %v6092_v60, %v6026_v24 }
  0xaf   : > { %v6124_v22 = vsel %vm1361_vm2, %v1348_v58, %v1350_v61  ;;  %v6168_v58 = vsel %vm560_vm1, %v6061_v39, %v1065_v42 }
  0xb0   : > { %1400 = vrot.lane.b32.xlu1 %v1379_v62, %s5811_s23  ;;  %v1352_v4 = vpop.permute.xlu1 %1351  ;;  %v1380_v27 = vmul.bf16 %v6124_v22, %v6029_v25 }
  0xb1   : > { %549 = vrot.lane.b32.xlu0 %v6098_v0, %s5808_s20  ;;  %v6144_v38 = vsel %vm1361_vm2, %v1350_v61, %v1352_v4  ;;  %v1094_v61 = vmul.bf16 %v6168_v58, %v6040_v29 }
  0xb2   : > { %v1354_v6 = vpop.permute.xlu0 %1353  ;;  %v1381_v47 = vmul.bf16 %v6144_v38, %v6040_v29 }
  0xb3   : > { %v6175_v62 = vsel %vm1361_vm2, %v1352_v4, %v1354_v6 }
  0xb4   : > { %v1356_v11 = vpop.permute.xlu1 %1355 }
  0xb5   : > { %v6113_v12 = vsel %vm1361_vm2, %v1354_v6, %v1356_v11  ;;  %1113 = vrot.lane.b32.xlu0 %v1092_v8, %s5810_s22  ;;  %v1382_v8 = vmul.bf16 %v6175_v62, %v6043_v31 }
  0xb6   : > { %v1383_v14 = vmul.bf16 %v6113_v12, %v6052_v35  ;;  %v1358_v23 = vpop.permute.xlu0 %1357 }
  0xb7   : > { %v6137_v30 = vsel %vm1361_vm2, %v1356_v11, %v1358_v23 }
  0xb8   : > { %1408 = vrot.lane.b32.xlu1 %v1383_v14, %s5811_s23  ;;  %v1384_v40 = vmul.bf16 %v6137_v30, %v6055_v36  ;;  %v6148_v43 = vpop.permute.xlu1 %1359 }
  0xb9   : > { %1123 = vrot.lane.b32.xlu0 %v1097_v19, %s5810_s22  ;;  %v6158_v50 = vsel %vm1361_vm2, %v1358_v23, %v6148_v43  ;;  %v1386_v57 = vmul.bf16 %v6148_v43, %v6098_v0 }
  0xba   : > { %v1385_v55 = vmul.bf16 %v6158_v50, %v6067_v44  ;;  %v1855_v39 = vpop.permute.xlu0 %1854 }
  0xbc   : > { %1119 = vrot.lane.b32.xlu1 %v1095_v26, %s5810_s22  ;;  %v6182_v42 = vpop.permute.xlu1 %1852  ;;  %v5814_v26 = vmov 1983009808  }
  0xbd   : > { %1402 = vrot.lane.b32.xlu0 %v1380_v27, %s5811_s23  ;;  %v2922_v27 = vunpack.c.l.s4 %v5814_v26  ;;  %v2916_v26 = vld [vmem:[%s6248_s10] sm:$0xff] }
  0xbe   : > { %v1859_v4 = vpop.permute.xlu0 %1858 }
  0xc0   : > { %1125 = vrot.lane.b32.xlu1 %v1098_v32, %s5810_s22  ;;  %v1857_v6 = vpop.permute.xlu1 %1856 }
  0xc1   : > { %1410 = vrot.lane.b32.xlu0 %v1384_v40, %s5811_s23 }
  0xc2   : > { %v1863_v11 = vpop.permute.xlu0 %1862 }
  0xc4   : > { %1404 = vrot.lane.b32.xlu1 %v1381_v47, %s5811_s23  ;;  %v1861_v14 = vpop.permute.xlu1 %1860 }
  0xc5   : > { %1127 = vrot.lane.b32.xlu0 %v1099_v48, %s5810_s22  ;;  %v6226_v23 = vsel %vm1868_vm3, %v1861_v14, %v1863_v11 }
  0xc6   : > { %7248 = vst [vmem:[#allocation6_spill] sm:$0xff] %v6226_v23  ;;  %v1890_v47 = vmul.bf16 %v6226_v23, %v6052_v35 }
  0xc8   : > { %1412 = vrot.lane.b32.xlu1 %v1385_v55, %s5811_s23  ;;  %v1885_v55 = vmul.bf16 %v6182_v42, %v6015_v20 }
  0xc9   : > { %1414 = vrot.lane.b32.xlu0 %v1386_v57, %s5811_s23  ;;  %v6241_v57 = vsel %vm1868_vm3, %v1855_v39, %v1857_v6 }
  0xca   : > { %7250 = vst [vmem:[#allocation8_spill] sm:$0xff] %v6241_v57 }
  0xcc   : > { %1634 = vrot.lane.b32.xlu1 %v6043_v31, %s5809_s21 }
  0xcd   : > { %1117 = vrot.lane.b32.xlu0 %v1094_v61, %s5810_s22  ;;  %v2923_v61 = vunpack.c.0.s8 %v2922_v27 }
  0xd0   : > { %2639 = vrot.lane.b32.xlu1 %v5915_v37, %s5812_s24  ;;  %v6203_v37 = vpop.permute.xlu0 %1866 }
  0xd1   : > { %1406 = vrot.lane.b32.xlu0 %v1382_v8, %s5811_s23  ;;  %7246 = vst [vmem:[#allocation4_spill] sm:$0xff] %v6203_v37  ;;  %v1887_v8 = vmul.bf16 %v6241_v57, %v6029_v25 }
  0xd4   : > { %2643 = vrot.lane.b32.xlu1 %v5927_v45, %s5812_s24  ;;  %v1865_v45 = vpop.permute.xlu1 %1864 }
  0xd5   : > { %1632 = vrot.lane.b32.xlu0 %v6040_v29, %s5809_s21  ;;  %v6236_v48 = vsel %vm1868_vm3, %v1865_v45, %v6203_v37 }
  0xd6   : > { %7249 = vst [vmem:[#allocation7_spill] sm:$0xff] %v6236_v48 }
  0xd8   : > { %1636 = vrot.lane.b32.xlu1 %v6052_v35, %s5809_s21  ;;  %v2134_v19 = vpop.permute.xlu1 %2133 }
  0xd9   : > { %2637 = vrot.lane.b32.xlu0 %v5910_v34, %s5812_s24  ;;  %v6207_v34 = vsel %vm1868_vm3, %v6182_v42, %v1855_v39  ;;  %v6255_v39 = vsel %vm1868_vm3, %v1859_v4, %v1861_v14  ;;  %v6273_v14 = vsel %vm1868_vm3, %v1863_v11, %v1865_v45 }
  0xda   : > { %7251 = vst [vmem:[#allocation9_spill] sm:$0xff] %v6255_v39  ;;  %7253 = vst [vmem:[#allocation11_spill] sm:$0xff] %v6273_v14  ;;  %v1891_v11 = vmul.bf16 %v6273_v14, %v6055_v36 }
  0xdc   : > { %1640 = vrot.lane.b32.xlu1 %v6067_v44, %s5809_s21  ;;  %v2138_v40 = vpop.permute.xlu1 %2137 }
  0xdd   : > { %2641 = vrot.lane.b32.xlu0 %v5922_v41, %s5812_s24  ;;  %v1886_v41 = vmul.bf16 %v6207_v34, %v6026_v24 }
  0xe0   : > { %2647 = vrot.lane.b32.xlu1 %v5938_v52, %s5812_s24  ;;  %v6216_v52 = vsel %vm1868_vm3, %v1857_v6, %v1859_v4  ;;  %v1889_v4 = vmul.bf16 %v6255_v39, %v6043_v31 }
  0xe1   : > { %2645 = vrot.lane.b32.xlu0 %v5932_v49, %s5812_s24  ;;  %v6218_v49 = vpop.permute.xlu0 %2131 }
  0xe2   : > { %7247 = vst [vmem:[#allocation5_spill] sm:$0xff] %v6218_v49  ;;  %v2164_v27 = vmul.bf16 %v6218_v49, %v6015_v20  ;;  %v6302_v14 = vsel %vm2147_vm4, %v6218_v49, %v2134_v19  ;;  %v6322_v49 = vld [vmem:[%s7217_s2 + $0x1] sm:$0x1] }
  0xe3   : > { %7256 = vst [vmem:[#allocation14_spill] sm:$0xff] %v6302_v14 }
  0xe4   : > { %2651 = vrot.lane.b32.xlu1 %v5950_v59, %s5812_s24  ;;  %v1888_v59 = vmul.bf16 %v6216_v52, %v6040_v29 }
  0xe5   : > { %1638 = vrot.lane.b32.xlu0 %v6055_v36, %s5809_s21  ;;  %v2136_v32 = vpop.permute.xlu0 %2135 }
  0xe8   : > { %1907 = vrot.lane.b32.xlu1 %v1886_v41, %s5813_s25  ;;  %v6257_v41 = vpop.permute.xlu1 %2141 }
  0xe9   : > { %1642 = vrot.lane.b32.xlu0 %v6098_v0, %s5809_s21  ;;  %v2140_v6 = vpop.permute.xlu0 %2139 }
  0xea   : > { %v6285_v21 = vsel %vm2147_vm4, %v2138_v40, %v2140_v6 }
  0xeb   : > { %7255 = vst [vmem:[#allocation13_spill] sm:$0xff] %v6285_v21  ;;  %v2168_v5 = vmul.bf16 %v6285_v21, %v6043_v31 }
  0xec   : > { %1911 = vrot.lane.b32.xlu1 %v1888_v59, %s5813_s25  ;;  %v6261_v59 = vsub.s32 %v2923_v61, %v5872_v3 }
  0xed   : > { %2649 = vrot.lane.b32.xlu0 %v5945_v56, %s5812_s24  ;;  %v1892_v56 = vmul.bf16 %v6236_v48, %v6067_v44  ;;  %v6278_v61 = vpop.permute.xlu0 %2143 }
  0xee   : > { %v2927_v3 = vrot.slane %v2916_v26, %v6261_v59 }
  0xf0   : > { %1915 = vrot.lane.b32.xlu1 %v1890_v47, %s5813_s25  ;;  %v6268_v47 = vsel %vm2147_vm4, %v2134_v19, %v2136_v32  ;;  %v2935_v45 = vcombine.high %v2927_v3, %v2927_v3 }
  0xf1   : > { %1905 = vrot.lane.b32.xlu0 %v1885_v55, %s5813_s25  ;;  %7252 = vst [vmem:[#allocation10_spill] sm:$0xff] %v6268_v47  ;;  %v2920_v55 = vcombine.high %v2916_v26, %v2916_v26 }
  0xf3   : > { %v6291_v26 = vrot.slane %v2920_v55, %v6261_v59 }
  0xf4   : > { %1919 = vrot.lane.b32.xlu1 %v1892_v56, %s5813_s25  ;;  %v6280_v56 = vpop.permute.xlu1 %2145 }
  0xf5   : > { %1909 = vrot.lane.b32.xlu0 %v1887_v8, %s5813_s25  ;;  %7254 = vst [vmem:[#allocation12_spill] sm:$0xff] %v6280_v56  ;;  %v2166_v8 = vmul.bf16 %v6268_v47, %v6029_v25  ;;  %v1893_v47 = vmul.bf16 %v6203_v37, %v6098_v0  ;;  %v2936_v55 = vcombine.high %v6291_v26, %v6291_v26 }
  0xf6   : > { %v2165_v37 = vmul.bf16 %v6302_v14, %v6026_v24  ;;  %v2917_v14 = vld [vmem:[%s6248_s10 + $0x8] sm:$0xff] }
  0xf8   : > { %2184 = vrot.lane.b32.xlu1 %v2164_v27, %s5806_s19 }
  0xf9   : > { %1913 = vrot.lane.b32.xlu0 %v1889_v4, %s5813_s25 }
  0xfc   : > { %2188 = vrot.lane.b32.xlu1 %v2166_v8, %s5806_s19  ;;  %v2963_v8 = vpack.c.bf16 %v2935_v45, %v2935_v45 }
  0xfd   : > { %1917 = vrot.lane.b32.xlu0 %v1891_v11, %s5813_s25 }
  0xfe   : > { %v534_v27 = vpop.permute.xlu0 %533  ;;  %v6294_v4 = vpop.permute.xlu1 %1626 }
 0x100   : > { %2192 = vrot.lane.b32.xlu1 %v2168_v5, %s5806_s19  ;;  %v6313_v5 = vsel %vm2147_vm4, %v2136_v32, %v2138_v40  ;;  %v6331_v40 = vsel %vm2147_vm4, %v2140_v6, %v6257_v41 }
 0x101   : > { %1921 = vrot.lane.b32.xlu0 %v1893_v47, %s5813_s25  ;;  %7257 = vst [vmem:[#allocation15_spill] sm:$0xff] %v6313_v5  ;;  %v2965_v47 = vpack.c.bf16 %v2936_v55, %v2936_v55  ;;  %7258 = vst [vmem:[#allocation16_spill] sm:$0xff] %v6331_v40  ;;  %v7259_v55 = vmov 0   ;;  %v2169_v6 = vmul.bf16 %v6331_v40, %v6052_v35  ;;  %v2964_v40 = vpack.c.bf16 %v6291_v26, %v6291_v26 }
 0x102   : > { %v538_v11 = vpop.permute.xlu0 %537  ;;  %v536_v48 = vpop.permute.xlu1 %535  ;;  %v521_v26 = vmul.bf16 %v5961_v2, %v6026_v24 }
 0x103   : > { %v553_v21 = vsel %vm551_vm5, %v536_v48, %v538_v11  ;;  %v552_v19 = vsel %vm551_vm5, %v534_v27, %v536_v48  ;;  %v2937_v27 = vcombine.high %v2917_v14, %v2917_v14 }
 0x104   : > { %2980 = vrot.lane.b32.xlu1 %v2963_v8, %s5802_s13  ;;  %5324 = vmatprep.subr.msk.bf16.mxu0 %vm564_vm6, %v553_v21  ;;  %v566_v45 = vsel %vm564_vm6, %v552_v19, 0  ;;  %v2167_v21 = vmul.bf16 %v6313_v5, %v6040_v29  ;;  %v2962_v8 = vpack.c.bf16 %v2927_v3, %v2927_v3 }
 0x105   : > { %2186 = vrot.lane.b32.xlu0 %v2165_v37, %s5806_s19  ;;  %590 = vmatpush1.bf16.msra.mxu0 %v566_v45  ;;  %v2944_v37 = vrot.slane %v2917_v14, %v6261_v59 }
 0x106   : > { %v6325_v48 = vpop.permute.xlu0 %1628  ;;  %v6327_v32 = vpop.permute.xlu1 %1630 }
 0x107   : > { %v2952_v3 = vcombine.high %v2944_v37, %v2944_v37 }
 0x108   : > { %2984 = vrot.lane.b32.xlu1 %v2965_v47, %s5802_s13  ;;  %5325 = vmatmul.mubr.msk.bf16.vlgmr.msra.gmra.mrb[0].mxu0 %vm560_vm1, %v6322_v49  ;;  %v6346_v47 = vsel %vm2147_vm4, %v6278_v61, %v6280_v56 }
 0x109   : > { %2190 = vrot.lane.b32.xlu0 %v2167_v21, %s5806_s19  ;;  %703 = vmatprep.mubr.bf16.mxu0 %v7259_v55  ;;  %7260 = vst [vmem:[#allocation17_spill] sm:$0xff] %v6346_v47  ;;  %v2951_v21 = vrot.slane %v2937_v27, %v6261_v59  ;;  %v2171_v23 = vmul.bf16 %v6346_v47, %v6067_v44 }
 0x10a   : > { %v542_v19 = vpop.permute.xlu0 %541  ;;  %v540_v45 = vpop.permute.xlu1 %539  ;;  %v2967_v27 = vpack.c.bf16 %v2952_v3, %v2952_v3 }
 0x10b   : > { %v555_v5 = vsel %vm551_vm5, %v540_v45, %v542_v19  ;;  %v554_v39 = vsel %vm551_vm5, %v538_v11, %v540_v45 }
 0x10c   : > { %2194 = vrot.lane.b32.xlu1 %v2169_v6, %s5806_s19  ;;  %5326 = vmatprep.subr.msk.bf16.mxu1 %vm564_vm6, %v555_v5  ;;  %v572_v14 = vsel %vm564_vm6, %v554_v39, 0  ;;  %v520_v39 = vmul.bf16 %v5955_v63, %v6015_v20 }
 0x10d   : > { %2978 = vrot.lane.b32.xlu0 %v2962_v8, %s5802_s13  ;;  %631 = vmatpush1.bf16.msra.mxu1 %v572_v14  ;;  %v2953_v8 = vcombine.high %v2951_v21, %v2951_v21 }
 0x10e   : > { %v546_v57 = vpop.permute.xlu0 %545  ;;  %v544_v11 = vpop.permute.xlu1 %543 }
 0x10f   : > { %v556_v6 = vsel %vm551_vm5, %v542_v19, %v544_v11  ;;  %v557_v5 = vsel %vm551_vm5, %v544_v11, %v546_v57  ;;  %v2966_v19 = vpack.c.bf16 %v2944_v37, %v2944_v37  ;;  %v525_v37 = vmul.bf16 %v5978_v15, %v6052_v35  ;;  %v6396_v11 = vld [vmem:[%s7217_s2] sm:$0x1] }
 0x110   : > { %2198 = vrot.lane.b32.xlu1 %v2171_v23, %s5806_s19  ;;  %5328 = vmatprep.subr.msk.bf16.mxu0 %vm564_vm6, %v557_v5  ;;  %v578_v59 = vsel %vm564_vm6, %v556_v6, 0  ;;  %v6376_v23 = vsel %vm2147_vm4, %v6257_v41, %v6278_v61  ;;  %v2969_v14 = vpack.c.bf16 %v2953_v8, %v2953_v8  ;;  %v524_v61 = vmul.bf16 %v5974_v13, %v6043_v31 }
 0x111   : > { %2982 = vrot.lane.b32.xlu0 %v2964_v40, %s5802_s13  ;;  %672 = vmatpush1.bf16.msra.mxu0 %v578_v59  ;;  %7261 = vst [vmem:[#allocation18_spill] sm:$0xff] %v6376_v23  ;;  %v757_v40 = vsel %vm564_vm6, %v520_v39, 0  ;;  %v2170_v41 = vmul.bf16 %v6376_v23, %v6055_v36  ;;  %v2172_v5 = vmul.bf16 %v6280_v56, %v6098_v0 }
 0x112   : > { %5332 = vmatprep.subr.msk.bf16.mxu0 %vm564_vm6, %v521_v26  ;;  %v1112_v45 = vpop.permute.xlu1 %1111  ;;  %5327 = vmatmul.mubr.msk.bf16.vlgmr.msra.gmra.mrb[0].mxu1 %vm560_vm1, %v6322_v49  ;;  %v769_v39 = vsel %vm564_vm6, %v524_v61, 0  ;;  %v2968_v59 = vpack.c.bf16 %v2951_v21, %v2951_v21 }
 0x113   : > { %744 = vmatprep.mubr.bf16.mxu1 %v7259_v55 }
 0x114   : > { %2988 = vrot.lane.b32.xlu1 %v2967_v27, %s5802_s13  ;;  %5329 = vmatmul.mubr.msk.bf16.vlgmr.msra.gmra.mrb[4].mxu0 %vm560_vm1, %v6322_v49 }
 0x115   : > { %2986 = vrot.lane.b32.xlu0 %v2966_v19, %s5802_s13  ;;  %781 = vmatpush1.bf16.msra.mxu0 %v757_v40 }
 0x116   : > { %5336 = vmatprep.subr.msk.bf16.mxu0 %vm564_vm6, %v525_v37  ;;  %v548_v3 = vpop.permute.xlu1 %547  ;;  %812 = vmatprep.mubr.bf16.mxu0 %v7259_v55  ;;  %v522_v37 = vmul.bf16 %v5966_v7, %v6029_v25 }
 0x117   : > { %v558_v8 = vsel %vm551_vm5, %v546_v57, %v548_v3  ;;  %v523_v57 = vmul.bf16 %v5970_v10, %v6040_v29 }
 0x118   : > { %2992 = vrot.lane.b32.xlu1 %v2969_v14, %s5802_s13  ;;  %v584_v21 = vsel %vm564_vm6, %v558_v8, 0 }
 0x119   : > { %2196 = vrot.lane.b32.xlu0 %v2170_v41, %s5806_s19 }
 0x11a   : > { %v6398_v6 = vpop.permute.xlu1 %1115 }
 0x11c   : > { %2413 = vrot.lane.b32.xlu1 %v6026_v24, %s5815_s16  ;;  %5333 = vmatmul.mubr.msk.bf16.vlgmr.msra.gmra.mrb[0].mxu0 %vm560_vm1, %v6396_v11 }
 0x11d   : > { %863 = vmatpush1.bf16.msra.mxu0 %v769_v39  ;;  %2200 = vrot.lane.b32.xlu0 %v2172_v5, %s5806_s19  ;;  %v763_v5 = vsel %vm564_vm6, %v522_v37, 0 }
 0x11e   : > { %894 = vmatprep.mubr.bf16.mxu0 %v7259_v55  ;;  %v1122_v27 = vpop.permute.xlu1 %1121 }
 0x11f   : > { %v1399_v26 = vpop.permute.xlu0 %1398 }
 0x120   : > { %2417 = vrot.lane.b32.xlu1 %v6040_v29, %s5815_s16 }
 0x121   : > { %2990 = vrot.lane.b32.xlu0 %v2968_v59, %s5802_s13  ;;  %v527_v59 = vmul.bf16 %v5986_v18, %v6067_v44 }
 0x122   : > { %v1401_v14 = vpop.permute.xlu1 %1400 }
 0x123   : > { %v550_v19 = vpop.permute.xlu0 %549 }
 0x124   : > { %v559_v40 = vsel %vm551_vm5, %v548_v3, %v550_v19  ;;  %2421 = vrot.lane.b32.xlu1 %v6052_v35, %s5815_s16  ;;  %5337 = vmatmul.mubr.msk.bf16.vlgmr.msra.gmra.mrb[4].mxu0 %vm560_vm1, %v6396_v11  ;;  %v6446_v19 = vld [vmem:[%s7217_s2 + $0x2] sm:$0x1] }
 0x125   : > { %2411 = vrot.lane.b32.xlu0 %v6015_v20, %s5815_s16  ;;  %5330 = vmatprep.subr.msk.bf16.mxu1 %vm564_vm6, %v559_v40  ;;  %v526_v40 = vmul.bf16 %v5982_v17, %v6055_v36 }
 0x126   : > { %713 = vmatpush1.bf16.msra.mxu1 %v584_v21  ;;  %1197 = vmatprep.mubr.bf16.mxu0 %v7259_v55 }
 0x127   : > { %v1114_v3 = vpop.permute.xlu0 %1113  ;;  %5334 = vmatprep.subr.msk.bf16.mxu1 %vm564_vm6, %v523_v57 }
 0x128   : > { %v1130_v41 = vsel %vm1129_vm7, %v1112_v45, %v1114_v3  ;;  %2425 = vrot.lane.b32.xlu1 %v6067_v44, %s5815_s16  ;;  %v1131_v61 = vsel %vm1129_vm7, %v1114_v3, %v6398_v6 }
 0x129   : > { %2415 = vrot.lane.b32.xlu0 %v6029_v25, %s5815_s16  ;;  %5331 = vmatmul.mubr.msk.bf16.vlgmr.msra.gmra.mrb[4].mxu1 %vm560_vm1, %v6322_v49  ;;  %v1142_v39 = vsel %vm564_vm6, %v1130_v41, 0 }
 0x12a   : > { %5341 = vmatprep.subr.msk.bf16.mxu0 %vm564_vm6, %v1131_v61  ;;  %822 = vmatpush1.bf16.msra.mxu1 %v763_v5  ;;  %v1409_v45 = vpop.permute.xlu1 %1408  ;;  %v775_v61 = vsel %vm564_vm6, %v526_v40, 0 }
 0x12b   : > { %1166 = vmatpush1.bf16.msra.mxu0 %v1142_v39  ;;  %v1124_v8 = vpop.permute.xlu0 %1123  ;;  %5338 = vmatprep.subr.msk.bf16.mxu1 %vm564_vm6, %v527_v59 }
 0x12c   : > { %v1135_v49 = vsel %vm1129_vm7, %v1122_v27, %v1124_v8  ;;  %853 = vmatprep.mubr.bf16.mxu1 %v7259_v55 }
 0x12d   : > { %2419 = vrot.lane.b32.xlu0 %v6043_v31, %s5815_s16  ;;  %5345 = vmatprep.subr.msk.bf16.mxu0 %vm564_vm6, %v1135_v49 }
 0x12e   : > { %5342 = vmatmul.mubr.msk.bf16.vlgmr.msra.gmra.mrb[0].mxu0 %vm560_vm1, %v6446_v19  ;;  %v1120_v21 = vpop.permute.xlu1 %1119 }
 0x12f   : > { %v1134_v57 = vsel %vm1129_vm7, %v1120_v21, %v1122_v27  ;;  %v1403_v37 = vpop.permute.xlu0 %1402  ;;  %1279 = vmatprep.mubr.bf16.mxu0 %v7259_v55  ;;  %v1417_v27 = vsel %vm1416_vm8, %v1399_v26, %v1401_v14 }
 0x130   : > { %v1154_v3 = vsel %vm564_vm6, %v1134_v57, 0  ;;  %v1418_v41 = vsel %vm1416_vm8, %v1401_v14, %v1403_v37  ;;  %v1429_v49 = vsel %vm564_vm6, %v1417_v27, 0 }
 0x131   : > { %2423 = vrot.lane.b32.xlu0 %v6055_v36, %s5815_s16  ;;  %5335 = vmatmul.mubr.msk.bf16.vlgmr.msra.gmra.mrb[0].mxu1 %vm560_vm1, %v6396_v11 }
 0x132   : > { %904 = vmatpush1.bf16.msra.mxu1 %v775_v61  ;;  %1248 = vmatpush1.bf16.msra.mxu0 %v1154_v3  ;;  %v1126_v5 = vpop.permute.xlu1 %1125  ;;  %v6486_v3 = vld [vmem:[%s7217_s2 + $0x3] sm:$0x1] }
 0x133   : > { %5350 = vmatprep.subr.msk.bf16.mxu0 %vm564_vm6, %v1418_v41  ;;  %v6468_v39 = vpop.permute.xlu0 %1410  ;;  %935 = vmatprep.mubr.bf16.mxu1 %v7259_v55 }
 0x134   : > { %v1422_v59 = vsel %vm1416_vm8, %v1409_v45, %v6468_v39 }
 0x135   : > { %2427 = vrot.lane.b32.xlu0 %v6098_v0, %s5815_s16 }
 0x136   : > { %5346 = vmatmul.mubr.msk.bf16.vlgmr.msra.gmra.mrb[4].mxu0 %vm560_vm1, %v6446_v19  ;;  %v1405_v40 = vpop.permute.xlu1 %1404 }
 0x137   : > { %1453 = vmatpush1.bf16.msra.mxu0 %v1429_v49  ;;  %v1128_v26 = vpop.permute.xlu0 %1127  ;;  %1484 = vmatprep.mubr.bf16.mxu0 %v7259_v55  ;;  %v1136_v49 = vsel %vm1129_vm7, %v1124_v8, %v1126_v5  ;;  %v1645_v8 = vsel %vm1644_vm9, %v6294_v4, %v6325_v48  ;;  %v1419_v4 = vsel %vm1416_vm8, %v1403_v37, %v1405_v40 }
 0x138   : > { %5354 = vmatprep.subr.msk.bf16.mxu0 %vm564_vm6, %v1422_v59  ;;  %v1137_v47 = vsel %vm1129_vm7, %v1126_v5, %v1128_v26  ;;  %v1435_v37 = vsel %vm564_vm6, %v1419_v4, 0 }
 0x139   : > { %5339 = vmatmul.mubr.msk.bf16.vlgmr.msra.gmra.mrb[4].mxu1 %vm560_vm1, %v6396_v11 }
 0x13a   : > { %v1413_v14 = vpop.permute.xlu1 %1412  ;;  %1238 = vmatprep.mubr.bf16.mxu1 %v7259_v55 }
 0x13b   : > { %v1415_v57 = vpop.permute.xlu0 %1414 }
 0x13e   : > { %v6488_v41 = vpop.permute.xlu1 %1634  ;;  %5351 = vmatmul.mubr.msk.bf16.vlgmr.msra.gmra.mrb[0].mxu0 %vm560_vm1, %v6486_v3 }
 0x13f   : > { %v1118_v61 = vpop.permute.xlu0 %1117  ;;  %1566 = vmatprep.mubr.bf16.mxu0 %v7259_v55 }
 0x140   : > { %v1132_v11 = vsel %vm1129_vm7, %v6398_v6, %v1118_v61  ;;  %v1133_v27 = vsel %vm1129_vm7, %v1118_v61, %v1120_v21  ;;  %v1160_v6 = vsel %vm564_vm6, %v1136_v49, 0  ;;  %v6539_v49 = vld [vmem:[%s7217_s2 + $0x4] sm:$0x1] }
 0x141   : > { %5343 = vmatprep.subr.msk.bf16.mxu1 %vm564_vm6, %v1133_v27  ;;  %v1148_v59 = vsel %vm564_vm6, %v1132_v11, 0 }
 0x142   : > { %1207 = vmatpush1.bf16.msra.mxu1 %v1148_v59  ;;  %v2640_v56 = vpop.permute.xlu1 %2639 }
 0x143   : > { %v1407_v23 = vpop.permute.xlu0 %1406  ;;  %5347 = vmatprep.subr.msk.bf16.mxu1 %vm564_vm6, %v1137_v47  ;;  %v1646_v47 = vsel %vm1644_vm9, %v6325_v48, %v6327_v32 }
 0x144   : > { %v1421_v17 = vsel %vm1416_vm8, %v1407_v23, %v1409_v45  ;;  %v1420_v26 = vsel %vm1416_vm8, %v1405_v40, %v1407_v23  ;;  %v1424_v40 = vsel %vm1416_vm8, %v1413_v14, %v1415_v57 }
 0x145   : > { %5344 = vmatmul.mubr.msk.bf16.vlgmr.msra.gmra.mrb[0].mxu1 %vm560_vm1, %v6446_v19  ;;  %v1441_v21 = vsel %vm564_vm6, %v1421_v17, 0  ;;  %v1657_v17 = vsel %vm564_vm6, %v1645_v8, 0 }
 0x146   : > { %1289 = vmatpush1.bf16.msra.mxu1 %v1160_v6  ;;  %1535 = vmatpush1.bf16.msra.mxu0 %v1441_v21  ;;  %v2644_v5 = vpop.permute.xlu1 %2643  ;;  %v1423_v21 = vsel %vm1416_vm8, %v6468_v39, %v1413_v14 }
 0x147   : > { %v1633_v45 = vpop.permute.xlu0 %1632  ;;  %5352 = vmatprep.subr.msk.bf16.mxu1 %vm564_vm6, %v1420_v26  ;;  %5359 = vmatprep.subr.msk.bf16.mxu0 %vm564_vm6, %v1646_v47  ;;  %v1447_v14 = vsel %vm564_vm6, %v1423_v21, 0 }
 0x148   : > { %1320 = vmatprep.mubr.bf16.mxu1 %v7259_v55 }
 0x149   : > { %5355 = vmatmul.mubr.msk.bf16.vlgmr.msra.gmra.mrb[4].mxu0 %vm560_vm1, %v6486_v3 }
 0x14a   : > { %1681 = vmatpush1.bf16.msra.mxu0 %v1657_v17  ;;  %v1637_v23 = vpop.permute.xlu1 %1636  ;;  %1712 = vmatprep.mubr.bf16.mxu0 %v7259_v55 }
 0x14b   : > { %v6521_v48 = vpop.permute.xlu0 %2637  ;;  %v1649_v47 = vsel %vm1644_vm9, %v6488_v41, %v1637_v23 }
 0x14c   : > { %v6525_v61 = vsel %vm2653_vm10, %v6521_v48, %v2640_v56  ;;  %v2670_v11 = vmul.bf16 %v6521_v48, %v6015_v20  ;;  %v1669_v4 = vsel %vm564_vm6, %v1649_v47, 0 }
 0x14d   : > { %v2671_v27 = vmul.bf16 %v6525_v61, %v6026_v24  ;;  %5348 = vmatmul.mubr.msk.bf16.vlgmr.msra.gmra.mrb[4].mxu1 %vm560_vm1, %v6446_v19 }
 0x14e   : > { %1494 = vmatpush1.bf16.msra.mxu1 %v1435_v37  ;;  %2690 = vrot.lane.b32.xlu1 %v2670_v11, %s5816_s26  ;;  %v1641_v59 = vpop.permute.xlu1 %1640 }
 0x14f   : > { %5356 = vmatprep.subr.msk.bf16.mxu1 %vm564_vm6, %v1424_v40  ;;  %v2642_v20 = vpop.permute.xlu0 %2641  ;;  %2692 = vrot.lane.b32.xlu0 %v2671_v27, %s5816_s26 }
 0x150   : > { %v6544_v24 = vsel %vm2653_vm10, %v2640_v56, %v2642_v20  ;;  %v6547_v19 = vsel %vm2653_vm10, %v2642_v20, %v2644_v5  ;;  %1525 = vmatprep.mubr.bf16.mxu1 %v7259_v55 }
 0x151   : > { %v2672_v57 = vmul.bf16 %v6544_v24, %v6029_v25  ;;  %v2673_v6 = vmul.bf16 %v6547_v19, %v6040_v29  ;;  %5360 = vmatmul.mubr.msk.bf16.vlgmr.msra.gmra.mrb[0].mxu0 %vm560_vm1, %v6539_v49 }
 0x152   : > { %v2648_v8 = vpop.permute.xlu1 %2647  ;;  %1794 = vmatprep.mubr.bf16.mxu0 %v7259_v55 }
 0x153   : > { %v2646_v56 = vpop.permute.xlu0 %2645  ;;  %2694 = vrot.lane.b32.xlu1 %v2672_v57, %s5816_s26  ;;  %2696 = vrot.lane.b32.xlu0 %v2673_v6, %s5816_s26 }
 0x154   : > { %v6562_v26 = vsel %vm2653_vm10, %v2644_v5, %v2646_v56  ;;  %v6565_v25 = vsel %vm2653_vm10, %v2646_v56, %v2648_v8  ;;  %v1648_v5 = vsel %vm1644_vm9, %v1633_v45, %v6488_v41  ;;  %v1647_v41 = vsel %vm1644_vm9, %v6327_v32, %v1633_v45 }
 0x155   : > { %v2674_v29 = vmul.bf16 %v6562_v26, %v6043_v31  ;;  %v2675_v39 = vmul.bf16 %v6565_v25, %v6052_v35  ;;  %5353 = vmatmul.mubr.msk.bf16.vlgmr.msra.gmra.mrb[0].mxu1 %vm560_vm1, %v6486_v3  ;;  %v1663_v40 = vsel %vm564_vm6, %v1647_v41, 0 }
 0x156   : > { %1576 = vmatpush1.bf16.msra.mxu1 %v1447_v14  ;;  %v6578_v17 = vpop.permute.xlu1 %2651  ;;  %1607 = vmatprep.mubr.bf16.mxu1 %v7259_v55 }
 0x157   : > { %5361 = vmatprep.subr.msk.bf16.mxu1 %vm564_vm6, %v1648_v5  ;;  %v1639_v31 = vpop.permute.xlu0 %1638  ;;  %2698 = vrot.lane.b32.xlu1 %v2674_v29, %s5816_s26 }
 0x158   : > { %2700 = vrot.lane.b32.xlu0 %v2675_v39, %s5816_s26  ;;  %v1650_v35 = vsel %vm1644_vm9, %v1637_v23, %v1639_v31  ;;  %v1651_v6 = vsel %vm1644_vm9, %v1639_v31, %v1641_v59  ;;  %v5367_v31 = vld [vmem:[%s7217_s2 + $0x5] sm:$0x1] }
 0x159   : > { %5363 = vmatprep.subr.msk.bf16.mxu0 %vm564_vm6, %v1650_v35 }
 0x15a   : > { %1763 = vmatpush1.bf16.msra.mxu0 %v1669_v4  ;;  %v1908_v11 = vpop.permute.xlu1 %1907 }
 0x15b   : > { %v1643_v27 = vpop.permute.xlu0 %1642 }
 0x15c   : > { %v1652_v37 = vsel %vm1644_vm9, %v1641_v59, %v1643_v27 }
 0x15d   : > { %5357 = vmatmul.mubr.msk.bf16.vlgmr.msra.gmra.mrb[4].mxu1 %vm560_vm1, %v6486_v3  ;;  %5364 = vmatmul.mubr.msk.bf16.vlgmr.msra.gmra.mrb[4].mxu0 %vm560_vm1, %v6539_v49 }
 0x15e   : > { %1722 = vmatpush1.bf16.msra.mxu1 %v1663_v40  ;;  %v1912_v23 = vpop.permute.xlu1 %1911  ;;  %1753 = vmatprep.mubr.bf16.mxu1 %v7259_v55 }
 0x15f   : > { %5365 = vmatprep.subr.msk.bf16.mxu1 %vm564_vm6, %v1652_v37  ;;  %v2650_v32 = vpop.permute.xlu0 %2649  ;;  %1991 = vmatprep.mubr.bf16.mxu0 %v7259_v55 }
 0x160   : > { %v6599_v45 = vsel %vm2653_vm10, %v2648_v8, %v2650_v32  ;;  %v6603_v3 = vsel %vm2653_vm10, %v2650_v32, %v6578_v17  ;;  %v2678_v8 = vmul.bf16 %v6578_v17, %v6098_v0 }
 0x161   : > { %v2676_v20 = vmul.bf16 %v6599_v45, %v6055_v36  ;;  %v2677_v57 = vmul.bf16 %v6603_v3, %v6067_v44  ;;  %v1675_v36 = vsel %vm564_vm6, %v1651_v6, 0 }
 0x162   : > { %v1916_v21 = vpop.permute.xlu1 %1915 }
 0x163   : > { %v1906_v56 = vpop.permute.xlu0 %1905  ;;  %2702 = vrot.lane.b32.xlu1 %v2676_v20, %s5816_s26  ;;  %2704 = vrot.lane.b32.xlu0 %v2677_v57, %s5816_s26 }
 0x164   : > { %v1924_v29 = vsel %vm1923_vm11, %v1906_v56, %v1908_v11 }
 0x165   : > { %5362 = vmatmul.mubr.msk.bf16.vlgmr.msra.gmra.mrb[0].mxu1 %vm560_vm1, %v6539_v49  ;;  %v1936_v14 = vsel %vm564_vm6, %v1924_v29, 0 }
 0x166   : > { %1804 = vmatpush1.bf16.msra.mxu1 %v1675_v36  ;;  %v1920_v44 = vpop.permute.xlu1 %1919  ;;  %1835 = vmatprep.mubr.bf16.mxu1 %v7259_v55 }
 0x167   : > { %v1910_v59 = vpop.permute.xlu0 %1909  ;;  %2706 = vrot.lane.b32.xlu1 %v2678_v8, %s5816_s26 }
 0x168   : > { %v1925_v39 = vsel %vm1923_vm11, %v1908_v11, %v1910_v59  ;;  %v1926_v0 = vsel %vm1923_vm11, %v1910_v59, %v1912_v23  ;;  %v5376_v59 = vld [vmem:[%s7217_s2 + $0x6] sm:$0x1] }
 0x169   : > { %5368 = vmatprep.subr.msk.bf16.mxu0 %vm564_vm6, %v1925_v39  ;;  %v1942_v4 = vsel %vm564_vm6, %v1926_v0, 0 }
 0x16a   : > { %1960 = vmatpush1.bf16.msra.mxu0 %v1936_v14  ;;  %v2185_v47 = vpop.permute.xlu1 %2184 }
 0x16b   : > { %v1914_v5 = vpop.permute.xlu0 %1913 }
 0x16c   : > { %v1927_v35 = vsel %vm1923_vm11, %v1912_v23, %v1914_v5  ;;  %v1928_v41 = vsel %vm1923_vm11, %v1914_v5, %v1916_v21 }
 0x16d   : > { %5370 = vmatprep.subr.msk.bf16.mxu1 %vm564_vm6, %v1927_v35  ;;  %5366 = vmatmul.mubr.msk.bf16.vlgmr.msra.gmra.mrb[4].mxu1 %vm560_vm1, %v6539_v49  ;;  %v1948_v40 = vsel %vm564_vm6, %v1928_v41, 0 }
 0x16e   : > { %2001 = vmatpush1.bf16.msra.mxu1 %v1942_v4  ;;  %v2189_v11 = vpop.permute.xlu1 %2188  ;;  %5369 = vmatmul.mubr.msk.bf16.vlgmr.msra.gmra.mrb[0].mxu0 %vm560_vm1, %v5367_v31 }
 0x16f   : > { %v1918_v27 = vpop.permute.xlu0 %1917  ;;  %2032 = vmatprep.mubr.bf16.mxu1 %v7259_v55  ;;  %2073 = vmatprep.mubr.bf16.mxu0 %v7259_v55 }
 0x170   : > { %v1929_v37 = vsel %vm1923_vm11, %v1916_v21, %v1918_v27  ;;  %v1930_v49 = vsel %vm1923_vm11, %v1918_v27, %v1920_v44 }
 0x171   : > { %5372 = vmatprep.subr.msk.bf16.mxu0 %vm564_vm6, %v1929_v37  ;;  %v1954_v57 = vsel %vm564_vm6, %v1930_v49, 0 }
 0x172   : > { %2042 = vmatpush1.bf16.msra.mxu0 %v1948_v40  ;;  %v2193_v23 = vpop.permute.xlu1 %2192 }
 0x173   : > { %v1922_v32 = vpop.permute.xlu0 %1921 }
 0x174   : > { %v1931_v20 = vsel %vm1923_vm11, %v1920_v44, %v1922_v32 }
 0x175   : > { %5374 = vmatprep.subr.msk.bf16.mxu1 %vm564_vm6, %v1931_v20  ;;  %5371 = vmatmul.mubr.msk.bf16.vlgmr.msra.gmra.mrb[0].mxu1 %vm560_vm1, %v5367_v31 }
 0x176   : > { %2083 = vmatpush1.bf16.msra.mxu1 %v1954_v57  ;;  %v2981_v6 = vpop.permute.xlu1 %2980  ;;  %5373 = vmatmul.mubr.msk.bf16.vlgmr.msra.gmra.mrb[4].mxu0 %vm560_vm1, %v5367_v31 }
 0x177   : > { %v2187_v21 = vpop.permute.xlu0 %2186  ;;  %2114 = vmatprep.mubr.bf16.mxu1 %v7259_v55  ;;  %2269 = vmatprep.mubr.bf16.mxu0 %v7259_v55 }
 0x178   : > { %v2202_v56 = vsel %vm2147_vm4, %v2185_v47, %v2187_v21  ;;  %v2203_v8 = vsel %vm2147_vm4, %v2187_v21, %v2189_v11 }
 0x179   : > { %5377 = vmatprep.subr.msk.bf16.mxu0 %vm564_vm6, %v2203_v8  ;;  %v2214_v36 = vsel %vm564_vm6, %v2202_v56, 0 }
 0x17a   : > { %2238 = vmatpush1.bf16.msra.mxu0 %v2214_v36  ;;  %v2985_v29 = vpop.permute.xlu1 %2984 }
 0x17b   : > { %v2191_v44 = vpop.permute.xlu0 %2190 }
 0x17c   : > { %v2204_v39 = vsel %vm2147_vm4, %v2189_v11, %v2191_v44  ;;  %v2205_v14 = vsel %vm2147_vm4, %v2191_v44, %v2193_v23 }
 0x17d   : > { %5379 = vmatprep.subr.msk.bf16.mxu1 %vm564_vm6, %v2205_v14  ;;  %5375 = vmatmul.mubr.msk.bf16.vlgmr.msra.gmra.mrb[4].mxu1 %vm560_vm1, %v5367_v31  ;;  %v2220_v0 = vsel %vm564_vm6, %v2204_v39, 0 }
 0x17e   : > { %2279 = vmatpush1.bf16.msra.mxu1 %v2220_v0  ;;  %v2195_v47 = vpop.permute.xlu1 %2194  ;;  %5378 = vmatmul.mubr.msk.bf16.vlgmr.msra.gmra.mrb[0].mxu0 %vm560_vm1, %v5376_v59 }
 0x17f   : > { %v2979_v5 = vpop.permute.xlu0 %2978  ;;  %2310 = vmatprep.mubr.bf16.mxu1 %v7259_v55  ;;  %2351 = vmatprep.mubr.bf16.mxu0 %v7259_v55  ;;  %v2206_v20 = vsel %vm2147_vm4, %v2193_v23, %v2195_v47 }
 0x180   : > { %v6663_v35 = vsel %vm391_vm0, %v2979_v5, %v2981_v6  ;;  %v6666_v4 = vsel %vm391_vm0, 0, %v2979_v5  ;;  %v2226_v21 = vsel %vm564_vm6, %v2206_v20, 0 }
 0x181   : > { %3226 = vrot.lane.b32.xlu0 %v6666_v4, %s5808_s20  ;;  %3228 = vrot.lane.b32.xlu1 %v6663_v35, %s5808_s20  ;;  %v3451_v5 = vmul.bf16 %v6666_v4, %v6049_v33 }
 0x182   : > { %v2199_v31 = vpop.permute.xlu1 %2198 }
 0x183   : > { %v2983_v41 = vpop.permute.xlu0 %2982 }
 0x184   : > { %v6673_v11 = vsel %vm391_vm0, %v2981_v6, %v2983_v41  ;;  %v6676_v27 = vsel %vm391_vm0, %v2983_v41, %v2985_v29 }
 0x185   : > { %3230 = vrot.lane.b32.xlu0 %v6673_v11, %s5808_s20  ;;  %3232 = vrot.lane.b32.xlu1 %v6676_v27, %s5808_s20  ;;  %v3453_v33 = vmul.bf16 %v6673_v11, %v6071_v46 }
 0x186   : > { %v2989_v37 = vpop.permute.xlu1 %2988  ;;  %5380 = vmatmul.mubr.msk.bf16.vlgmr.msra.gmra.mrb[0].mxu1 %vm560_vm1, %v5376_v59 }
 0x187   : > { %v2987_v40 = vpop.permute.xlu0 %2986  ;;  %2392 = vmatprep.mubr.bf16.mxu1 %v7259_v55 }
 0x188   : > { %v6685_v49 = vsel %vm391_vm0, %v2985_v29, %v2987_v40  ;;  %v6688_v32 = vsel %vm391_vm0, %v2987_v40, %v2989_v37 }
 0x189   : > { %3234 = vrot.lane.b32.xlu0 %v6685_v49, %s5808_s20  ;;  %3236 = vrot.lane.b32.xlu1 %v6688_v32, %s5808_s20  ;;  %v3455_v46 = vmul.bf16 %v6685_v49, %v6119_v16 }
 0x18a   : > { %v2993_v56 = vpop.permute.xlu1 %2992 }
 0x18b   : > { %v2197_v57 = vpop.permute.xlu0 %2196 }
 0x18c   : > { %v2207_v6 = vsel %vm2147_vm4, %v2195_v47, %v2197_v57  ;;  %v2208_v8 = vsel %vm2147_vm4, %v2197_v57, %v2199_v31 }
 0x18d   : > { %5381 = vmatprep.subr.msk.bf16.mxu0 %vm564_vm6, %v2207_v6  ;;  %v2232_v44 = vsel %vm564_vm6, %v2208_v8, 0 }
 0x18e   : > { %2320 = vmatpush1.bf16.msra.mxu0 %v2226_v21  ;;  %v2414_v39 = vpop.permute.xlu1 %2413 }
 0x18f   : > { %v2201_v36 = vpop.permute.xlu0 %2200 }
 0x190   : > { %v2209_v29 = vsel %vm2147_vm4, %v2199_v31, %v2201_v36  ;;  %v6719_v31 = vsel %vm391_vm0, %v2993_v56, 0 }
 0x191   : > { %5383 = vmatprep.subr.msk.bf16.mxu1 %vm564_vm6, %v2209_v29  ;;  %5382 = vmatmul.mubr.msk.bf16.vlgmr.msra.gmra.mrb[4].mxu0 %vm560_vm1, %v5376_v59 }
 0x192   : > { %2361 = vmatpush1.bf16.msra.mxu1 %v2232_v44  ;;  %2497 = vmatprep.mubr.bf16.mxu0 %v7259_v55  ;;  %v2418_v41 = vpop.permute.xlu1 %2417  ;;  %v3456_v44 = vmul.bf16 %v6688_v32, %v6078_v51 }
 0x193   : > { %v2991_v23 = vpop.permute.xlu0 %2990 }
 0x194   : > { %v6705_v14 = vsel %vm391_vm0, %v2989_v37, %v2991_v23  ;;  %v6708_v0 = vsel %vm391_vm0, %v2991_v23, %v2993_v56  ;;  %v5385_v56 = vld [vmem:[%s7217_s2 + $0x7] sm:$0x1] }
 0x195   : > { %3238 = vrot.lane.b32.xlu0 %v6705_v14, %s5808_s20  ;;  %3240 = vrot.lane.b32.xlu1 %v6708_v0, %s5808_s20  ;;  %v3457_v23 = vmul.bf16 %v6705_v14, %v6110_v9  ;;  %v3459_v9 = vmul.bf16 %v6719_v31, %v6081_v53  ;;  %v3697_v53 = vmul.bf16 %v6663_v35, %v6092_v60 }
 0x196   : > { %5384 = vmatmul.mubr.msk.bf16.vlgmr.msra.gmra.mrb[4].mxu1 %vm560_vm1, %v5376_v59  ;;  %v3452_v59 = vmul.bf16 %v6663_v35, %v6102_v1  ;;  %v3454_v1 = vmul.bf16 %v6676_v27, %v6168_v58  ;;  %v2422_v8 = vpop.permute.xlu1 %2421  ;;  %v3700_v60 = vmul.bf16 %v6685_v49, %v6175_v62 }
 0x197   : > { %v2412_v47 = vpop.permute.xlu0 %2411  ;;  %2538 = vmatprep.mubr.bf16.mxu1 %v7259_v55 }
 0x198   : > { %v2430_v37 = vsel %vm2429_vm12, %v2412_v47, %v2414_v39 }
 0x199   : > { %3242 = vrot.lane.b32.xlu0 %v6719_v31, %s5808_s20  ;;  %3471 = vrot.lane.b32.xlu1 %v3451_v5, %s5810_s22  ;;  %v2442_v57 = vsel %vm564_vm6, %v2430_v37, 0  ;;  %v3458_v37 = vmul.bf16 %v6708_v0, %v6134_v28  ;;  %v3696_v28 = vmul.bf16 %v6666_v4, %v6083_v54  ;;  %v3701_v54 = vmul.bf16 %v6688_v32, %v6113_v12 }
 0x19a   : > { %v2426_v47 = vpop.permute.xlu1 %2425  ;;  %v3704_v12 = vmul.bf16 %v6719_v31, %v6148_v43 }
 0x19b   : > { %v2416_v40 = vpop.permute.xlu0 %2415 }
 0x19c   : > { %v2431_v20 = vsel %vm2429_vm12, %v2414_v39, %v2416_v40  ;;  %v2432_v6 = vsel %vm2429_vm12, %v2416_v40, %v2418_v41 }
 0x19d   : > { %3473 = vrot.lane.b32.xlu0 %v3452_v59, %s5810_s22  ;;  %3475 = vrot.lane.b32.xlu1 %v3453_v33, %s5810_s22  ;;  %v2448_v29 = vsel %vm564_vm6, %v2432_v6, 0  ;;  %v3699_v33 = vmul.bf16 %v6676_v27, %v6144_v38  ;;  %v3703_v38 = vmul.bf16 %v6708_v0, %v6158_v50 }
 0x19e   : > { %5386 = vmatprep.subr.msk.bf16.mxu0 %vm564_vm6, %v2431_v20  ;;  %v3698_v20 = vmul.bf16 %v6673_v11, %v6124_v22  ;;  %v3702_v22 = vmul.bf16 %v6705_v14, %v6137_v30 }
 0x19f   : > { %2466 = vmatpush1.bf16.msra.mxu0 %v2442_v57  ;;  %v2420_v21 = vpop.permute.xlu0 %2419 }
 0x1a0   : > { %v2433_v36 = vsel %vm2429_vm12, %v2418_v41, %v2420_v21  ;;  %v2434_v58 = vsel %vm2429_vm12, %v2420_v21, %v2422_v8 }
 0x1a1   : > { %3477 = vrot.lane.b32.xlu0 %v3454_v1, %s5810_s22  ;;  %3479 = vrot.lane.b32.xlu1 %v3455_v46, %s5810_s22  ;;  %v2454_v5 = vsel %vm564_vm6, %v2434_v58, 0  ;;  %v5394_v46 = vld [vmem:[%s7217_s2 + $0x8] sm:$0x1]  ;;  %v4168_v58 = vmul.bf16 %v6666_v4, %v6182_v42 }
 0x1a2   : > { %5388 = vmatprep.subr.msk.bf16.mxu1 %vm564_vm6, %v2433_v36  ;;  %5387 = vmatmul.mubr.msk.bf16.vlgmr.msra.gmra.mrb[0].mxu0 %vm560_vm1, %v5385_v56 }
 0x1a3   : > { %2507 = vmatpush1.bf16.msra.mxu1 %v2448_v29  ;;  %v2424_v16 = vpop.permute.xlu0 %2423  ;;  %2579 = vmatprep.mubr.bf16.mxu0 %v7259_v55  ;;  %v4169_v29 = vmul.bf16 %v6663_v35, %v6207_v34 }
 0x1a4   : > { %v2435_v39 = vsel %vm2429_vm12, %v2422_v8, %v2424_v16  ;;  %v2436_v51 = vsel %vm2429_vm12, %v2424_v16, %v2426_v47 }
 0x1a5   : > { %3481 = vrot.lane.b32.xlu0 %v3456_v44, %s5810_s22  ;;  %3483 = vrot.lane.b32.xlu1 %v3457_v23, %s5810_s22  ;;  %v2460_v59 = vsel %vm564_vm6, %v2436_v51, 0  ;;  %v4171_v44 = vmul.bf16 %v6676_v27, %v6216_v52  ;;  %v7262_v23 = vld [vmem:[#allocation8_spill] sm:$0xff]  ;;  %v3014_v51 = vmul.bf16 %v6666_v4, %v5955_v63  ;;  %v7263_v52 = vld [vmem:[#allocation6_spill] sm:$0xff] }
 0x1a6   : > { %5390 = vmatprep.subr.msk.bf16.mxu0 %vm564_vm6, %v2435_v39  ;;  %5389 = vmatmul.mubr.msk.bf16.vlgmr.msra.gmra.mrb[0].mxu1 %vm560_vm1, %v5385_v56  ;;  %v4170_v39 = vmul.bf16 %v6673_v11, %v7262_v23  ;;  %v7274_v23 = vld [vmem:[#allocation18_spill] sm:$0xff] }
 0x1a7   : > { %2548 = vmatpush1.bf16.msra.mxu0 %v2454_v5  ;;  %v2428_v41 = vpop.permute.xlu0 %2427  ;;  %2620 = vmatprep.mubr.bf16.mxu1 %v7259_v55 }
 0x1a8   : > { %v2437_v40 = vsel %vm2429_vm12, %v2426_v47, %v2428_v41 }
 0x1a9   : > { %3487 = vrot.lane.b32.xlu1 %v3459_v9, %s5810_s22  ;;  %3485 = vrot.lane.b32.xlu0 %v3458_v37, %s5810_s22  ;;  %v4173_v9 = vmul.bf16 %v6688_v32, %v7263_v52  ;;  %v7264_v37 = vld [vmem:[#allocation9_spill] sm:$0xff] }
 0x1aa   : > { %5392 = vmatprep.subr.msk.bf16.mxu1 %vm564_vm6, %v2437_v40  ;;  %5391 = vmatmul.mubr.msk.bf16.vlgmr.msra.gmra.mrb[4].mxu0 %vm560_vm1, %v5385_v56  ;;  %v4172_v40 = vmul.bf16 %v6685_v49, %v7264_v37 }
 0x1ab   : > { %2589 = vmatpush1.bf16.msra.mxu1 %v2460_v59  ;;  %2776 = vmatprep.mubr.bf16.mxu0 %v7259_v55 }
 0x1ad   : > { %3718 = vrot.lane.b32.xlu1 %v3697_v53, %s5811_s23  ;;  %3716 = vrot.lane.b32.xlu0 %v3696_v28, %s5811_s23  ;;  %v3015_v53 = vmul.bf16 %v6663_v35, %v5961_v2 }
 0x1ae   : > { %5393 = vmatmul.mubr.msk.bf16.vlgmr.msra.gmra.mrb[4].mxu1 %vm560_vm1, %v5385_v56 }
 0x1af   : > { %2817 = vmatprep.mubr.bf16.mxu1 %v7259_v55 }
 0x1b1   : > { %3722 = vrot.lane.b32.xlu1 %v3699_v33, %s5811_s23  ;;  %3720 = vrot.lane.b32.xlu0 %v3698_v20, %s5811_s23  ;;  %v3027_v33 = vsel %vm564_vm6, %v3014_v51, 0  ;;  %v7277_v51 = vld [vmem:[#allocation17_spill] sm:$0xff] }
 0x1b5   : > { %3726 = vrot.lane.b32.xlu1 %v3701_v54, %s5811_s23  ;;  %3724 = vrot.lane.b32.xlu0 %v3700_v60, %s5811_s23  ;;  %v7265_v54 = vld [vmem:[#allocation7_spill] sm:$0xff] }
 0x1b6   : > { %v4175_v2 = vmul.bf16 %v6708_v0, %v7265_v54  ;;  %v7266_v60 = vld [vmem:[#allocation11_spill] sm:$0xff] }
 0x1b9   : > { %3730 = vrot.lane.b32.xlu1 %v3703_v38, %s5811_s23  ;;  %3728 = vrot.lane.b32.xlu0 %v3702_v22, %s5811_s23  ;;  %v4174_v38 = vmul.bf16 %v6705_v14, %v7266_v60  ;;  %v3016_v22 = vmul.bf16 %v6673_v11, %v5966_v7 }
 0x1bb   : > { %v3033_v7 = vsel %vm564_vm6, %v3016_v22, 0 }
 0x1bd   : > { %3943 = vrot.lane.b32.xlu1 %v6666_v4, %s5809_s21  ;;  %3732 = vrot.lane.b32.xlu0 %v3704_v12, %s5811_s23  ;;  %v3017_v12 = vmul.bf16 %v6676_v27, %v5970_v10 }
 0x1c0   : > { %v2691_v62 = vpop.permute.xlu1 %2690 }
 0x1c1   : > { %v2693_v57 = vpop.permute.xlu0 %2692  ;;  %3947 = vrot.lane.b32.xlu1 %v6673_v11, %s5809_s21  ;;  %3945 = vrot.lane.b32.xlu0 %v6663_v35, %s5809_s21 }
 0x1c2   : > { %v2709_v30 = vsel %vm2708_vm13, %v2691_v62, %v2693_v57  ;;  %v3019_v62 = vmul.bf16 %v6688_v32, %v5978_v15  ;;  %v3018_v15 = vmul.bf16 %v6685_v49, %v5974_v13 }
 0x1c3   : > { %v2721_v21 = vsel %vm564_vm6, %v2709_v30, 0 }
 0x1c4   : > { %v3039_v13 = vsel %vm564_vm6, %v3018_v15, 0 }
 0x1c5   : > { %v2697_v50 = vpop.permute.xlu0 %2696  ;;  %3951 = vrot.lane.b32.xlu1 %v6685_v49, %s5809_s21  ;;  %3949 = vrot.lane.b32.xlu0 %v6676_v27, %s5809_s21  ;;  %v2695_v43 = vpop.permute.xlu1 %2694 }
 0x1c6   : > { %v2710_v6 = vsel %vm2708_vm13, %v2693_v57, %v2695_v43  ;;  %v2711_v1 = vsel %vm2708_vm13, %v2695_v43, %v2697_v50  ;;  %v7267_v57 = vld [vmem:[#allocation5_spill] sm:$0xff]  ;;  %v3021_v43 = vmul.bf16 %v6708_v0, %v5986_v18  ;;  %v7270_v18 = vld [vmem:[#allocation14_spill] sm:$0xff] }
 0x1c7   : > { %5395 = vmatprep.subr.msk.bf16.mxu0 %vm564_vm6, %v2710_v6  ;;  %v2727_v36 = vsel %vm564_vm6, %v2711_v1, 0  ;;  %v4413_v30 = vmul.bf16 %v6666_v4, %v7267_v57  ;;  %v3022_v6 = vld [vmem:[%s7218_s3] sm:$0x1]  ;;  %v4886_v57 = vmul.bf16 %v6663_v35, %v6525_v61  ;;  %v4888_v61 = vmul.bf16 %v6676_v27, %v6547_v19 }
 0x1c8   : > { %2745 = vmatpush1.bf16.msra.mxu0 %v2721_v21  ;;  %v7269_v21 = vld [vmem:[#allocation10_spill] sm:$0xff]  ;;  %v4890_v19 = vmul.bf16 %v6688_v32, %v6565_v25  ;;  %v4893_v25 = vmul.bf16 %v6719_v31, %v6578_v17 }
 0x1c9   : > { %3955 = vrot.lane.b32.xlu1 %v6705_v14, %s5809_s21  ;;  %3953 = vrot.lane.b32.xlu0 %v6688_v32, %s5809_s21  ;;  %v2699_v56 = vpop.permute.xlu1 %2698  ;;  %v4415_v1 = vmul.bf16 %v6673_v11, %v7269_v21  ;;  %v5130_v17 = vld [vmem:[%s7221_s6] sm:$0x3] }
 0x1ca   : > { %v2712_v8 = vsel %vm2708_vm13, %v2697_v50, %v2699_v56  ;;  %v2701_v16 = vpop.permute.xlu0 %2700  ;;  %v7268_v50 = vld [vmem:[#allocation4_spill] sm:$0xff] }
 0x1cb   : > { %5397 = vmatprep.subr.msk.bf16.mxu1 %vm564_vm6, %v2712_v8  ;;  %5396 = vmatmul.mubr.msk.bf16.vlgmr.msra.gmra.mrb[0].mxu0 %vm560_vm1, %v5394_v46  ;;  %v2713_v34 = vsel %vm2708_vm13, %v2699_v56, %v2701_v16  ;;  %v4176_v10 = vmul.bf16 %v6719_v31, %v7268_v50  ;;  %v7271_v56 = vld [vmem:[#allocation3_spill] sm:$0xff] }
 0x1cc   : > { %2786 = vmatpush1.bf16.msra.mxu1 %v2727_v36  ;;  %2858 = vmatprep.mubr.bf16.mxu0 %v7259_v55  ;;  %v2733_v41 = vsel %vm564_vm6, %v2713_v34, 0  ;;  %v3020_v8 = vmul.bf16 %v6705_v14, %v7271_v56  ;;  %v7275_v34 = vld [vmem:[#allocation16_spill] sm:$0xff]  ;;  %v5144_v56 = vld [vmem:[%s7222_s7] sm:$0x3] }
 0x1cd   : > { %3959 = vrot.lane.b32.xlu1 %v6719_v31, %s5809_s21  ;;  %3957 = vrot.lane.b32.xlu0 %v6708_v0, %s5809_s21 }
 0x1ce   : > { %v3045_v36 = vsel %vm564_vm6, %v3020_v8, 0 }
 0x1cf   : > { %5398 = vmatmul.mubr.msk.bf16.vlgmr.msra.gmra.mrb[0].mxu1 %vm560_vm1, %v5394_v46 }
 0x1d0   : > { %2899 = vmatprep.mubr.bf16.mxu1 %v7259_v55 }
 0x1d1   : > { %4190 = vrot.lane.b32.xlu1 %v4169_v29, %s5813_s25  ;;  %4188 = vrot.lane.b32.xlu0 %v4168_v58, %s5813_s25  ;;  %v7272_v29 = vld [vmem:[#allocation13_spill] sm:$0xff] }
 0x1d2   : > { %v4417_v58 = vmul.bf16 %v6685_v49, %v7272_v29 }
 0x1d5   : > { %v2705_v47 = vpop.permute.xlu0 %2704  ;;  %4194 = vrot.lane.b32.xlu1 %v4171_v44, %s5813_s25  ;;  %4192 = vrot.lane.b32.xlu0 %v4170_v39, %s5813_s25  ;;  %v2703_v42 = vpop.permute.xlu1 %2702  ;;  %v4419_v39 = vmul.bf16 %v6705_v14, %v7274_v23 }
 0x1d6   : > { %v2714_v5 = vsel %vm2708_vm13, %v2701_v16, %v2703_v42  ;;  %v2715_v59 = vsel %vm2708_vm13, %v2703_v42, %v2705_v47  ;;  %v7273_v16 = vld [vmem:[#allocation15_spill] sm:$0xff]  ;;  %v7276_v42 = vld [vmem:[#allocation12_spill] sm:$0xff] }
 0x1d7   : > { %5399 = vmatprep.subr.msk.bf16.mxu0 %vm564_vm6, %v2714_v5  ;;  %v2739_v20 = vsel %vm564_vm6, %v2715_v59, 0  ;;  %v4416_v44 = vmul.bf16 %v6676_v27, %v7273_v16  ;;  %v4421_v5 = vmul.bf16 %v6719_v31, %v7276_v42 }
 0x1d8   : > { %2827 = vmatpush1.bf16.msra.mxu0 %v2733_v41  ;;  %v4420_v41 = vmul.bf16 %v6708_v0, %v7277_v51 }
 0x1d9   : > { %4198 = vrot.lane.b32.xlu1 %v4173_v9, %s5813_s25  ;;  %4196 = vrot.lane.b32.xlu0 %v4172_v40, %s5813_s25  ;;  %v2707_v63 = vpop.permute.xlu1 %2706 }
 0x1da   : > { %5403 = vmatprep.subr.msk.bf16.mxu0 %vm564_vm6, %v3015_v53  ;;  %v2716_v28 = vsel %vm2708_vm13, %v2705_v47, %v2707_v63  ;;  %v4418_v47 = vmul.bf16 %v6688_v32, %v7275_v34 }
 0x1db   : > { %5400 = vmatmul.mubr.msk.bf16.vlgmr.msra.gmra.mrb[4].mxu0 %vm560_vm1, %v5394_v46  ;;  %5401 = vmatprep.subr.msk.bf16.mxu1 %vm564_vm6, %v2716_v28 }
 0x1dc   : > { %2868 = vmatpush1.bf16.msra.mxu1 %v2739_v20  ;;  %3051 = vmatpush1.bf16.msra.mxu0 %v3027_v33  ;;  %v5411_v20 = vld [vmem:[%s7218_s3 + $0x1] sm:$0x1] }
 0x1dd   : > { %4202 = vrot.lane.b32.xlu1 %v4175_v2, %s5813_s25  ;;  %4200 = vrot.lane.b32.xlu0 %v4174_v38, %s5813_s25  ;;  %v4885_v38 = vmul.bf16 %v6666_v4, %v6521_v48 }
 0x1de   : > { %5405 = vmatprep.subr.msk.bf16.mxu1 %vm564_vm6, %v3017_v12  ;;  %5407 = vmatprep.subr.msk.bf16.mxu0 %vm564_vm6, %v3019_v62 }
 0x1df   : > { %5402 = vmatmul.mubr.msk.bf16.vlgmr.msra.gmra.mrb[4].mxu1 %vm560_vm1, %v5394_v46  ;;  %3082 = vmatprep.mubr.bf16.mxu0 %v7259_v55  ;;  %v4414_v46 = vmul.bf16 %v6663_v35, %v7270_v18 }
 0x1e0   : > { %3092 = vmatpush1.bf16.msra.mxu1 %v3033_v7  ;;  %3123 = vmatprep.mubr.bf16.mxu1 %v7259_v55  ;;  %v4887_v7 = vmul.bf16 %v6673_v11, %v6544_v24  ;;  %v4889_v24 = vmul.bf16 %v6685_v49, %v6562_v26  ;;  %v4891_v26 = vmul.bf16 %v6705_v14, %v6599_v45 }
 0x1e1   : > { %4433 = vrot.lane.b32.xlu1 %v4413_v30, %s5806_s19  ;;  %4204 = vrot.lane.b32.xlu0 %v4176_v10, %s5813_s25 }
 0x1e2   : > { %5409 = vmatprep.subr.msk.bf16.mxu1 %vm564_vm6, %v3021_v43 }
 0x1e3   : > { %5404 = vmatmul.mubr.msk.bf16.vlgmr.msra.gmra.mrb[0].mxu0 %vm560_vm1, %v3022_v6 }
 0x1e4   : > { %3133 = vmatpush1.bf16.msra.mxu0 %v3039_v13  ;;  %3164 = vmatprep.mubr.bf16.mxu0 %v7259_v55  ;;  %v5420_v13 = vld [vmem:[%s7218_s3 + $0x2] sm:$0x1] }
 0x1e5   : > { %4437 = vrot.lane.b32.xlu1 %v4415_v1, %s5806_s19  ;;  %4435 = vrot.lane.b32.xlu0 %v4414_v46, %s5806_s19 }
 0x1e7   : > { %5406 = vmatmul.mubr.msk.bf16.vlgmr.msra.gmra.mrb[0].mxu1 %vm560_vm1, %v3022_v6 }
 0x1e8   : > { %3174 = vmatpush1.bf16.msra.mxu1 %v3045_v36  ;;  %3205 = vmatprep.mubr.bf16.mxu1 %v7259_v55 }
 0x1e9   : > { %4441 = vrot.lane.b32.xlu1 %v4417_v58, %s5806_s19  ;;  %4439 = vrot.lane.b32.xlu0 %v4416_v44, %s5806_s19 }
 0x1eb   : > { %5408 = vmatmul.mubr.msk.bf16.vlgmr.msra.gmra.mrb[4].mxu0 %vm560_vm1, %v3022_v6 }
 0x1ec   : > { %3311 = vmatprep.mubr.bf16.mxu0 %v7259_v55 }
 0x1ed   : > { %4445 = vrot.lane.b32.xlu1 %v4419_v39, %s5806_s19  ;;  %4443 = vrot.lane.b32.xlu0 %v4418_v47, %s5806_s19 }
 0x1ef   : > { %5410 = vmatmul.mubr.msk.bf16.vlgmr.msra.gmra.mrb[4].mxu1 %vm560_vm1, %v3022_v6 }
 0x1f0   : > { %3352 = vmatprep.mubr.bf16.mxu1 %v7259_v55 }
 0x1f1   : > { %4449 = vrot.lane.b32.xlu1 %v4421_v5, %s5806_s19  ;;  %4447 = vrot.lane.b32.xlu0 %v4420_v41, %s5806_s19 }
 0x1f3   : > { %v3227_v52 = vpop.permute.xlu0 %3226  ;;  %v3229_v9 = vpop.permute.xlu1 %3228 }
 0x1f4   : > { %v3244_v37 = vsel %vm551_vm5, %v3227_v52, %v3229_v9  ;;  %v5429_v52 = vld [vmem:[%s7218_s3 + $0x3] sm:$0x1] }
 0x1f5   : > { %4662 = vrot.lane.b32.xlu1 %v6663_v35, %s5815_s16  ;;  %4660 = vrot.lane.b32.xlu0 %v6666_v4, %s5815_s16  ;;  %v3256_v63 = vsel %vm564_vm6, %v3244_v37, 0 }
 0x1f7   : > { %v3231_v40 = vpop.permute.xlu0 %3230  ;;  %v3233_v53 = vpop.permute.xlu1 %3232 }
 0x1f8   : > { %v3245_v59 = vsel %vm551_vm5, %v3229_v9, %v3231_v40  ;;  %v3246_v28 = vsel %vm551_vm5, %v3231_v40, %v3233_v53 }
 0x1f9   : > { %4666 = vrot.lane.b32.xlu1 %v6676_v27, %s5815_s16  ;;  %4664 = vrot.lane.b32.xlu0 %v6673_v11, %s5815_s16  ;;  %v3262_v2 = vsel %vm564_vm6, %v3246_v28, 0 }
 0x1fa   : > { %5412 = vmatprep.subr.msk.bf16.mxu0 %vm564_vm6, %v3245_v59 }
 0x1fb   : > { %3280 = vmatpush1.bf16.msra.mxu0 %v3256_v63  ;;  %v3235_v33 = vpop.permute.xlu0 %3234  ;;  %v3237_v60 = vpop.permute.xlu1 %3236 }
 0x1fc   : > { %v3247_v54 = vsel %vm551_vm5, %v3233_v53, %v3235_v33  ;;  %v3248_v22 = vsel %vm551_vm5, %v3235_v33, %v3237_v60 }
 0x1fd   : > { %4670 = vrot.lane.b32.xlu1 %v6688_v32, %s5815_s16  ;;  %4668 = vrot.lane.b32.xlu0 %v6685_v49, %s5815_s16  ;;  %v3268_v48 = vsel %vm564_vm6, %v3248_v22, 0  ;;  %v4892_v32 = vmul.bf16 %v6708_v0, %v6603_v3 }
 0x1fe   : > { %5414 = vmatprep.subr.msk.bf16.mxu1 %vm564_vm6, %v3247_v54  ;;  %5413 = vmatmul.mubr.msk.bf16.vlgmr.msra.gmra.mrb[0].mxu0 %vm560_vm1, %v5411_v20 }
 0x1ff   : > { %3321 = vmatpush1.bf16.msra.mxu1 %v3262_v2  ;;  %3393 = vmatprep.mubr.bf16.mxu0 %v7259_v55 }
 0x201   : > { %4674 = vrot.lane.b32.xlu1 %v6708_v0, %s5815_s16  ;;  %4672 = vrot.lane.b32.xlu0 %v6705_v14, %s5815_s16 }
 0x202   : > { %5415 = vmatmul.mubr.msk.bf16.vlgmr.msra.gmra.mrb[0].mxu1 %vm560_vm1, %v5411_v20 }
 0x203   : > { %3434 = vmatprep.mubr.bf16.mxu1 %v7259_v55 }
 0x205   : > { %4905 = vrot.lane.b32.xlu1 %v4885_v38, %s5816_s26  ;;  %4676 = vrot.lane.b32.xlu0 %v6719_v31, %s5815_s16 }
 0x207   : > { %v3239_v12 = vpop.permute.xlu0 %3238  ;;  %v3241_v62 = vpop.permute.xlu1 %3240 }
 0x208   : > { %v3249_v30 = vsel %vm551_vm5, %v3237_v60, %v3239_v12  ;;  %v3250_v4 = vsel %vm551_vm5, %v3239_v12, %v3241_v62 }
 0x209   : > { %4909 = vrot.lane.b32.xlu1 %v4887_v7, %s5816_s26  ;;  %4907 = vrot.lane.b32.xlu0 %v4886_v57, %s5816_s26  ;;  %v3274_v11 = vsel %vm564_vm6, %v3250_v4, 0 }
 0x20a   : > { %5416 = vmatprep.subr.msk.bf16.mxu0 %vm564_vm6, %v3249_v30 }
 0x20b   : > { %3362 = vmatpush1.bf16.msra.mxu0 %v3268_v48  ;;  %v3243_v50 = vpop.permute.xlu0 %3242  ;;  %v3472_v10 = vpop.permute.xlu1 %3471  ;;  %v5438_v48 = vld [vmem:[%s7218_s3 + $0x4] sm:$0x1] }
 0x20c   : > { %v3251_v35 = vsel %vm551_vm5, %v3241_v62, %v3243_v50 }
 0x20d   : > { %4913 = vrot.lane.b32.xlu1 %v4889_v24, %s5816_s26  ;;  %4911 = vrot.lane.b32.xlu0 %v4888_v61, %s5816_s26 }
 0x20e   : > { %5418 = vmatprep.subr.msk.bf16.mxu1 %vm564_vm6, %v3251_v35  ;;  %5417 = vmatmul.mubr.msk.bf16.vlgmr.msra.gmra.mrb[4].mxu0 %vm560_vm1, %v5411_v20 }
 0x20f   : > { %3403 = vmatpush1.bf16.msra.mxu1 %v3274_v11  ;;  %v3474_v15 = vpop.permute.xlu0 %3473  ;;  %v3476_v43 = vpop.permute.xlu1 %3475  ;;  %3556 = vmatprep.mubr.bf16.mxu0 %v7259_v55 }
 0x210   : > { %v3489_v27 = vsel %vm1129_vm7, %v3472_v10, %v3474_v15  ;;  %v3490_v49 = vsel %vm1129_vm7, %v3474_v15, %v3476_v43 }
 0x211   : > { %v3501_v6 = vsel %vm564_vm6, %v3489_v27, 0  ;;  %4917 = vrot.lane.b32.xlu1 %v4891_v26, %s5816_s26  ;;  %4915 = vrot.lane.b32.xlu0 %v4890_v19, %s5816_s26 }
 0x212   : > { %5421 = vmatprep.subr.msk.bf16.mxu0 %vm564_vm6, %v3490_v49  ;;  %5419 = vmatmul.mubr.msk.bf16.vlgmr.msra.gmra.mrb[4].mxu1 %vm560_vm1, %v5411_v20 }
 0x213   : > { %3525 = vmatpush1.bf16.msra.mxu0 %v3501_v6  ;;  %v3478_v45 = vpop.permute.xlu0 %3477  ;;  %v3480_v14 = vpop.permute.xlu1 %3479  ;;  %3597 = vmatprep.mubr.bf16.mxu1 %v7259_v55 }
 0x214   : > { %v3491_v21 = vsel %vm1129_vm7, %v3476_v43, %v3478_v45  ;;  %v3492_v1 = vsel %vm1129_vm7, %v3478_v45, %v3480_v14 }
 0x215   : > { %v3507_v18 = vsel %vm564_vm6, %v3491_v21, 0  ;;  %4921 = vrot.lane.b32.xlu1 %v4893_v25, %s5816_s26  ;;  %4919 = vrot.lane.b32.xlu0 %v4892_v32, %s5816_s26 }
 0x216   : > { %5423 = vmatprep.subr.msk.bf16.mxu1 %vm564_vm6, %v3492_v1  ;;  %5422 = vmatmul.mubr.msk.bf16.vlgmr.msra.gmra.mrb[0].mxu0 %vm560_vm1, %v5420_v13 }
 0x217   : > { %3566 = vmatpush1.bf16.msra.mxu1 %v3507_v18  ;;  %v3482_v3 = vpop.permute.xlu0 %3481  ;;  %v3484_v0 = vpop.permute.xlu1 %3483  ;;  %3638 = vmatprep.mubr.bf16.mxu0 %v7259_v55 }
 0x218   : > { %v3493_v31 = vsel %vm1129_vm7, %v3480_v14, %v3482_v3  ;;  %v3494_v46 = vsel %vm1129_vm7, %v3482_v3, %v3484_v0  ;;  %v5447_v3 = vld [vmem:[%s7218_s3 + $0x5] sm:$0x1] }
 0x219   : > { %v3513_v8 = vsel %vm564_vm6, %v3493_v31, 0  ;;  %5425 = vmatprep.subr.msk.bf16.mxu0 %vm564_vm6, %v3494_v46  ;;  %5133 = vperm.xlu0 %5786, %v5130_v17  }
 0x21a   : > { %3607 = vmatpush1.bf16.msra.mxu0 %v3513_v8  ;;  %5424 = vmatmul.mubr.msk.bf16.vlgmr.msra.gmra.mrb[0].mxu1 %vm560_vm1, %v5420_v13 }
 0x21b   : > { %v3486_v36 = vpop.permute.xlu0 %3485  ;;  %v3488_v29 = vpop.permute.xlu1 %3487  ;;  %3679 = vmatprep.mubr.bf16.mxu1 %v7259_v55  ;;  %5147 = vperm.xlu1 %5787, %v5144_v56  }
 0x21c   : > { %v3495_v58 = vsel %vm1129_vm7, %v3484_v0, %v3486_v36  ;;  %v3496_v16 = vsel %vm1129_vm7, %v3486_v36, %v3488_v29 }
 0x21d   : > { %v3519_v44 = vsel %vm564_vm6, %v3495_v58, 0  ;;  %5427 = vmatprep.subr.msk.bf16.mxu1 %vm564_vm6, %v3496_v16 }
 0x21e   : > { %3648 = vmatpush1.bf16.msra.mxu1 %v3519_v44  ;;  %5426 = vmatmul.mubr.msk.bf16.vlgmr.msra.gmra.mrb[4].mxu0 %vm560_vm1, %v5420_v13 }
 0x21f   : > { %v3717_v23 = vpop.permute.xlu0 %3716  ;;  %v3719_v39 = vpop.permute.xlu1 %3718  ;;  %3801 = vmatprep.mubr.bf16.mxu0 %v7259_v55 }
 0x220   : > { %v3734_v34 = vsel %vm1416_vm8, %v3717_v23, %v3719_v39 }
 0x221   : > { %v3746_v51 = vsel %vm564_vm6, %v3734_v34, 0 }
 0x222   : > { %5428 = vmatmul.mubr.msk.bf16.vlgmr.msra.gmra.mrb[4].mxu1 %vm560_vm1, %v5420_v13 }
 0x223   : > { %v3721_v47 = vpop.permute.xlu0 %3720  ;;  %v3723_v42 = vpop.permute.xlu1 %3722  ;;  %3842 = vmatprep.mubr.bf16.mxu1 %v7259_v55 }
 0x224   : > { %v3735_v5 = vsel %vm1416_vm8, %v3719_v39, %v3721_v47  ;;  %v3736_v41 = vsel %vm1416_vm8, %v3721_v47, %v3723_v42 }
 0x225   : > { %5430 = vmatprep.subr.msk.bf16.mxu0 %vm564_vm6, %v3735_v5  ;;  %v3752_v59 = vsel %vm564_vm6, %v3736_v41, 0 }
 0x226   : > { %3770 = vmatpush1.bf16.msra.mxu0 %v3746_v51 }
 0x227   : > { %v3725_v9 = vpop.permute.xlu0 %3724  ;;  %v3727_v37 = vpop.permute.xlu1 %3726 }
 0x228   : > { %v3737_v40 = vsel %vm1416_vm8, %v3723_v42, %v3725_v9  ;;  %v3738_v53 = vsel %vm1416_vm8, %v3725_v9, %v3727_v37  ;;  %v5456_v9 = vld [vmem:[%s7218_s3 + $0x6] sm:$0x1] }
 0x229   : > { %5432 = vmatprep.subr.msk.bf16.mxu1 %vm564_vm6, %v3737_v40  ;;  %5431 = vmatmul.mubr.msk.bf16.vlgmr.msra.gmra.mrb[0].mxu0 %vm560_vm1, %v5429_v52  ;;  %v3758_v20 = vsel %vm564_vm6, %v3738_v53, 0 }
 0x22a   : > { %3811 = vmatpush1.bf16.msra.mxu1 %v3752_v59  ;;  %3883 = vmatprep.mubr.bf16.mxu0 %v7259_v55 }
 0x22b   : > { %v3729_v63 = vpop.permute.xlu0 %3728  ;;  %v3731_v28 = vpop.permute.xlu1 %3730 }
 0x22c   : > { %v3739_v33 = vsel %vm1416_vm8, %v3727_v37, %v3729_v63  ;;  %v3740_v54 = vsel %vm1416_vm8, %v3729_v63, %v3731_v28 }
 0x22d   : > { %5434 = vmatprep.subr.msk.bf16.mxu0 %vm564_vm6, %v3739_v33  ;;  %5433 = vmatmul.mubr.msk.bf16.vlgmr.msra.gmra.mrb[0].mxu1 %vm560_vm1, %v5429_v52  ;;  %v3764_v22 = vsel %vm564_vm6, %v3740_v54, 0 }
 0x22e   : > { %3852 = vmatpush1.bf16.msra.mxu0 %v3758_v20  ;;  %3924 = vmatprep.mubr.bf16.mxu1 %v7259_v55 }
 0x22f   : > { %v3733_v2 = vpop.permute.xlu0 %3732  ;;  %v3944_v60 = vpop.permute.xlu1 %3943 }
 0x230   : > { %v3741_v38 = vsel %vm1416_vm8, %v3731_v28, %v3733_v2 }
 0x231   : > { %5436 = vmatprep.subr.msk.bf16.mxu1 %vm564_vm6, %v3741_v38  ;;  %5435 = vmatmul.mubr.msk.bf16.vlgmr.msra.gmra.mrb[4].mxu0 %vm560_vm1, %v5429_v52 }
 0x232   : > { %3893 = vmatpush1.bf16.msra.mxu1 %v3764_v22  ;;  %4028 = vmatprep.mubr.bf16.mxu0 %v7259_v55 }
 0x233   : > { %v3946_v12 = vpop.permute.xlu0 %3945  ;;  %v3948_v62 = vpop.permute.xlu1 %3947 }
 0x234   : > { %v3961_v7 = vsel %vm1644_vm9, %v3944_v60, %v3946_v12  ;;  %v3962_v57 = vsel %vm1644_vm9, %v3946_v12, %v3948_v62 }
 0x235   : > { %v3973_v30 = vsel %vm564_vm6, %v3961_v7, 0  ;;  %5439 = vmatprep.subr.msk.bf16.mxu0 %vm564_vm6, %v3962_v57  ;;  %5437 = vmatmul.mubr.msk.bf16.vlgmr.msra.gmra.mrb[4].mxu1 %vm560_vm1, %v5429_v52 }
 0x236   : > { %3997 = vmatpush1.bf16.msra.mxu0 %v3973_v30  ;;  %4069 = vmatprep.mubr.bf16.mxu1 %v7259_v55 }
 0x237   : > { %v3950_v4 = vpop.permute.xlu0 %3949  ;;  %v3952_v50 = vpop.permute.xlu1 %3951 }
 0x238   : > { %v3963_v10 = vsel %vm1644_vm9, %v3948_v62, %v3950_v4  ;;  %v3964_v24 = vsel %vm1644_vm9, %v3950_v4, %v3952_v50 }
 0x239   : > { %v3979_v61 = vsel %vm564_vm6, %v3963_v10, 0  ;;  %5441 = vmatprep.subr.msk.bf16.mxu1 %vm564_vm6, %v3964_v24  ;;  %5440 = vmatmul.mubr.msk.bf16.vlgmr.msra.gmra.mrb[0].mxu0 %vm560_vm1, %v5438_v48 }
 0x23a   : > { %4038 = vmatpush1.bf16.msra.mxu1 %v3979_v61  ;;  %4110 = vmatprep.mubr.bf16.mxu0 %v7259_v55  ;;  %v5465_v61 = vld [vmem:[%s7218_s3 + $0x7] sm:$0x1] }
 0x23b   : > { %v3954_v35 = vpop.permute.xlu0 %3953  ;;  %v3956_v11 = vpop.permute.xlu1 %3955 }
 0x23c   : > { %v3965_v15 = vsel %vm1644_vm9, %v3952_v50, %v3954_v35  ;;  %v3966_v43 = vsel %vm1644_vm9, %v3954_v35, %v3956_v11 }
 0x23d   : > { %v3985_v26 = vsel %vm564_vm6, %v3965_v15, 0  ;;  %5443 = vmatprep.subr.msk.bf16.mxu0 %vm564_vm6, %v3966_v43  ;;  %5442 = vmatmul.mubr.msk.bf16.vlgmr.msra.gmra.mrb[0].mxu1 %vm560_vm1, %v5438_v48 }
 0x23e   : > { %4079 = vmatpush1.bf16.msra.mxu0 %v3985_v26  ;;  %4151 = vmatprep.mubr.bf16.mxu1 %v7259_v55 }
 0x23f   : > { %v3958_v19 = vpop.permute.xlu0 %3957  ;;  %v3960_v27 = vpop.permute.xlu1 %3959 }
 0x240   : > { %v3967_v49 = vsel %vm1644_vm9, %v3956_v11, %v3958_v19  ;;  %v3968_v6 = vsel %vm1644_vm9, %v3958_v19, %v3960_v27 }
 0x241   : > { %v3991_v45 = vsel %vm564_vm6, %v3967_v49, 0  ;;  %5445 = vmatprep.subr.msk.bf16.mxu1 %vm564_vm6, %v3968_v6  ;;  %5444 = vmatmul.mubr.msk.bf16.vlgmr.msra.gmra.mrb[4].mxu0 %vm560_vm1, %v5438_v48 }
 0x242   : > { %4120 = vmatpush1.bf16.msra.mxu1 %v3991_v45  ;;  %4273 = vmatprep.mubr.bf16.mxu0 %v7259_v55 }
 0x243   : > { %v4189_v14 = vpop.permute.xlu0 %4188  ;;  %v4191_v25 = vpop.permute.xlu1 %4190 }
 0x244   : > { %v4206_v32 = vsel %vm1923_vm11, %v4189_v14, %v4191_v25 }
 0x245   : > { %5446 = vmatmul.mubr.msk.bf16.vlgmr.msra.gmra.mrb[4].mxu1 %vm560_vm1, %v5438_v48  ;;  %v4218_v18 = vsel %vm564_vm6, %v4206_v32, 0 }
 0x246   : > { %4314 = vmatprep.mubr.bf16.mxu1 %v7259_v55 }
 0x247   : > { %v4193_v13 = vpop.permute.xlu0 %4192  ;;  %v4195_v21 = vpop.permute.xlu1 %4194 }
 0x248   : > { %v4207_v1 = vsel %vm1923_vm11, %v4191_v25, %v4193_v13  ;;  %v4208_v17 = vsel %vm1923_vm11, %v4193_v13, %v4195_v21 }
 0x249   : > { %5448 = vmatprep.subr.msk.bf16.mxu0 %vm564_vm6, %v4207_v1  ;;  %v4224_v56 = vsel %vm564_vm6, %v4208_v17, 0 }
 0x24a   : > { %4242 = vmatpush1.bf16.msra.mxu0 %v4218_v18 }
 0x24b   : > { %v4197_v0 = vpop.permute.xlu0 %4196  ;;  %v4199_v31 = vpop.permute.xlu1 %4198 }
 0x24c   : > { %v4209_v46 = vsel %vm1923_vm11, %v4195_v21, %v4197_v0  ;;  %v4210_v8 = vsel %vm1923_vm11, %v4197_v0, %v4199_v31  ;;  %v5474_v0 = vld [vmem:[%s7218_s3 + $0x8] sm:$0x1] }
 0x24d   : > { %5450 = vmatprep.subr.msk.bf16.mxu1 %vm564_vm6, %v4209_v46  ;;  %5449 = vmatmul.mubr.msk.bf16.vlgmr.msra.gmra.mrb[0].mxu0 %vm560_vm1, %v5447_v3  ;;  %v4230_v16 = vsel %vm564_vm6, %v4210_v8, 0 }
 0x24e   : > { %4283 = vmatpush1.bf16.msra.mxu1 %v4224_v56  ;;  %4355 = vmatprep.mubr.bf16.mxu0 %v7259_v55 }
 0x24f   : > { %v4201_v36 = vpop.permute.xlu0 %4200  ;;  %v4203_v29 = vpop.permute.xlu1 %4202 }
 0x250   : > { %v4211_v58 = vsel %vm1923_vm11, %v4199_v31, %v4201_v36  ;;  %v4212_v44 = vsel %vm1923_vm11, %v4201_v36, %v4203_v29 }
 0x251   : > { %5452 = vmatprep.subr.msk.bf16.mxu0 %vm564_vm6, %v4211_v58  ;;  %5451 = vmatmul.mubr.msk.bf16.vlgmr.msra.gmra.mrb[0].mxu1 %vm560_vm1, %v5447_v3  ;;  %v4236_v47 = vsel %vm564_vm6, %v4212_v44, 0 }
 0x252   : > { %4324 = vmatpush1.bf16.msra.mxu0 %v4230_v16  ;;  %4396 = vmatprep.mubr.bf16.mxu1 %v7259_v55 }
 0x253   : > { %v4205_v23 = vpop.permute.xlu0 %4204  ;;  %v4434_v39 = vpop.permute.xlu1 %4433 }
 0x254   : > { %v4213_v34 = vsel %vm1923_vm11, %v4203_v29, %v4205_v23 }
 0x255   : > { %5454 = vmatprep.subr.msk.bf16.mxu1 %vm564_vm6, %v4213_v34  ;;  %5453 = vmatmul.mubr.msk.bf16.vlgmr.msra.gmra.mrb[4].mxu0 %vm560_vm1, %v5447_v3 }
 0x256   : > { %4365 = vmatpush1.bf16.msra.mxu1 %v4236_v47  ;;  %4518 = vmatprep.mubr.bf16.mxu0 %v7259_v55 }
 0x257   : > { %v4436_v42 = vpop.permute.xlu0 %4435  ;;  %v4438_v5 = vpop.permute.xlu1 %4437 }
 0x258   : > { %v4451_v51 = vsel %vm2147_vm4, %v4434_v39, %v4436_v42  ;;  %v4452_v41 = vsel %vm2147_vm4, %v4436_v42, %v4438_v5 }
 0x259   : > { %v4463_v52 = vsel %vm564_vm6, %v4451_v51, 0  ;;  %5457 = vmatprep.subr.msk.bf16.mxu0 %vm564_vm6, %v4452_v41  ;;  %5455 = vmatmul.mubr.msk.bf16.vlgmr.msra.gmra.mrb[4].mxu1 %vm560_vm1, %v5447_v3 }
 0x25a   : > { %4487 = vmatpush1.bf16.msra.mxu0 %v4463_v52  ;;  %4559 = vmatprep.mubr.bf16.mxu1 %v7259_v55 }
 0x25b   : > { %v4440_v37 = vpop.permute.xlu0 %4439  ;;  %v4442_v40 = vpop.permute.xlu1 %4441 }
 0x25c   : > { %v4453_v59 = vsel %vm2147_vm4, %v4438_v5, %v4440_v37  ;;  %v4454_v53 = vsel %vm2147_vm4, %v4440_v37, %v4442_v40 }
 0x25d   : > { %v4469_v63 = vsel %vm564_vm6, %v4453_v59, 0  ;;  %5459 = vmatprep.subr.msk.bf16.mxu1 %vm564_vm6, %v4454_v53  ;;  %5458 = vmatmul.mubr.msk.bf16.vlgmr.msra.gmra.mrb[0].mxu0 %vm560_vm1, %v5456_v9 }
 0x25e   : > { %4528 = vmatpush1.bf16.msra.mxu1 %v4469_v63  ;;  %4600 = vmatprep.mubr.bf16.mxu0 %v7259_v55 }
 0x25f   : > { %v4444_v28 = vpop.permute.xlu0 %4443  ;;  %v4446_v33 = vpop.permute.xlu1 %4445 }
 0x260   : > { %v4455_v20 = vsel %vm2147_vm4, %v4442_v40, %v4444_v28  ;;  %v4456_v54 = vsel %vm2147_vm4, %v4444_v28, %v4446_v33 }
 0x261   : > { %v4475_v2 = vsel %vm564_vm6, %v4455_v20, 0  ;;  %5461 = vmatprep.subr.msk.bf16.mxu0 %vm564_vm6, %v4456_v54  ;;  %5460 = vmatmul.mubr.msk.bf16.vlgmr.msra.gmra.mrb[0].mxu1 %vm560_vm1, %v5456_v9 }
 0x262   : > { %4569 = vmatpush1.bf16.msra.mxu0 %v4475_v2  ;;  %4641 = vmatprep.mubr.bf16.mxu1 %v7259_v55 }
 0x263   : > { %v4448_v60 = vpop.permute.xlu0 %4447  ;;  %v4450_v38 = vpop.permute.xlu1 %4449 }
 0x264   : > { %v4457_v22 = vsel %vm2147_vm4, %v4446_v33, %v4448_v60  ;;  %v4458_v12 = vsel %vm2147_vm4, %v4448_v60, %v4450_v38 }
 0x265   : > { %v4481_v62 = vsel %vm564_vm6, %v4457_v22, 0  ;;  %5463 = vmatprep.subr.msk.bf16.mxu1 %vm564_vm6, %v4458_v12  ;;  %5462 = vmatmul.mubr.msk.bf16.vlgmr.msra.gmra.mrb[4].mxu0 %vm560_vm1, %v5456_v9 }
 0x266   : > { %4610 = vmatpush1.bf16.msra.mxu1 %v4481_v62  ;;  %4745 = vmatprep.mubr.bf16.mxu0 %v7259_v55 }
 0x267   : > { %v4661_v7 = vpop.permute.xlu0 %4660  ;;  %v4663_v57 = vpop.permute.xlu1 %4662 }
 0x268   : > { %v4678_v30 = vsel %vm2429_vm12, %v4661_v7, %v4663_v57 }
 0x269   : > { %5464 = vmatmul.mubr.msk.bf16.vlgmr.msra.gmra.mrb[4].mxu1 %vm560_vm1, %v5456_v9  ;;  %v4690_v10 = vsel %vm564_vm6, %v4678_v30, 0 }
 0x26a   : > { %4786 = vmatprep.mubr.bf16.mxu1 %v7259_v55 }
 0x26b   : > { %v4665_v48 = vpop.permute.xlu0 %4664  ;;  %v4667_v4 = vpop.permute.xlu1 %4666 }
 0x26c   : > { %v4679_v50 = vsel %vm2429_vm12, %v4663_v57, %v4665_v48  ;;  %v4680_v24 = vsel %vm2429_vm12, %v4665_v48, %v4667_v4 }
 0x26d   : > { %5466 = vmatprep.subr.msk.bf16.mxu0 %vm564_vm6, %v4679_v50  ;;  %v4696_v43 = vsel %vm564_vm6, %v4680_v24, 0 }
 0x26e   : > { %4714 = vmatpush1.bf16.msra.mxu0 %v4690_v10 }
 0x26f   : > { %v4669_v35 = vpop.permute.xlu0 %4668  ;;  %v4671_v11 = vpop.permute.xlu1 %4670 }
 0x270   : > { %v4681_v15 = vsel %vm2429_vm12, %v4667_v4, %v4669_v35  ;;  %v4682_v26 = vsel %vm2429_vm12, %v4669_v35, %v4671_v11 }
 0x271   : > { %5467 = vmatmul.mubr.msk.bf16.vlgmr.msra.gmra.mrb[0].mxu0 %vm560_vm1, %v5465_v61  ;;  %5468 = vmatprep.subr.msk.bf16.mxu1 %vm564_vm6, %v4681_v15  ;;  %v4702_v6 = vsel %vm564_vm6, %v4682_v26, 0 }
 0x272   : > { %4755 = vmatpush1.bf16.msra.mxu1 %v4696_v43  ;;  %4827 = vmatprep.mubr.bf16.mxu0 %v7259_v55 }
 0x273   : > { %v4673_v19 = vpop.permute.xlu0 %4672  ;;  %v4675_v27 = vpop.permute.xlu1 %4674 }
 0x274   : > { %v4683_v49 = vsel %vm2429_vm12, %v4671_v11, %v4673_v19  ;;  %v4684_v45 = vsel %vm2429_vm12, %v4673_v19, %v4675_v27 }
 0x275   : > { %5469 = vmatmul.mubr.msk.bf16.vlgmr.msra.gmra.mrb[0].mxu1 %vm560_vm1, %v5465_v61  ;;  %5470 = vmatprep.subr.msk.bf16.mxu0 %vm564_vm6, %v4683_v49  ;;  %v4708_v13 = vsel %vm564_vm6, %v4684_v45, 0 }
 0x276   : > { %4796 = vmatpush1.bf16.msra.mxu0 %v4702_v6  ;;  %4868 = vmatprep.mubr.bf16.mxu1 %v7259_v55 }
 0x277   : > { %v4677_v14 = vpop.permute.xlu0 %4676  ;;  %v4906_v25 = vpop.permute.xlu1 %4905 }
 0x278   : > { %v4685_v32 = vsel %vm2429_vm12, %v4675_v27, %v4677_v14 }
 0x279   : > { %5471 = vmatmul.mubr.msk.bf16.vlgmr.msra.gmra.mrb[4].mxu0 %vm560_vm1, %v5465_v61  ;;  %5472 = vmatprep.subr.msk.bf16.mxu1 %vm564_vm6, %v4685_v32 }
 0x27a   : > { %4837 = vmatpush1.bf16.msra.mxu1 %v4708_v13  ;;  %4990 = vmatprep.mubr.bf16.mxu0 %v7259_v55 }
 0x27b   : > { %v4908_v21 = vpop.permute.xlu0 %4907  ;;  %v4910_v1 = vpop.permute.xlu1 %4909 }
 0x27c   : > { %v4923_v18 = vsel %vm2708_vm13, %v4906_v25, %v4908_v21  ;;  %v4924_v17 = vsel %vm2708_vm13, %v4908_v21, %v4910_v1  ;;  %v7278_v21 = vld [vmem:[#allocation2_spill] sm:$0xff] }
 0x27d   : > { %v4935_v3 = vsel %vm564_vm6, %v4923_v18, 0  ;;  %5473 = vmatmul.mubr.msk.bf16.vlgmr.msra.gmra.mrb[4].mxu1 %vm560_vm1, %v5465_v61  ;;  %5475 = vmatprep.subr.msk.bf16.mxu0 %vm564_vm6, %v4924_v17 }
 0x27e   : > { %4959 = vmatpush1.bf16.msra.mxu0 %v4935_v3  ;;  %5031 = vmatprep.mubr.bf16.mxu1 %v7259_v55 }
 0x27f   : > { %v4912_v31 = vpop.permute.xlu0 %4911  ;;  %v4914_v46 = vpop.permute.xlu1 %4913 }
 0x280   : > { %v4925_v56 = vsel %vm2708_vm13, %v4910_v1, %v4912_v31  ;;  %v4926_v8 = vsel %vm2708_vm13, %v4912_v31, %v4914_v46 }
 0x281   : > { %v4941_v36 = vsel %vm564_vm6, %v4925_v56, 0  ;;  %5476 = vmatmul.mubr.msk.bf16.vlgmr.msra.gmra.mrb[0].mxu0 %vm560_vm1, %v5474_v0  ;;  %5477 = vmatprep.subr.msk.bf16.mxu1 %vm564_vm6, %v4926_v8 }
 0x282   : > { %5000 = vmatpush1.bf16.msra.mxu1 %v4941_v36  ;;  %5072 = vmatprep.mubr.bf16.mxu0 %v7259_v55 }
 0x283   : > { %v4916_v29 = vpop.permute.xlu0 %4915  ;;  %v4918_v58 = vpop.permute.xlu1 %4917 }
 0x284   : > { %v4927_v16 = vsel %vm2708_vm13, %v4914_v46, %v4916_v29  ;;  %v4928_v44 = vsel %vm2708_vm13, %v4916_v29, %v4918_v58 }
 0x285   : > { %v4947_v23 = vsel %vm564_vm6, %v4927_v16, 0  ;;  %5478 = vmatmul.mubr.msk.bf16.vlgmr.msra.gmra.mrb[0].mxu1 %vm560_vm1, %v5474_v0  ;;  %5479 = vmatprep.subr.msk.bf16.mxu0 %vm564_vm6, %v4928_v44 }
 0x286   : > { %5041 = vmatpush1.bf16.msra.mxu0 %v4947_v23  ;;  %5113 = vmatprep.mubr.bf16.mxu1 %v7259_v55 }
 0x287   : > { %v4920_v39 = vpop.permute.xlu0 %4919  ;;  %v4922_v34 = vpop.permute.xlu1 %4921 }
 0x288   : > { %v4929_v47 = vsel %vm2708_vm13, %v4918_v58, %v4920_v39  ;;  %v4930_v42 = vsel %vm2708_vm13, %v4920_v39, %v4922_v34 }
 0x289   : > { %v4953_v5 = vsel %vm564_vm6, %v4929_v47, 0  ;;  %5480 = vmatmul.mubr.msk.bf16.vlgmr.msra.gmra.mrb[4].mxu0 %vm560_vm1, %v5474_v0  ;;  %5481 = vmatprep.subr.msk.bf16.mxu1 %vm564_vm6, %v4930_v42 }
 0x28a   : > { %5082 = vmatpush1.bf16.msra.mxu1 %v4953_v5 }
 0x28d   : > { %5482 = vmatmul.mubr.msk.bf16.vlgmr.msra.gmra.mrb[4].mxu1 %vm560_vm1, %v5474_v0 }
 0x298   : > { %v5134_v51 = vpop.permute.xlu0 %5133 }
 0x29a   : > { %v5148_v52 = vpop.permute.xlu1 %5147 }
 0x354   : > { %v4992_v41 = vpop.f32.mrb[0].mxu0 }
 0x355   : > { %v5136_v9 = vmul.f32 %v5134_v51, %v4992_v41  ;;  %v4994_v55 = vpop.f32.mrb[1].mxu0 }
 0x356   : > { %v5137_v37 = vmul.f32 %v5134_v51, %v4994_v55  ;;  %v4996_v40 = vpop.f32.mrb[2].mxu0 }
 0x357   : > { %v5150_v59 = vadd.f32 %v5148_v52, %v5136_v9  ;;  %v4997_v53 = vpop.f32.mrb[3].mxu0 }
 0x358   : > { %v5151_v63 = vadd.f32 %v5148_v52, %v5137_v37  ;;  %v5033_v28 = vpop.f32.mrb[0].mxu1 }
 0x359   : > { %v5166_v33 = vmul.f32 0.01, %v5150_v59  ;;  %v5138_v20 = vmul.f32 %v5134_v51, %v5033_v28  ;;  %v5035_v54 = vpop.f32.mrb[1].mxu1  ;;  %vm5158_vm14 = vcmp.ge.f32.partialorder %v5150_v59, 0.0 }
 0x35a   : > { %v5167_v2 = vmul.f32 0.01, %v5151_v63  ;;  %v5139_v60 = vmul.f32 %v5134_v51, %v5035_v54  ;;  %vm5159_vm15 = vcmp.ge.f32.partialorder %v5151_v63, 0.0  ;;  %v5037_v38 = vpop.f32.mrb[2].mxu1 }
 0x35b   : > { %v5152_v22 = vadd.f32 %v5148_v52, %v5138_v20  ;;  %v5174_v12 = vsel %vm5158_vm14, %v5150_v59, %v5166_v33  ;;  %v5038_v62 = vpop.f32.mrb[3].mxu1 }
 0x35c   : > { %v5153_v7 = vadd.f32 %v5148_v52, %v5139_v60  ;;  %v5175_v57 = vsel %vm5159_vm15, %v5151_v63, %v5167_v2  ;;  %v5074_v30 = vpop.f32.mrb[4].mxu0 }
 0x35d   : > { %vm5160_vm0 = vcmp.ge.f32.partialorder %v5152_v22, 0.0  ;;  %v5168_v48 = vmul.f32 0.01, %v5152_v22  ;;  %v5483_v4 = vpack.c.bf16 %v5175_v57, %v5174_v12  ;;  %v5140_v50 = vmul.f32 %v5134_v51, %v5074_v30  ;;  %v5076_v10 = vpop.f32.mrb[5].mxu0 }
 0x35e   : > { %vm5161_vm1 = vcmp.ge.f32.partialorder %v5153_v7, 0.0  ;;  %v5169_v24 = vmul.f32 0.01, %v5153_v7  ;;  %v5141_v61 = vmul.f32 %v5134_v51, %v5076_v10  ;;  %v5078_v35 = vpop.f32.mrb[6].mxu0 }
 0x35f   : > { %v5176_v11 = vsel %vm5160_vm0, %v5152_v22, %v5168_v48  ;;  %v5154_v15 = vadd.f32 %v5148_v52, %v5140_v50  ;;  %v5079_v43 = vpop.f32.mrb[7].mxu0  ;;  %v5208_v1 = vrot.slane %v5483_v4, %v7278_v21 }
 0x360   : > { %v5177_v26 = vsel %vm5161_vm1, %v5153_v7, %v5169_v24  ;;  %v5155_v19 = vadd.f32 %v5148_v52, %v5141_v61  ;;  %v5115_v27 = vpop.f32.mrb[4].mxu1 }
 0x361   : > { %v5484_v49 = vpack.c.bf16 %v5177_v26, %v5176_v11  ;;  %vm5162_vm2 = vcmp.ge.f32.partialorder %v5154_v15, 0.0  ;;  %v5170_v6 = vmul.f32 0.01, %v5154_v15  ;;  %v5142_v45 = vmul.f32 %v5134_v51, %v5115_v27  ;;  %v5117_v14 = vpop.f32.mrb[5].mxu1 }
 0x362   : > { %vm5163_vm3 = vcmp.ge.f32.partialorder %v5155_v19, 0.0  ;;  %v5171_v25 = vmul.f32 0.01, %v5155_v19  ;;  %v5143_v32 = vmul.f32 %v5134_v51, %v5117_v14  ;;  %v5119_v13 = vpop.f32.mrb[6].mxu1 }
 0x363   : > { %v5215_v18 = vrot.slane %v5484_v49, %v7278_v21  ;;  %v5178_v17 = vsel %vm5162_vm2, %v5154_v15, %v5170_v6  ;;  %v5156_v3 = vadd.f32 %v5148_v52, %v5142_v45  ;;  %v5120_v0 = vpop.f32.mrb[7].mxu1 }
 0x364   : > { %v5179_v31 = vsel %vm5163_vm3, %v5155_v19, %v5171_v25  ;;  %v5157_v46 = vadd.f32 %v5148_v52, %v5143_v32 }
 0x365   : > { %v5230_v56 = vcombine.low %v5208_v1, %v5215_v18  ;;  %v5485_v8 = vpack.c.bf16 %v5179_v31, %v5178_v17  ;;  %vm5164_vm4 = vcmp.ge.f32.partialorder %v5156_v3, 0.0  ;;  %v5172_v36 = vmul.f32 0.01, %v5156_v3 }
 0x366   : > { %vm5165_vm5 = vcmp.ge.f32.partialorder %v5157_v46, 0.0  ;;  %v5173_v29 = vmul.f32 0.01, %v5157_v46 }
 0x367   : > { %v5180_v58 = vsel %vm5164_vm4, %v5156_v3, %v5172_v36  ;;  %v5222_v23 = vrot.slane %v5485_v8, %v7278_v21  ;;  %v5238_v47 = vrot.slane %v5230_v56, %v7278_v21 }
 0x368   : > { %v5181_v16 = vsel %vm5165_vm5, %v5157_v46, %v5173_v29 }
 0x369   : > { %v5486_v44 = vpack.c.bf16 %v5181_v16, %v5180_v58 }
 0x36b   : > { %v5229_v39 = vrot.slane %v5486_v44, %v7278_v21 }
 0x36d   : > { %v5231_v34 = vcombine.low %v5222_v23, %v5229_v39 }
 0x36f   : > { %v5245_v42 = vrot.slane %v5231_v34, %v7278_v21 }
 0x371   : > { %v5246_v5 = vcombine.low %v5238_v47, %v5245_v42 }
 0x373   : > { %5248 = vst [vmem:[%s320_s17] sm:$0xff] %v5246_v5 }
 0x374 PF: > { %s18_s27 = sadd.s32 1, %s5799_s27  }
 0x375   : > { %p15_p4 = scmp.ge.s32.totalorder %s18_s27, 4  }
 0x377   :  { %17 = sbr.rel (!%p15_p4) target bundleno = 1 (0x1), region = 101 }

// kernel: decoder_forward.5
= control target key start
LH: loop header
LB: loop body
LE: loop exit
PB: predicated region body
PF: predicated region fallthrough
CT: control target
= control target key end

     0   :  { %s3304_s21 = smov 0   ;;  %s4004_s0 = inlined_call_operand.vmem [shape: bf16[2,2,1024], index: 0, kind: input, shape index: {}]   ;;  %s4005_s1 = inlined_call_operand.vmem [shape: bf16[9,2,2], index: 1, kind: input, shape index: {}]   ;;  %s4006_s2 = inlined_call_operand.vmem [shape: bf16[1,1024], index: 2, kind: input, shape index: {}]   ;;  %s4007_s3 = inlined_call_operand.vmem [shape: bf16[1,1024], index: 3, kind: input, shape index: {}]   ;;  %s4008_s4 = inlined_call_operand.vmem [shape: f32[2,1], index: 4, kind: input, shape index: {}]   ;;  %s4009_s5 = inlined_call_operand.vmem [shape: f32[2,1], index: 5, kind: input, shape index: {}]   ;;  %s4010_s6 = inlined_call_operand.vmem [shape: f32[2,2,1024], index: 6, kind: output, shape index: {}]  }
   0x1 LB: > { %s2997_s22 = sadd.s32 4294967295, %s3251_s21   ;;  %p3001_p0 = scmp.ge.s32.totalorder %s3251_s21, 1  ;;  %s3251_s21 = sphi %s3304_s21, %s16_s21  }
   0x2   : > { %p211_p1 = scmp.lt.s32.totalorder %s3251_s21, 3 }
   0x4   : > { %p212_p2 = pnand %p3001_p0, %p211_p1 }
   0x5   : > { %p240_p3 = scmp.lt.s32.totalorder (!%p212_p2), %s2997_s22, 1  ;;  %v258_v0 = vlaneseq (!%p212_p2)  ;;  %v3253_v1 = vmov (!%p212_p2), 1966171168   ;;  %v251_v7 = vld [vmem:[%s4007_s3] sm:$0xff] (!%p212_p2)  ;;  %s3254_s29 = smov (!%p212_p2), 33   ;;  %vm319_vm0 = vcmask (!%p212_p2), 269312  }
   0x6   : > { %215 = sbr.rel (%p212_p2) target bundleno = 703 (0x2bf), region = 44  ;;  %v256_v2 = vunpack.c.l.s4 (!%p212_p2), %v3253_v1  ;;  %v873_v19 = vcombine.high (!%p212_p2), %v251_v7, %v251_v7  ;;  %v250_v33 = vld [vmem:[%s4006_s2] sm:$0xff] (!%p212_p2)  ;;  %s3255_s8 = smov (!%p212_p2), 2   ;;  %vm488_vm1 = vcmask (!%p212_p2), 15360   ;;  %vm1289_vm2 = vcmask (!%p212_p2), 261120  }
   0x7   : > { %v3314_v3 = vshrl.u32 (!%p212_p2), %v258_v0, 7  ;;  %v343_v44 = vcombine.high (!%p212_p2), %v250_v33, %v250_v33  ;;  %s3256_s9 = smov (!%p212_p2), 32   ;;  %s3257_s10 = smov (!%p212_p2), 34   ;;  %vm1796_vm3 = vcmask (!%p212_p2), 277504   ;;  %vm2075_vm4 = vcmask (!%p212_p2), 523264  }
   0x8   : > { %v257_v4 = vunpack.c.0.s8 (!%p212_p2), %v256_v2  ;;  %s3258_s11 = smov (!%p212_p2), 64   ;;  %s3260_s12 = smov (!%p212_p2), 127   ;;  %vm479_vm5 = vcmask (!%p212_p2), 1039360   ;;  %vm492_vm6 = vcmask (!%p212_p2), 1040384   ;;  %vm1572_vm7 = vcmask (!%p212_p2), 777216  }
   0x9   : > { %v3342_v26 = vsub.s32 (!%p212_p2), 0, %v3314_v3  ;;  %s3261_s13 = smov (!%p212_p2), 95   ;;  %s3262_s14 = smov (!%p212_p2), 126   ;;  %vm1057_vm8 = vcmask (!%p212_p2), 1031168   ;;  %vm1344_vm9 = vcmask (!%p212_p2), 785408   ;;  %vm2581_vm10 = vcmask (!%p212_p2), 539648  }
   0xa   : > { %v3321_v5 = vsub.s32 (!%p212_p2), %v257_v4, %v3314_v3  ;;  %s3263_s15 = smov (!%p212_p2), 96   ;;  %s3264_s16 = smov (!%p212_p2), 66   ;;  %vm1851_vm11 = vcmask (!%p212_p2), 769024   ;;  %vm2357_vm12 = vcmask (!%p212_p2), 515072   ;;  %vm2636_vm13 = vcmask (!%p212_p2), 506880  }
   0xb   : > { %s3265_s17 = smov (!%p212_p2), 94   ;;  %s3266_s20 = smov (!%p212_p2), 63  }
   0xc   : > { %v880_v13 = vrot.slane (!%p212_p2), %v251_v7, %v3321_v5  ;;  %v887_v24 = vrot.slane (!%p212_p2), %v873_v19, %v3321_v5  ;;  %v350_v40 = vrot.slane (!%p212_p2), %v250_v33, %v3321_v5  ;;  %v357_v55 = vrot.slane (!%p212_p2), %v343_v44, %v3321_v5 }
   0xd   : > { %s4012_s22 = smov (!%p240_p3, %s2997_s22), 1 }
   0xe   : > { %s3002_s23 = sshll.u32 %s4012_s22, 3  ;;  %v888_v18 = vcombine.high %v880_v13, %v880_v13  ;;  %v896_v21 = vrot.slane %v880_v13, %v3321_v5  ;;  %v889_v32 = vcombine.high %v887_v24, %v887_v24  ;;  %v903_v36 = vrot.slane %v887_v24, %v3321_v5 }
   0xf   : > { %s243_s26 = scalar_lea.vmem %s4004_s0, %s3002_s23  ;;  %v358_v48 = vcombine.high %v350_v40, %v350_v40  ;;  %v366_v51 = vrot.slane %v350_v40, %v3321_v5  ;;  %v359_v62 = vcombine.high %v357_v55, %v357_v55  ;;  %v373_v1 = vrot.slane %v357_v55, %v3321_v5 }
  0x10   : > { %v252_v6 = vld [vmem:[%s243_s26] sm:$0xff]  ;;  %v910_v23 = vrot.slane %v888_v18, %v3321_v5  ;;  %v923_v27 = vpack.i.b16 %v896_v21, %v896_v21  ;;  %v918_v28 = vcombine.high %v896_v21, %v896_v21  ;;  %v917_v39 = vrot.slane %v889_v32, %v3321_v5 }
  0x11   : > { %v261_v8 = vrot.slane %v252_v6, %v3321_v5  ;;  %v254_v9 = vcombine.high %v252_v6, %v252_v6  ;;  %v951_v42 = vpack.i.b16 %v903_v36, %v903_v36  ;;  %v919_v43 = vcombine.high %v903_v36, %v903_v36 }
  0x12   : > { %v930_v30 = vpack.i.b16 %v910_v23, %v910_v23  ;;  %v920_v31 = vcombine.high %v910_v23, %v910_v23  ;;  %v3350_v34 = vrot.slane %v923_v27, %v3342_v26  ;;  %v937_v35 = vpack.i.b16 %v918_v28, %v918_v28 }
  0x13   : > { %v277_v10 = vrot.slane %v261_v8, %v3321_v5  ;;  %v269_v11 = vcombine.high %v261_v8, %v261_v8  ;;  %v268_v12 = vrot.slane %v254_v9, %v3321_v5  ;;  %v958_v46 = vpack.i.b16 %v917_v39, %v917_v39 }
  0x14   : > { %v3355_v37 = vrot.slane %v930_v30, %v3342_v26  ;;  %v944_v38 = vpack.i.b16 %v920_v31, %v920_v31  ;;  %v3362_v41 = vrot.slane %v937_v35, %v3342_v26  ;;  %v921_v47 = vcombine.high %v917_v39, %v917_v39 }
  0x15   : > { %303 = vrot.lane.b32.xlu0 %v277_v10, %s3254_s29  ;;  %v299_v14 = vcombine.high %v277_v10, %v277_v10  ;;  %v291_v15 = vrot.slane %v269_v11, %v3321_v5  ;;  %v270_v17 = vcombine.high %v268_v12, %v268_v12  ;;  %v284_v20 = vrot.slane %v268_v12, %v3321_v5 }
  0x16   : > { %v3367_v45 = vrot.slane %v944_v38, %v3342_v26  ;;  %v3372_v49 = vrot.slane %v951_v42, %v3342_v26  ;;  %v965_v50 = vpack.i.b16 %v919_v43, %v919_v43  ;;  %v3378_v52 = vrot.slane %v958_v46, %v3342_v26 }
  0x17   : > { %307 = vrot.lane.b32.xlu1 %v299_v14, %s3254_s29  ;;  %v301_v16 = vcombine.high %v291_v15, %v291_v15  ;;  %v298_v22 = vrot.slane %v270_v17, %v3321_v5  ;;  %v300_v25 = vcombine.high %v284_v20, %v284_v20  ;;  %v972_v53 = vpack.i.b16 %v921_v47, %v921_v47 }
  0x18   : > { %v380_v54 = vrot.slane %v358_v48, %v3321_v5  ;;  %v3385_v56 = vrot.slane %v965_v50, %v3342_v26  ;;  %v393_v57 = vpack.i.b16 %v366_v51, %v366_v51  ;;  %v388_v58 = vcombine.high %v366_v51, %v366_v51 }
  0x19   : > { %305 = vrot.lane.b32.xlu0 %v291_v15, %s3254_s29  ;;  %v302_v29 = vcombine.high %v298_v22, %v298_v22  ;;  %v3390_v59 = vrot.slane %v972_v53, %v3342_v26  ;;  %v387_v6 = vrot.slane %v359_v62, %v3321_v5  ;;  %v421_v8 = vpack.i.b16 %v373_v1, %v373_v1 }
  0x1a   : > { %v400_v60 = vpack.i.b16 %v380_v54, %v380_v54  ;;  %v390_v61 = vcombine.high %v380_v54, %v380_v54  ;;  %v3395_v63 = vrot.slane %v393_v57, %v3342_v26  ;;  %v407_v0 = vpack.i.b16 %v388_v58, %v388_v58 }
  0x1b   : > { %309 = vrot.lane.b32.xlu1 %v301_v16, %s3254_s29  ;;  %v389_v9 = vcombine.high %v373_v1, %v373_v1  ;;  %v428_v11 = vpack.i.b16 %v387_v6, %v387_v6  ;;  %v391_v12 = vcombine.high %v387_v6, %v387_v6  ;;  %v3414_v13 = vrot.slane %v421_v8, %v3342_v26 }
  0x1c   : > { %v3401_v2 = vrot.slane %v400_v60, %v3342_v26  ;;  %v414_v4 = vpack.i.b16 %v390_v61, %v390_v61  ;;  %v3406_v7 = vrot.slane %v407_v0, %v3342_v26 }
  0x1d   : > { %311 = vrot.lane.b32.xlu0 %v284_v20, %s3254_s29  ;;  %v435_v5 = vpack.i.b16 %v389_v9, %v389_v9  ;;  %v3418_v14 = vrot.slane %v428_v11, %v3342_v26  ;;  %v442_v15 = vpack.i.b16 %v391_v12, %v391_v12  ;;  %v3259_v20 = vmov 0  }
  0x1e   : > { %v3410_v10 = vrot.slane %v414_v4, %v3342_v26  ;;  %549 = vmatprep.mubr.bf16.mxu0 %v3259_v20  ;;  %590 = vmatprep.mubr.bf16.mxu1 %v3259_v20 }
  0x1f   : > { %313 = vrot.lane.b32.xlu1 %v298_v22, %s3254_s29  ;;  %v3422_v16 = vrot.slane %v435_v5, %v3342_v26  ;;  %v3426_v17 = vrot.slane %v442_v15, %v3342_v26  ;;  %3240 = vset.pattern.permute.xlu0 %v3259_v20 }
  0x20   : > { %3241 = vset.pattern.permute.xlu1 %v3259_v20 }
  0x21   : > { %315 = vrot.lane.b32.xlu0 %v300_v25, %s3254_s29 }
  0x23   : > { %317 = vrot.lane.b32.xlu1 %v302_v29, %s3254_s29  ;;  %s3267_s29 = smov 62  }
  0x25   : > { %986 = vrot.lane.b32.xlu0 %v3350_v34, %s3255_s8 }
  0x27   : > { %988 = vrot.lane.b32.xlu1 %v3355_v37, %s3255_s8 }
  0x29   : > { %990 = vrot.lane.b32.xlu0 %v3362_v41, %s3255_s8 }
  0x2b   : > { %992 = vrot.lane.b32.xlu1 %v3367_v45, %s3255_s8 }
  0x2d   : > { %994 = vrot.lane.b32.xlu0 %v3372_v49, %s3255_s8 }
  0x2f   : > { %996 = vrot.lane.b32.xlu1 %v3378_v52, %s3255_s8 }
  0x31   : > { %998 = vrot.lane.b32.xlu0 %v3385_v56, %s3255_s8 }
  0x33   : > { %1000 = vrot.lane.b32.xlu1 %v3390_v59, %s3255_s8 }
  0x35   : > { %1273 = vrot.lane.b32.xlu0 %v3395_v63, %s3256_s9 }
  0x37   : > { %1275 = vrot.lane.b32.xlu1 %v3401_v2, %s3256_s9 }
  0x39   : > { %1277 = vrot.lane.b32.xlu0 %v3406_v7, %s3256_s9 }
  0x3b   : > { %1279 = vrot.lane.b32.xlu1 %v3410_v10, %s3256_s9 }
  0x3d   : > { %1281 = vrot.lane.b32.xlu0 %v3414_v13, %s3256_s9 }
  0x3f   : > { %1283 = vrot.lane.b32.xlu1 %v3418_v14, %s3256_s9 }
  0x41   : > { %1285 = vrot.lane.b32.xlu0 %v3422_v16, %s3256_s9 }
  0x43   : > { %1287 = vrot.lane.b32.xlu1 %v3426_v17, %s3256_s9 }
  0x45   : > { %1782 = vrot.lane.b32.xlu0 %v3355_v37, %s3257_s10 }
  0x47   : > { %1780 = vrot.lane.b32.xlu1 %v3350_v34, %s3257_s10 }
  0x49   : > { %1786 = vrot.lane.b32.xlu0 %v3367_v45, %s3257_s10 }
  0x4b   : > { %1784 = vrot.lane.b32.xlu1 %v3362_v41, %s3257_s10 }
  0x4d   : > { %1790 = vrot.lane.b32.xlu0 %v3378_v52, %s3257_s10 }
  0x4f   : > { %1788 = vrot.lane.b32.xlu1 %v3372_v49, %s3257_s10 }
  0x51   : > { %1794 = vrot.lane.b32.xlu0 %v3390_v59, %s3257_s10 }
  0x53   : > { %1792 = vrot.lane.b32.xlu1 %v3385_v56, %s3257_s10 }
  0x55   : > { %2059 = vrot.lane.b32.xlu0 %v3395_v63, %s3258_s11 }
  0x57   : > { %2061 = vrot.lane.b32.xlu1 %v3401_v2, %s3258_s11 }
  0x59   : > { %2063 = vrot.lane.b32.xlu0 %v3406_v7, %s3258_s11 }
  0x5b   : > { %2065 = vrot.lane.b32.xlu1 %v3410_v10, %s3258_s11 }
  0x5d   : > { %2067 = vrot.lane.b32.xlu0 %v3414_v13, %s3258_s11 }
  0x5f   : > { %2069 = vrot.lane.b32.xlu1 %v3418_v14, %s3258_s11 }
  0x61   : > { %2071 = vrot.lane.b32.xlu0 %v3422_v16, %s3258_s11 }
  0x63   : > { %2073 = vrot.lane.b32.xlu1 %v3426_v17, %s3258_s11 }
  0x87   : > { %v304_v18 = vpop.permute.xlu0 %303 }
  0x88   : > { %v3455_v19 = vsel %vm319_vm0, 0, %v304_v18 }
  0x89   : > { %v308_v21 = vpop.permute.xlu1 %307  ;;  %461 = vrot.lane.b32.xlu0 %v3455_v19, %s3260_s12  ;;  %1554 = vrot.lane.b32.xlu1 %v3455_v19, %s3261_s13 }
  0x8b   : > { %v306_v22 = vpop.permute.xlu0 %305 }
  0x8c   : > { %v3466_v23 = vsel %vm319_vm0, %v304_v18, %v306_v22  ;;  %v3469_v24 = vsel %vm319_vm0, %v306_v22, %v308_v21 }
  0x8d   : > { %v310_v25 = vpop.permute.xlu1 %309  ;;  %465 = vrot.lane.b32.xlu0 %v3469_v24, %s3260_s12  ;;  %463 = vrot.lane.b32.xlu1 %v3466_v23, %s3260_s12 }
  0x8e   : > { %v3480_v28 = vsel %vm319_vm0, %v308_v21, %v310_v25 }
  0x8f   : > { %v312_v26 = vpop.permute.xlu0 %311 }
  0x90   : > { %v3483_v30 = vsel %vm319_vm0, %v310_v25, %v312_v26 }
  0x91   : > { %1556 = vrot.lane.b32.xlu0 %v3466_v23, %s3261_s13  ;;  %v314_v27 = vpop.permute.xlu1 %313  ;;  %1558 = vrot.lane.b32.xlu1 %v3469_v24, %s3261_s13 }
  0x92   : > { %v3490_v33 = vsel %vm319_vm0, %v312_v26, %v314_v27 }
  0x93   : > { %v316_v29 = vpop.permute.xlu0 %315 }
  0x94   : > { %v3493_v35 = vsel %vm319_vm0, %v314_v27, %v316_v29 }
  0x95   : > { %469 = vrot.lane.b32.xlu0 %v3483_v30, %s3260_s12  ;;  %467 = vrot.lane.b32.xlu1 %v3480_v28, %s3260_s12  ;;  %v318_v31 = vpop.permute.xlu1 %317 }
  0x96   : > { %v3504_v43 = vsel %vm319_vm0, %v316_v29, %v318_v31  ;;  %v3520_v62 = vsel %vm319_vm0, %v318_v31, 0 }
  0x97   : > { %v987_v32 = vpop.permute.xlu0 %986 }
  0x98   : > { %v1019_v38 = vmul.bf16 %v987_v32, %v3455_v19 }
  0x99   : > { %473 = vrot.lane.b32.xlu0 %v3493_v35, %s3260_s12  ;;  %471 = vrot.lane.b32.xlu1 %v3490_v33, %s3260_s12  ;;  %v989_v36 = vpop.permute.xlu1 %988 }
  0x9a   : > { %v1003_v0 = vsel %vm488_vm1, %v987_v32, %v989_v36 }
  0x9b   : > { %v3500_v39 = vpop.permute.xlu0 %990  ;;  %v1020_v6 = vmul.bf16 %v1003_v0, %v3466_v23 }
  0x9c   : > { %v1004_v44 = vsel %vm488_vm1, %v989_v36, %v3500_v39 }
  0x9d   : > { %1039 = vrot.lane.b32.xlu1 %v1019_v38, %s3262_s14  ;;  %v993_v40 = vpop.permute.xlu1 %992  ;;  %v1021_v48 = vmul.bf16 %v1004_v44, %v3469_v24 }
  0x9f   : > { %v995_v42 = vpop.permute.xlu0 %994 }
  0xa0   : > { %v1006_v5 = vsel %vm488_vm1, %v993_v40, %v995_v42 }
  0xa1   : > { %475 = vrot.lane.b32.xlu1 %v3504_v43, %s3260_s12  ;;  %v997_v46 = vpop.permute.xlu1 %996  ;;  %v1023_v22 = vmul.bf16 %v1006_v5, %v3483_v30 }
  0xa2   : > { %v1007_v50 = vsel %vm488_vm1, %v995_v42, %v997_v46 }
  0xa3   : > { %v999_v47 = vpop.permute.xlu0 %998  ;;  %v1024_v54 = vmul.bf16 %v1007_v50, %v3490_v33 }
  0xa4   : > { %v1008_v8 = vsel %vm488_vm1, %v997_v46, %v999_v47 }
  0xa5   : > { %1043 = vrot.lane.b32.xlu1 %v1021_v48, %s3262_s14  ;;  %v1001_v51 = vpop.permute.xlu1 %1000  ;;  %v1025_v15 = vmul.bf16 %v1008_v8, %v3493_v35  ;;  %v1005_v48 = vsel %vm488_vm1, %v3500_v39, %v993_v40 }
  0xa6   : > { %v1009_v25 = vsel %vm488_vm1, %v999_v47, %v1001_v51  ;;  %v1027_v42 = vmul.bf16 %v1001_v51, %v3520_v62  ;;  %v1022_v50 = vmul.bf16 %v1005_v48, %v3480_v28 }
  0xa7   : > { %v1274_v53 = vpop.permute.xlu0 %1273  ;;  %v1026_v29 = vmul.bf16 %v1009_v25, %v3504_v43 }
  0xa8   : > { %v1306_v55 = vmul.bf16 %v1274_v53, %v3455_v19 }
  0xa9   : > { %1049 = vrot.lane.b32.xlu1 %v1024_v54, %s3262_s14  ;;  %v1276_v57 = vpop.permute.xlu1 %1275 }
  0xaa   : > { %v1290_v58 = vsel %vm1289_vm2, %v1274_v53, %v1276_v57  ;;  %1326 = vrot.lane.b32.xlu0 %v1306_v55, %s3263_s15 }
  0xab   : > { %v1278_v60 = vpop.permute.xlu0 %1277  ;;  %v1307_v61 = vmul.bf16 %v1290_v58, %v3466_v23 }
  0xac   : > { %v1291_v18 = vsel %vm1289_vm2, %v1276_v57, %v1278_v60 }
  0xad   : > { %1328 = vrot.lane.b32.xlu1 %v1307_v61, %s3263_s15  ;;  %v1280_v1 = vpop.permute.xlu1 %1279  ;;  %v1308_v26 = vmul.bf16 %v1291_v18, %v3469_v24 }
  0xae   : > { %477 = vrot.lane.b32.xlu0 %v3520_v62, %s3260_s12  ;;  %v1292_v31 = vsel %vm1289_vm2, %v1278_v60, %v1280_v1 }
  0xaf   : > { %v1282_v4 = vpop.permute.xlu0 %1281  ;;  %v1309_v38 = vmul.bf16 %v1292_v31, %v3480_v28 }
  0xb0   : > { %v1293_v51 = vsel %vm1289_vm2, %v1280_v1, %v1282_v4 }
  0xb1   : > { %v1284_v9 = vpop.permute.xlu1 %1283  ;;  %v1310_v53 = vmul.bf16 %v1293_v51, %v3483_v30 }
  0xb2   : > { %v1294_v11 = vsel %vm1289_vm2, %v1282_v4, %v1284_v9  ;;  %1041 = vrot.lane.b32.xlu0 %v1020_v6, %s3262_s14 }
  0xb3   : > { %v1311_v12 = vmul.bf16 %v1294_v11, %v3490_v33  ;;  %v1286_v21 = vpop.permute.xlu0 %1285 }
  0xb4   : > { %v1295_v27 = vsel %vm1289_vm2, %v1284_v9, %v1286_v21 }
  0xb5   : > { %1336 = vrot.lane.b32.xlu1 %v1311_v12, %s3263_s15  ;;  %v1312_v32 = vmul.bf16 %v1295_v27, %v3493_v35  ;;  %v1288_v36 = vpop.permute.xlu1 %1287 }
  0xb6   : > { %1051 = vrot.lane.b32.xlu0 %v1025_v15, %s3262_s14  ;;  %v1296_v44 = vsel %vm1289_vm2, %v1286_v21, %v1288_v36  ;;  %v1314_v47 = vmul.bf16 %v1288_v36, %v3520_v62 }
  0xb7   : > { %v1313_v46 = vmul.bf16 %v1296_v44, %v3504_v43  ;;  %v1783_v54 = vpop.permute.xlu0 %1782 }
  0xb9   : > { %1047 = vrot.lane.b32.xlu1 %v1023_v22, %s3262_s14  ;;  %v1781_v55 = vpop.permute.xlu1 %1780 }
  0xba   : > { %1330 = vrot.lane.b32.xlu0 %v1308_v26, %s3263_s15  ;;  %v1797_v60 = vsel %vm1796_vm3, %v1781_v55, %v1783_v54  ;;  %v1813_v6 = vmul.bf16 %v1781_v55, %v3455_v19 }
  0xbb   : > { %v1787_v39 = vpop.permute.xlu0 %1786 }
  0xbd   : > { %1053 = vrot.lane.b32.xlu1 %v1026_v29, %s3262_s14  ;;  %v1785_v40 = vpop.permute.xlu1 %1784 }
  0xbe   : > { %1338 = vrot.lane.b32.xlu0 %v1312_v32, %s3263_s15  ;;  %v1798_v9 = vsel %vm1796_vm3, %v1783_v54, %v1785_v40 }
  0xbf   : > { %v1791_v57 = vpop.permute.xlu0 %1790  ;;  %v1815_v12 = vmul.bf16 %v1798_v9, %v3469_v24 }
  0xc1   : > { %1332 = vrot.lane.b32.xlu1 %v1309_v38, %s3263_s15  ;;  %v1789_v58 = vpop.permute.xlu1 %1788 }
  0xc2   : > { %1055 = vrot.lane.b32.xlu0 %v1027_v42, %s3262_s14 }
  0xc5   : > { %1340 = vrot.lane.b32.xlu1 %v1313_v46, %s3263_s15 }
  0xc6   : > { %1342 = vrot.lane.b32.xlu0 %v1314_v47, %s3263_s15 }
  0xc9   : > { %1562 = vrot.lane.b32.xlu1 %v3483_v30, %s3261_s13 }
  0xca   : > { %1045 = vrot.lane.b32.xlu0 %v1022_v50, %s3262_s14 }
  0xcd   : > { %2567 = vrot.lane.b32.xlu1 %v3355_v37, %s3264_s16  ;;  %v1795_v37 = vpop.permute.xlu0 %1794 }
  0xce   : > { %1334 = vrot.lane.b32.xlu0 %v1310_v53, %s3263_s15  ;;  %v1821_v44 = vmul.bf16 %v1795_v37, %v3520_v62 }
  0xd1   : > { %2571 = vrot.lane.b32.xlu1 %v3367_v45, %s3264_s16  ;;  %v1793_v45 = vpop.permute.xlu1 %1792  ;;  %v2060_v61 = vpop.permute.xlu0 %2059 }
  0xd2   : > { %1560 = vrot.lane.b32.xlu0 %v3480_v28, %s3261_s13  ;;  %v1803_v8 = vsel %vm1796_vm3, %v1793_v45, %v1795_v37  ;;  %v2092_v18 = vmul.bf16 %v2060_v61, %v3455_v19  ;;  %v1802_v25 = vsel %vm1796_vm3, %v1791_v57, %v1793_v45 }
  0xd3   : > { %v1820_v11 = vmul.bf16 %v1803_v8, %v3504_v43  ;;  %v1819_v31 = vmul.bf16 %v1802_v25, %v3493_v35 }
  0xd5   : > { %1564 = vrot.lane.b32.xlu1 %v3490_v33, %s3261_s13  ;;  %v2062_v0 = vpop.permute.xlu1 %2061  ;;  %v2064_v1 = vpop.permute.xlu0 %2063 }
  0xd6   : > { %2565 = vrot.lane.b32.xlu0 %v3350_v34, %s3264_s16  ;;  %v1814_v34 = vmul.bf16 %v1797_v60, %v3466_v23  ;;  %v2077_v22 = vsel %vm2075_vm4, %v2062_v0, %v2064_v1  ;;  %v2076_v47 = vsel %vm2075_vm4, %v2060_v61, %v2062_v0 }
  0xd7   : > { %v2094_v26 = vmul.bf16 %v2077_v22, %v3469_v24  ;;  %v2093_v53 = vmul.bf16 %v2076_v47, %v3466_v23  ;;  %v452_v22 = vmul.bf16 %v3414_v13, %v3483_v30 }
  0xd9   : > { %1568 = vrot.lane.b32.xlu1 %v3504_v43, %s3261_s13  ;;  %v2066_v4 = vpop.permute.xlu1 %2065  ;;  %v2068_v5 = vpop.permute.xlu0 %2067 }
  0xda   : > { %2569 = vrot.lane.b32.xlu0 %v3362_v41, %s3264_s16  ;;  %v1799_v41 = vsel %vm1796_vm3, %v1785_v40, %v1787_v39  ;;  %v2079_v32 = vsel %vm2075_vm4, %v2066_v4, %v2068_v5 }
  0xdb   : > { %v2096_v36 = vmul.bf16 %v2079_v32, %v3483_v30 }
  0xdd   : > { %2575 = vrot.lane.b32.xlu1 %v3378_v52, %s3264_s16  ;;  %v1801_v52 = vsel %vm1796_vm3, %v1789_v58, %v1791_v57  ;;  %v2070_v15 = vpop.permute.xlu1 %2069  ;;  %v2072_v27 = vpop.permute.xlu0 %2071  ;;  %v3638_v57 = vld [vmem:[%s4005_s1 + $0x1] sm:$0x1] }
  0xde   : > { %2573 = vrot.lane.b32.xlu0 %v3372_v49, %s3264_s16  ;;  %v1816_v49 = vmul.bf16 %v1799_v41, %v3480_v28  ;;  %v2081_v46 = vsel %vm2075_vm4, %v2070_v15, %v2072_v27  ;;  %v2080_v41 = vsel %vm2075_vm4, %v2068_v5, %v2070_v15  ;;  %v449_v5 = vmul.bf16 %v3401_v2, %v3466_v23 }
  0xdf   : > { %v2098_v48 = vmul.bf16 %v2081_v46, %v3493_v35  ;;  %v448_v15 = vmul.bf16 %v3395_v63, %v3455_v19  ;;  %v453_v63 = vmul.bf16 %v3418_v14, %v3490_v33  ;;  %v3701_v14 = vld [vmem:[%s4005_s1] sm:$0x1] }
  0xe1   : > { %2579 = vrot.lane.b32.xlu1 %v3390_v59, %s3264_s16  ;;  %v1818_v59 = vmul.bf16 %v1801_v52, %v3490_v33  ;;  %v2074_v29 = vpop.permute.xlu1 %2073  ;;  %v685_v2 = vsel %vm492_vm6, %v448_v15, 0 }
  0xe2   : > { %1566 = vrot.lane.b32.xlu0 %v3493_v35, %s3261_s13 }
  0xe5   : > { %1835 = vrot.lane.b32.xlu1 %v1814_v34, %s3265_s17 }
  0xe6   : > { %1570 = vrot.lane.b32.xlu0 %v3520_v62, %s3261_s13 }
  0xe9   : > { %1839 = vrot.lane.b32.xlu1 %v1816_v49, %s3265_s17  ;;  %v2097_v49 = vmul.bf16 %v2080_v41, %v3490_v33 }
  0xea   : > { %2577 = vrot.lane.b32.xlu0 %v3385_v56, %s3264_s16  ;;  %v1800_v56 = vsel %vm1796_vm3, %v1787_v39, %v1789_v58  ;;  %v2078_v39 = vsel %vm2075_vm4, %v2064_v1, %v2066_v4  ;;  %v2100_v58 = vmul.bf16 %v2074_v29, %v3520_v62  ;;  %v2082_v1 = vsel %vm2075_vm4, %v2072_v27, %v2074_v29 }
  0xeb   : > { %v1817_v21 = vmul.bf16 %v1800_v56, %v3483_v30  ;;  %v2095_v60 = vmul.bf16 %v2078_v39, %v3480_v28  ;;  %v2099_v9 = vmul.bf16 %v2082_v1, %v3504_v43 }
  0xed   : > { %1843 = vrot.lane.b32.xlu1 %v1818_v59, %s3265_s17 }
  0xee   : > { %1833 = vrot.lane.b32.xlu0 %v1813_v6, %s3265_s17 }
  0xf1   : > { %1847 = vrot.lane.b32.xlu1 %v1820_v11, %s3265_s17 }
  0xf2   : > { %1837 = vrot.lane.b32.xlu0 %v1815_v12, %s3265_s17 }
  0xf5   : > { %2112 = vrot.lane.b32.xlu1 %v2092_v18, %s3258_s11 }
  0xf6   : > { %1841 = vrot.lane.b32.xlu0 %v1817_v21, %s3265_s17 }
  0xf9   : > { %2116 = vrot.lane.b32.xlu1 %v2094_v26, %s3258_s11  ;;  %v697_v26 = vsel %vm492_vm6, %v452_v22, 0 }
  0xfa   : > { %1845 = vrot.lane.b32.xlu0 %v1819_v31, %s3265_s17 }
  0xfb   : > { %v462_v38 = vpop.permute.xlu0 %461  ;;  %v1555_v42 = vpop.permute.xlu1 %1554 }
  0xfd   : > { %2120 = vrot.lane.b32.xlu1 %v2096_v36, %s3258_s11 }
  0xfe   : > { %1849 = vrot.lane.b32.xlu0 %v1821_v44, %s3265_s17 }
  0xff   : > { %v466_v50 = vpop.permute.xlu0 %465  ;;  %v464_v51 = vpop.permute.xlu1 %463 }
 0x100   : > { %v481_v54 = vsel %vm479_vm5, %v464_v51, %v466_v50  ;;  %v480_v55 = vsel %vm479_vm5, %v462_v38, %v464_v51  ;;  %v451_v38 = vmul.bf16 %v3410_v10, %v3480_v28  ;;  %v455_v10 = vmul.bf16 %v3426_v17, %v3504_v43 }
 0x101   : > { %2124 = vrot.lane.b32.xlu1 %v2098_v48, %s3258_s11  ;;  %3006 = vmatprep.subr.msk.bf16.mxu0 %vm492_vm6, %v481_v54  ;;  %v494_v40 = vsel %vm492_vm6, %v480_v55, 0  ;;  %v454_v17 = vmul.bf16 %v3422_v16, %v3493_v35 }
 0x102   : > { %2114 = vrot.lane.b32.xlu0 %v2093_v53, %s3258_s11  ;;  %518 = vmatpush1.bf16.msra.mxu0 %v494_v40  ;;  %v3740_v53 = vld [vmem:[%s4005_s1 + $0x2] sm:$0x1] }
 0x103   : > { %v3641_v37 = vpop.permute.xlu0 %1556  ;;  %v3643_v45 = vpop.permute.xlu1 %1558  ;;  %v703_v41 = vsel %vm492_vm6, %v454_v17, 0 }
 0x104   : > { %v3648_v34 = vsel %vm1572_vm7, %v1555_v42, %v3641_v37  ;;  %v450_v42 = vmul.bf16 %v3406_v7, %v3469_v24 }
 0x105   : > { %2128 = vrot.lane.b32.xlu1 %v2100_v58, %s3258_s11  ;;  %3007 = vmatmul.mubr.msk.bf16.vlgmr.msra.gmra.mrb[0].mxu0 %vm488_vm1, %v3638_v57 }
 0x106   : > { %2118 = vrot.lane.b32.xlu0 %v2095_v60, %s3258_s11  ;;  %631 = vmatprep.mubr.bf16.mxu0 %v3259_v20  ;;  %v691_v7 = vsel %vm492_vm6, %v450_v42, 0 }
 0x107   : > { %v470_v61 = vpop.permute.xlu0 %469  ;;  %v468_v0 = vpop.permute.xlu1 %467 }
 0x108   : > { %v483_v52 = vsel %vm479_vm5, %v468_v0, %v470_v61  ;;  %v482_v59 = vsel %vm479_vm5, %v466_v50, %v468_v0 }
 0x109   : > { %2341 = vrot.lane.b32.xlu1 %v3466_v23, %s3266_s20  ;;  %3008 = vmatprep.subr.msk.bf16.mxu1 %vm492_vm6, %v483_v52  ;;  %v500_v4 = vsel %vm492_vm6, %v482_v59, 0 }
 0x10a   : > { %2122 = vrot.lane.b32.xlu0 %v2097_v49, %s3258_s11  ;;  %559 = vmatpush1.bf16.msra.mxu1 %v500_v4 }
 0x10b   : > { %v474_v6 = vpop.permute.xlu0 %473  ;;  %v472_v8 = vpop.permute.xlu1 %471 }
 0x10c   : > { %v484_v11 = vsel %vm479_vm5, %v470_v61, %v472_v8  ;;  %v485_v12 = vsel %vm479_vm5, %v472_v8, %v474_v6 }
 0x10d   : > { %v506_v56 = vsel %vm492_vm6, %v484_v11, 0  ;;  %2345 = vrot.lane.b32.xlu1 %v3480_v28, %s3266_s20  ;;  %3010 = vmatprep.subr.msk.bf16.mxu0 %vm492_vm6, %v485_v12 }
 0x10e   : > { %2126 = vrot.lane.b32.xlu0 %v2099_v9, %s3258_s11  ;;  %600 = vmatpush1.bf16.msra.mxu0 %v506_v56 }
 0x10f   : > { %3014 = vmatprep.subr.msk.bf16.mxu0 %vm492_vm6, %v449_v5  ;;  %v1040_v18 = vpop.permute.xlu1 %1039  ;;  %3009 = vmatmul.mubr.msk.bf16.vlgmr.msra.gmra.mrb[0].mxu1 %vm488_vm1, %v3638_v57 }
 0x110   : > { %672 = vmatprep.mubr.bf16.mxu1 %v3259_v20 }
 0x111   : > { %2349 = vrot.lane.b32.xlu1 %v3490_v33, %s3266_s20  ;;  %3011 = vmatmul.mubr.msk.bf16.vlgmr.msra.gmra.mrb[4].mxu0 %vm488_vm1, %v3638_v57 }
 0x112   : > { %2339 = vrot.lane.b32.xlu0 %v3455_v19, %s3266_s20  ;;  %709 = vmatpush1.bf16.msra.mxu0 %v685_v2 }
 0x113   : > { %3018 = vmatprep.subr.msk.bf16.mxu0 %vm492_vm6, %v453_v63  ;;  %v476_v21 = vpop.permute.xlu1 %475  ;;  %740 = vmatprep.mubr.bf16.mxu0 %v3259_v20 }
 0x114   : > { %v486_v29 = vsel %vm479_vm5, %v474_v6, %v476_v21  ;;  %v3774_v6 = vld [vmem:[%s4005_s1 + $0x3] sm:$0x1] }
 0x115   : > { %2353 = vrot.lane.b32.xlu1 %v3504_v43, %s3266_s20  ;;  %v512_v36 = vsel %vm492_vm6, %v486_v29, 0  ;;  %v1585_v29 = vsel %vm492_vm6, %v3648_v34, 0 }
 0x116   : > { %2343 = vrot.lane.b32.xlu0 %v3469_v24, %s3266_s20 }
 0x117   : > { %v3703_v25 = vpop.permute.xlu1 %1043 }
 0x119   : > { %3015 = vmatmul.mubr.msk.bf16.vlgmr.msra.gmra.mrb[0].mxu0 %vm488_vm1, %v3701_v14 }
 0x11a   : > { %791 = vmatpush1.bf16.msra.mxu0 %v697_v26  ;;  %2347 = vrot.lane.b32.xlu0 %v3483_v30, %s3266_s20 }
 0x11b   : > { %822 = vmatprep.mubr.bf16.mxu0 %v3259_v20  ;;  %v1050_v27 = vpop.permute.xlu1 %1049 }
 0x11c   : > { %v1327_v13 = vpop.permute.xlu0 %1326 }
 0x11e   : > { %2351 = vrot.lane.b32.xlu0 %v3493_v35, %s3266_s20 }
 0x11f   : > { %v1329_v44 = vpop.permute.xlu1 %1328 }
 0x120   : > { %v478_v31 = vpop.permute.xlu0 %477  ;;  %v1345_v61 = vsel %vm1344_vm9, %v1327_v13, %v1329_v44 }
 0x121   : > { %v487_v32 = vsel %vm479_vm5, %v476_v21, %v478_v31  ;;  %3019 = vmatmul.mubr.msk.bf16.vlgmr.msra.gmra.mrb[4].mxu0 %vm488_vm1, %v3701_v14  ;;  %v1357_v52 = vsel %vm492_vm6, %v1345_v61, 0 }
 0x122   : > { %2355 = vrot.lane.b32.xlu0 %v3520_v62, %s3266_s20  ;;  %3012 = vmatprep.subr.msk.bf16.mxu1 %vm492_vm6, %v487_v32  ;;  %s3087_s20 = sshll.u32 %s4012_s22, 4 }
 0x123   : > { %641 = vmatpush1.bf16.msra.mxu1 %v512_v36  ;;  %1125 = vmatprep.mubr.bf16.mxu0 %v3259_v20  ;;  %s3997_s25 = scalar_lea.vmem %s4010_s6, %s3087_s20 }
 0x124   : > { %v1042_v46 = vpop.permute.xlu0 %1041  ;;  %3016 = vmatprep.subr.msk.bf16.mxu1 %vm492_vm6, %v451_v38 }
 0x125   : > { %v1058_v47 = vsel %vm1057_vm8, %v1040_v18, %v1042_v46  ;;  %v1059_v48 = vsel %vm1057_vm8, %v1042_v46, %v3703_v25 }
 0x126   : > { %v1070_v50 = vsel %vm492_vm6, %v1058_v47, 0  ;;  %3013 = vmatmul.mubr.msk.bf16.vlgmr.msra.gmra.mrb[4].mxu1 %vm488_vm1, %v3638_v57  ;;  %3023 = vmatprep.subr.msk.bf16.mxu0 %vm492_vm6, %v1059_v48  ;;  %v3819_v47 = vld [vmem:[%s4005_s1 + $0x4] sm:$0x1] }
 0x127   : > { %750 = vmatpush1.bf16.msra.mxu1 %v691_v7  ;;  %1094 = vmatpush1.bf16.msra.mxu0 %v1070_v50  ;;  %v1337_v51 = vpop.permute.xlu1 %1336 }
 0x128   : > { %v1052_v54 = vpop.permute.xlu0 %1051  ;;  %3020 = vmatprep.subr.msk.bf16.mxu1 %vm492_vm6, %v455_v10  ;;  %781 = vmatprep.mubr.bf16.mxu1 %v3259_v20 }
 0x129   : > { %v1063_v55 = vsel %vm1057_vm8, %v1050_v27, %v1052_v54 }
 0x12a   : > { %3024 = vmatmul.mubr.msk.bf16.vlgmr.msra.gmra.mrb[0].mxu0 %vm488_vm1, %v3740_v53  ;;  %3027 = vmatprep.subr.msk.bf16.mxu0 %vm492_vm6, %v1063_v55 }
 0x12b   : > { %v1048_v39 = vpop.permute.xlu1 %1047  ;;  %1207 = vmatprep.mubr.bf16.mxu0 %v3259_v20 }
 0x12c   : > { %v1062_v40 = vsel %vm1057_vm8, %v1048_v39, %v1050_v27  ;;  %v1331_v57 = vpop.permute.xlu0 %1330 }
 0x12d   : > { %v1082_v58 = vsel %vm492_vm6, %v1062_v40, 0  ;;  %v1346_v60 = vsel %vm1344_vm9, %v1329_v44, %v1331_v57 }
 0x12e   : > { %3017 = vmatmul.mubr.msk.bf16.vlgmr.msra.gmra.mrb[0].mxu1 %vm488_vm1, %v3701_v14  ;;  %1176 = vmatpush1.bf16.msra.mxu0 %v1082_v58 }
 0x12f   : > { %832 = vmatpush1.bf16.msra.mxu1 %v703_v41  ;;  %3032 = vmatprep.subr.msk.bf16.mxu0 %vm492_vm6, %v1346_v60  ;;  %v1054_v16 = vpop.permute.xlu1 %1053 }
 0x130   : > { %v3759_v0 = vpop.permute.xlu0 %1338  ;;  %863 = vmatprep.mubr.bf16.mxu1 %v3259_v20  ;;  %v1064_v15 = vsel %vm1057_vm8, %v1052_v54, %v1054_v16 }
 0x131   : > { %v1350_v49 = vsel %vm1344_vm9, %v1337_v51, %v3759_v0  ;;  %v1088_v22 = vsel %vm492_vm6, %v1064_v15, 0 }
 0x132   : > { %3028 = vmatmul.mubr.msk.bf16.vlgmr.msra.gmra.mrb[4].mxu0 %vm488_vm1, %v3740_v53 }
 0x133   : > { %1381 = vmatpush1.bf16.msra.mxu0 %v1357_v52  ;;  %v1333_v59 = vpop.permute.xlu1 %1332  ;;  %1412 = vmatprep.mubr.bf16.mxu0 %v3259_v20 }
 0x134   : > { %3036 = vmatprep.subr.msk.bf16.mxu0 %vm492_vm6, %v1350_v49  ;;  %v1056_v1 = vpop.permute.xlu0 %1055 }
 0x135   : > { %v1065_v18 = vsel %vm1057_vm8, %v1054_v16, %v1056_v1 }
 0x136   : > { %3021 = vmatmul.mubr.msk.bf16.vlgmr.msra.gmra.mrb[4].mxu1 %vm488_vm1, %v3701_v14 }
 0x137   : > { %v1341_v4 = vpop.permute.xlu1 %1340  ;;  %1166 = vmatprep.mubr.bf16.mxu1 %v3259_v20 }
 0x138   : > { %v1343_v8 = vpop.permute.xlu0 %1342  ;;  %v1351_v10 = vsel %vm1344_vm9, %v3759_v0, %v1341_v4 }
 0x139   : > { %v1352_v34 = vsel %vm1344_vm9, %v1341_v4, %v1343_v8 }
 0x13a   : > { %3033 = vmatmul.mubr.msk.bf16.vlgmr.msra.gmra.mrb[0].mxu0 %vm488_vm1, %v3774_v6 }
 0x13b   : > { %v3779_v9 = vpop.permute.xlu1 %1562  ;;  %1494 = vmatprep.mubr.bf16.mxu0 %v3259_v20 }
 0x13c   : > { %v1046_v11 = vpop.permute.xlu0 %1045 }
 0x13d   : > { %v1060_v12 = vsel %vm1057_vm8, %v3703_v25, %v1046_v11  ;;  %v1061_v56 = vsel %vm1057_vm8, %v1046_v11, %v1048_v39  ;;  %v1574_v25 = vsel %vm1572_vm7, %v3641_v37, %v3643_v45  ;;  %v1347_v37 = vsel %vm1344_vm9, %v1331_v57, %v1333_v59  ;;  %v2844_v11 = vld [vmem:[%s4008_s4] sm:$0x3] }
 0x13e   : > { %v1076_v5 = vsel %vm492_vm6, %v1060_v12, 0  ;;  %3025 = vmatprep.subr.msk.bf16.mxu1 %vm492_vm6, %v1061_v56  ;;  %v1363_v42 = vsel %vm492_vm6, %v1347_v37, 0 }
 0x13f   : > { %1135 = vmatpush1.bf16.msra.mxu1 %v1076_v5  ;;  %v2568_v2 = vpop.permute.xlu1 %2567 }
 0x140   : > { %v1335_v63 = vpop.permute.xlu0 %1334  ;;  %3029 = vmatprep.subr.msk.bf16.mxu1 %vm492_vm6, %v1065_v18 }
 0x141   : > { %v1349_v21 = vsel %vm1344_vm9, %v1335_v63, %v1337_v51  ;;  %v1348_v26 = vsel %vm1344_vm9, %v1333_v59, %v1335_v63 }
 0x142   : > { %v1369_v14 = vsel %vm492_vm6, %v1349_v21, 0  ;;  %3026 = vmatmul.mubr.msk.bf16.vlgmr.msra.gmra.mrb[0].mxu1 %vm488_vm1, %v3740_v53 }
 0x143   : > { %1217 = vmatpush1.bf16.msra.mxu1 %v1088_v22  ;;  %1463 = vmatpush1.bf16.msra.mxu0 %v1369_v14  ;;  %v2572_v13 = vpop.permute.xlu1 %2571  ;;  %v3049_v22 = vld [vmem:[%s4005_s1 + $0x5] sm:$0x1] }
 0x144   : > { %v1561_v27 = vpop.permute.xlu0 %1560  ;;  %3034 = vmatprep.subr.msk.bf16.mxu1 %vm492_vm6, %v1348_v26  ;;  %3041 = vmatprep.subr.msk.bf16.mxu0 %vm492_vm6, %v1574_v25 }
 0x145   : > { %1248 = vmatprep.mubr.bf16.mxu1 %v3259_v20  ;;  %v1576_v39 = vsel %vm1572_vm7, %v1561_v27, %v3779_v9  ;;  %v1575_v60 = vsel %vm1572_vm7, %v3643_v45, %v1561_v27 }
 0x146   : > { %3037 = vmatmul.mubr.msk.bf16.vlgmr.msra.gmra.mrb[4].mxu0 %vm488_vm1, %v3774_v6  ;;  %v1591_v0 = vsel %vm492_vm6, %v1575_v60, 0 }
 0x147   : > { %1609 = vmatpush1.bf16.msra.mxu0 %v1585_v29  ;;  %v1565_v31 = vpop.permute.xlu1 %1564  ;;  %1640 = vmatprep.mubr.bf16.mxu0 %v3259_v20 }
 0x148   : > { %v2566_v32 = vpop.permute.xlu0 %2565  ;;  %v1577_v40 = vsel %vm1572_vm7, %v3779_v9, %v1565_v31 }
 0x149   : > { %v2582_v36 = vsel %vm2581_vm10, %v2566_v32, %v2568_v2  ;;  %v2598_v38 = vmul.bf16 %v2566_v32, %v3455_v19 }
 0x14a   : > { %v2599_v44 = vmul.bf16 %v2582_v36, %v3466_v23  ;;  %3030 = vmatmul.mubr.msk.bf16.vlgmr.msra.gmra.mrb[4].mxu1 %vm488_vm1, %v3740_v53 }
 0x14b   : > { %1422 = vmatpush1.bf16.msra.mxu1 %v1363_v42  ;;  %2618 = vrot.lane.b32.xlu1 %v2598_v38, %s3267_s29  ;;  %v1569_v46 = vpop.permute.xlu1 %1568 }
 0x14c   : > { %3038 = vmatprep.subr.msk.bf16.mxu1 %vm492_vm6, %v1352_v34  ;;  %v2570_v19 = vpop.permute.xlu0 %2569  ;;  %2620 = vrot.lane.b32.xlu0 %v2599_v44, %s3267_s29 }
 0x14d   : > { %v2583_v23 = vsel %vm2581_vm10, %v2568_v2, %v2570_v19  ;;  %v2584_v48 = vsel %vm2581_vm10, %v2570_v19, %v2572_v13  ;;  %1453 = vmatprep.mubr.bf16.mxu1 %v3259_v20 }
 0x14e   : > { %v2600_v50 = vmul.bf16 %v2583_v23, %v3469_v24  ;;  %v2601_v7 = vmul.bf16 %v2584_v48, %v3480_v28  ;;  %3042 = vmatmul.mubr.msk.bf16.vlgmr.msra.gmra.mrb[0].mxu0 %vm488_vm1, %v3819_v47  ;;  %v1375_v28 = vsel %vm492_vm6, %v1351_v10, 0  ;;  %v3058_v48 = vld [vmem:[%s4005_s1 + $0x6] sm:$0x1] }
 0x14f   : > { %v2576_v51 = vpop.permute.xlu1 %2575  ;;  %1722 = vmatprep.mubr.bf16.mxu0 %v3259_v20 }
 0x150   : > { %v2574_v53 = vpop.permute.xlu0 %2573  ;;  %2622 = vrot.lane.b32.xlu1 %v2600_v50, %s3267_s29  ;;  %2624 = vrot.lane.b32.xlu0 %v2601_v7, %s3267_s29 }
 0x151   : > { %v2585_v54 = vsel %vm2581_vm10, %v2572_v13, %v2574_v53  ;;  %v2586_v24 = vsel %vm2581_vm10, %v2574_v53, %v2576_v51 }
 0x152   : > { %v2602_v55 = vmul.bf16 %v2585_v54, %v3483_v30  ;;  %v2603_v17 = vmul.bf16 %v2586_v24, %v3490_v33  ;;  %3035 = vmatmul.mubr.msk.bf16.vlgmr.msra.gmra.mrb[0].mxu1 %vm488_vm1, %v3774_v6  ;;  %v1597_v33 = vsel %vm492_vm6, %v1577_v40, 0 }
 0x153   : > { %1504 = vmatpush1.bf16.msra.mxu1 %v1375_v28  ;;  %v2580_v57 = vpop.permute.xlu1 %2579  ;;  %1535 = vmatprep.mubr.bf16.mxu1 %v3259_v20 }
 0x154   : > { %3043 = vmatprep.subr.msk.bf16.mxu1 %vm492_vm6, %v1576_v39  ;;  %v1567_v58 = vpop.permute.xlu0 %1566  ;;  %2626 = vrot.lane.b32.xlu1 %v2602_v55, %s3267_s29  ;;  %v2606_v12 = vmul.bf16 %v2580_v57, %v3520_v62  ;;  %v2858_v62 = vld [vmem:[%s4009_s5] sm:$0x3] }
 0x155   : > { %v1578_v30 = vsel %vm1572_vm7, %v1565_v31, %v1567_v58  ;;  %2628 = vrot.lane.b32.xlu0 %v2603_v17, %s3267_s29 }
 0x156   : > { %3045 = vmatprep.subr.msk.bf16.mxu0 %vm492_vm6, %v1578_v30 }
 0x157   : > { %1691 = vmatpush1.bf16.msra.mxu0 %v1597_v33  ;;  %v1836_v41 = vpop.permute.xlu1 %1835 }
 0x158   : > { %v1571_v61 = vpop.permute.xlu0 %1570 }
 0x159   : > { %v1580_v16 = vsel %vm1572_vm7, %v1569_v46, %v1571_v61 }
 0x15a   : > { %3039 = vmatmul.mubr.msk.bf16.vlgmr.msra.gmra.mrb[4].mxu1 %vm488_vm1, %v3774_v6  ;;  %3046 = vmatmul.mubr.msk.bf16.vlgmr.msra.gmra.mrb[4].mxu0 %vm488_vm1, %v3819_v47  ;;  %v1579_v6 = vsel %vm1572_vm7, %v1567_v58, %v1569_v46 }
 0x15b   : > { %1650 = vmatpush1.bf16.msra.mxu1 %v1591_v0  ;;  %v1840_v49 = vpop.permute.xlu1 %1839  ;;  %1681 = vmatprep.mubr.bf16.mxu1 %v3259_v20  ;;  %v1603_v56 = vsel %vm492_vm6, %v1579_v6, 0  ;;  %v3067_v0 = vld [vmem:[%s4005_s1 + $0x7] sm:$0x1] }
 0x15c   : > { %3047 = vmatprep.subr.msk.bf16.mxu1 %vm492_vm6, %v1580_v16  ;;  %v2578_v45 = vpop.permute.xlu0 %2577  ;;  %1919 = vmatprep.mubr.bf16.mxu0 %v3259_v20 }
 0x15d   : > { %v2587_v52 = vsel %vm2581_vm10, %v2576_v51, %v2578_v45  ;;  %v2588_v59 = vsel %vm2581_vm10, %v2578_v45, %v2580_v57 }
 0x15e   : > { %v2604_v1 = vmul.bf16 %v2587_v52, %v3493_v35  ;;  %v2605_v4 = vmul.bf16 %v2588_v59, %v3504_v43 }
 0x15f   : > { %v1844_v8 = vpop.permute.xlu1 %1843 }
 0x160   : > { %v1834_v9 = vpop.permute.xlu0 %1833  ;;  %2630 = vrot.lane.b32.xlu1 %v2604_v1, %s3267_s29  ;;  %2632 = vrot.lane.b32.xlu0 %v2605_v4, %s3267_s29 }
 0x161   : > { %v1852_v35 = vsel %vm1851_vm11, %v1834_v9, %v1836_v41 }
 0x162   : > { %3044 = vmatmul.mubr.msk.bf16.vlgmr.msra.gmra.mrb[0].mxu1 %vm488_vm1, %v3819_v47  ;;  %v1864_v18 = vsel %vm492_vm6, %v1852_v35, 0 }
 0x163   : > { %1732 = vmatpush1.bf16.msra.mxu1 %v1603_v56  ;;  %v1848_v43 = vpop.permute.xlu1 %1847  ;;  %1763 = vmatprep.mubr.bf16.mxu1 %v3259_v20 }
 0x164   : > { %v1838_v5 = vpop.permute.xlu0 %1837  ;;  %2634 = vrot.lane.b32.xlu1 %v2606_v12, %s3267_s29  ;;  %2847 = vperm.xlu0 %3240, %v2844_v11  }
 0x165   : > { %v1853_v15 = vsel %vm1851_vm11, %v1836_v41, %v1838_v5  ;;  %v1854_v2 = vsel %vm1851_vm11, %v1838_v5, %v1840_v49 }
 0x166   : > { %3050 = vmatprep.subr.msk.bf16.mxu0 %vm492_vm6, %v1853_v15  ;;  %v1870_v25 = vsel %vm492_vm6, %v1854_v2, 0 }
 0x167   : > { %1888 = vmatpush1.bf16.msra.mxu0 %v1864_v18  ;;  %v2113_v63 = vpop.permute.xlu1 %2112 }
 0x168   : > { %v1842_v21 = vpop.permute.xlu0 %1841  ;;  %2861 = vperm.xlu1 %3241, %v2858_v62  }
 0x169   : > { %v1855_v14 = vsel %vm1851_vm11, %v1840_v49, %v1842_v21  ;;  %v1856_v26 = vsel %vm1851_vm11, %v1842_v21, %v1844_v8 }
 0x16a   : > { %3052 = vmatprep.subr.msk.bf16.mxu1 %vm492_vm6, %v1855_v14  ;;  %3048 = vmatmul.mubr.msk.bf16.vlgmr.msra.gmra.mrb[4].mxu1 %vm488_vm1, %v3819_v47  ;;  %v1876_v37 = vsel %vm492_vm6, %v1856_v26, 0 }
 0x16b   : > { %1929 = vmatpush1.bf16.msra.mxu1 %v1870_v25  ;;  %v2117_v13 = vpop.permute.xlu1 %2116  ;;  %3051 = vmatmul.mubr.msk.bf16.vlgmr.msra.gmra.mrb[0].mxu0 %vm488_vm1, %v3049_v22 }
 0x16c   : > { %v1846_v27 = vpop.permute.xlu0 %1845  ;;  %1960 = vmatprep.mubr.bf16.mxu1 %v3259_v20  ;;  %2001 = vmatprep.mubr.bf16.mxu0 %v3259_v20 }
 0x16d   : > { %v1857_v29 = vsel %vm1851_vm11, %v1844_v8, %v1846_v27  ;;  %v1858_v31 = vsel %vm1851_vm11, %v1846_v27, %v1848_v43 }
 0x16e   : > { %3054 = vmatprep.subr.msk.bf16.mxu0 %vm492_vm6, %v1857_v29  ;;  %v1882_v42 = vsel %vm492_vm6, %v1858_v31, 0 }
 0x16f   : > { %1970 = vmatpush1.bf16.msra.mxu0 %v1876_v37  ;;  %v2121_v32 = vpop.permute.xlu1 %2120 }
 0x170   : > { %v1850_v36 = vpop.permute.xlu0 %1849 }
 0x171   : > { %v1859_v38 = vsel %vm1851_vm11, %v1848_v43, %v1850_v36 }
 0x172   : > { %3056 = vmatprep.subr.msk.bf16.mxu1 %vm492_vm6, %v1859_v38  ;;  %3053 = vmatmul.mubr.msk.bf16.vlgmr.msra.gmra.mrb[0].mxu1 %vm488_vm1, %v3049_v22 }
 0x173   : > { %2011 = vmatpush1.bf16.msra.mxu1 %v1882_v42  ;;  %3055 = vmatmul.mubr.msk.bf16.vlgmr.msra.gmra.mrb[4].mxu0 %vm488_vm1, %v3049_v22  ;;  %v2125_v44 = vpop.permute.xlu1 %2124 }
 0x174   : > { %v2115_v34 = vpop.permute.xlu0 %2114  ;;  %2042 = vmatprep.mubr.bf16.mxu1 %v3259_v20  ;;  %2197 = vmatprep.mubr.bf16.mxu0 %v3259_v20 }
 0x175   : > { %v2130_v46 = vsel %vm2075_vm4, %v2113_v63, %v2115_v34  ;;  %v2131_v47 = vsel %vm2075_vm4, %v2115_v34, %v2117_v13 }
 0x176   : > { %v2142_v19 = vsel %vm492_vm6, %v2130_v46, 0  ;;  %3059 = vmatprep.subr.msk.bf16.mxu0 %vm492_vm6, %v2131_v47 }
 0x177   : > { %2166 = vmatpush1.bf16.msra.mxu0 %v2142_v19  ;;  %v2129_v10 = vpop.permute.xlu1 %2128 }
 0x178   : > { %v2119_v23 = vpop.permute.xlu0 %2118 }
 0x179   : > { %v2132_v50 = vsel %vm2075_vm4, %v2117_v13, %v2119_v23  ;;  %v2133_v7 = vsel %vm2075_vm4, %v2119_v23, %v2121_v32 }
 0x17a   : > { %v2148_v51 = vsel %vm492_vm6, %v2132_v50, 0  ;;  %3061 = vmatprep.subr.msk.bf16.mxu1 %vm492_vm6, %v2133_v7  ;;  %3057 = vmatmul.mubr.msk.bf16.vlgmr.msra.gmra.mrb[4].mxu1 %vm488_vm1, %v3049_v22  ;;  %v3076_v22 = vld [vmem:[%s4005_s1 + $0x8] sm:$0x1] }
 0x17b   : > { %2207 = vmatpush1.bf16.msra.mxu1 %v2148_v51  ;;  %3060 = vmatmul.mubr.msk.bf16.vlgmr.msra.gmra.mrb[0].mxu0 %vm488_vm1, %v3058_v48  ;;  %v2342_v55 = vpop.permute.xlu1 %2341 }
 0x17c   : > { %v2123_v53 = vpop.permute.xlu0 %2122  ;;  %2238 = vmatprep.mubr.bf16.mxu1 %v3259_v20  ;;  %2279 = vmatprep.mubr.bf16.mxu0 %v3259_v20 }
 0x17d   : > { %v2134_v54 = vsel %vm2075_vm4, %v2121_v32, %v2123_v53  ;;  %v2135_v24 = vsel %vm2075_vm4, %v2123_v53, %v2125_v44 }
 0x17e   : > { %v2154_v28 = vsel %vm492_vm6, %v2134_v54, 0  ;;  %3063 = vmatprep.subr.msk.bf16.mxu0 %vm492_vm6, %v2135_v24 }
 0x17f   : > { %2248 = vmatpush1.bf16.msra.mxu0 %v2154_v28  ;;  %v2346_v30 = vpop.permute.xlu1 %2345 }
 0x180   : > { %v2127_v17 = vpop.permute.xlu0 %2126 }
 0x181   : > { %v2136_v39 = vsel %vm2075_vm4, %v2125_v44, %v2127_v17  ;;  %v2137_v40 = vsel %vm2075_vm4, %v2127_v17, %v2129_v10  ;;  %v3268_v10 = vmov 1983009808  }
 0x182   : > { %v2160_v57 = vsel %vm492_vm6, %v2136_v39, 0  ;;  %3065 = vmatprep.subr.msk.bf16.mxu1 %vm492_vm6, %v2137_v40  ;;  %3062 = vmatmul.mubr.msk.bf16.vlgmr.msra.gmra.mrb[0].mxu1 %vm488_vm1, %v3058_v48  ;;  %v2907_v51 = vunpack.c.l.s4 %v3268_v10 }
 0x183   : > { %2289 = vmatpush1.bf16.msra.mxu1 %v2160_v57  ;;  %3064 = vmatmul.mubr.msk.bf16.vlgmr.msra.gmra.mrb[4].mxu0 %vm488_vm1, %v3058_v48  ;;  %v2350_v49 = vpop.permute.xlu1 %2349 }
 0x184   : > { %v2340_v58 = vpop.permute.xlu0 %2339  ;;  %2320 = vmatprep.mubr.bf16.mxu1 %v3259_v20  ;;  %2425 = vmatprep.mubr.bf16.mxu0 %v3259_v20 }
 0x185   : > { %v2358_v33 = vsel %vm2357_vm12, %v2340_v58, %v2342_v55 }
 0x186   : > { %v2370_v61 = vsel %vm492_vm6, %v2358_v33, 0 }
 0x187   : > { %v2354_v8 = vpop.permute.xlu1 %2353 }
 0x188   : > { %v2344_v60 = vpop.permute.xlu0 %2343 }
 0x189   : > { %v2359_v41 = vsel %vm2357_vm12, %v2342_v55, %v2344_v60  ;;  %v2360_v16 = vsel %vm2357_vm12, %v2344_v60, %v2346_v30 }
 0x18a   : > { %3068 = vmatprep.subr.msk.bf16.mxu0 %vm492_vm6, %v2359_v41  ;;  %3066 = vmatmul.mubr.msk.bf16.vlgmr.msra.gmra.mrb[4].mxu1 %vm488_vm1, %v3058_v48  ;;  %v2376_v59 = vsel %vm492_vm6, %v2360_v16, 0 }
 0x18b   : > { %2394 = vmatpush1.bf16.msra.mxu0 %v2370_v61  ;;  %2466 = vmatprep.mubr.bf16.mxu1 %v3259_v20 }
 0x18c   : > { %v2348_v45 = vpop.permute.xlu0 %2347 }
 0x18d   : > { %v2361_v52 = vsel %vm2357_vm12, %v2346_v30, %v2348_v45  ;;  %v2362_v1 = vsel %vm2357_vm12, %v2348_v45, %v2350_v49  ;;  %v2908_v30 = vunpack.c.0.s8 %v2907_v51 }
 0x18e   : > { %3070 = vmatprep.subr.msk.bf16.mxu1 %vm492_vm6, %v2361_v52  ;;  %3069 = vmatmul.mubr.msk.bf16.vlgmr.msra.gmra.mrb[0].mxu0 %vm488_vm1, %v3067_v0  ;;  %v2382_v9 = vsel %vm492_vm6, %v2362_v1, 0 }
 0x18f   : > { %2435 = vmatpush1.bf16.msra.mxu1 %v2376_v59  ;;  %2507 = vmatprep.mubr.bf16.mxu0 %v3259_v20  ;;  %v2911_v45 = vsub.s32 %v2908_v30, %v3314_v3 }
 0x190   : > { %v2352_v4 = vpop.permute.xlu0 %2351 }
 0x191   : > { %v2363_v6 = vsel %vm2357_vm12, %v2350_v49, %v2352_v4  ;;  %v2364_v11 = vsel %vm2357_vm12, %v2352_v4, %v2354_v8 }
 0x192   : > { %3072 = vmatprep.subr.msk.bf16.mxu0 %vm492_vm6, %v2363_v6  ;;  %3071 = vmatmul.mubr.msk.bf16.vlgmr.msra.gmra.mrb[0].mxu1 %vm488_vm1, %v3067_v0  ;;  %v2388_v35 = vsel %vm492_vm6, %v2364_v11, 0 }
 0x193   : > { %2476 = vmatpush1.bf16.msra.mxu0 %v2382_v9  ;;  %2548 = vmatprep.mubr.bf16.mxu1 %v3259_v20 }
 0x194   : > { %v2356_v12 = vpop.permute.xlu0 %2355 }
 0x195   : > { %v2365_v56 = vsel %vm2357_vm12, %v2354_v8, %v2356_v12 }
 0x196   : > { %3074 = vmatprep.subr.msk.bf16.mxu1 %vm492_vm6, %v2365_v56  ;;  %3073 = vmatmul.mubr.msk.bf16.vlgmr.msra.gmra.mrb[4].mxu0 %vm488_vm1, %v3067_v0 }
 0x197   : > { %2517 = vmatpush1.bf16.msra.mxu1 %v2388_v35  ;;  %2704 = vmatprep.mubr.bf16.mxu0 %v3259_v20 }
 0x19a   : > { %3075 = vmatmul.mubr.msk.bf16.vlgmr.msra.gmra.mrb[4].mxu1 %vm488_vm1, %v3067_v0 }
 0x19b   : > { %2745 = vmatprep.mubr.bf16.mxu1 %v3259_v20 }
 0x1bd   : > { %v2619_v43 = vpop.permute.xlu1 %2618 }
 0x1be   : > { %v2621_v5 = vpop.permute.xlu0 %2620 }
 0x1bf   : > { %v2637_v15 = vsel %vm2636_vm13, %v2619_v43, %v2621_v5 }
 0x1c0   : > { %v2649_v63 = vsel %vm492_vm6, %v2637_v15, 0 }
 0x1c2   : > { %v2625_v62 = vpop.permute.xlu0 %2624  ;;  %v2623_v18 = vpop.permute.xlu1 %2622 }
 0x1c3   : > { %v2638_v2 = vsel %vm2636_vm13, %v2621_v5, %v2623_v18  ;;  %v2639_v21 = vsel %vm2636_vm13, %v2623_v18, %v2625_v62 }
 0x1c4   : > { %3077 = vmatprep.subr.msk.bf16.mxu0 %vm492_vm6, %v2638_v2  ;;  %v2655_v26 = vsel %vm492_vm6, %v2639_v21, 0 }
 0x1c5   : > { %2673 = vmatpush1.bf16.msra.mxu0 %v2649_v63 }
 0x1c6   : > { %v2627_v14 = vpop.permute.xlu1 %2626 }
 0x1c7   : > { %v2640_v25 = vsel %vm2636_vm13, %v2625_v62, %v2627_v14  ;;  %v2629_v13 = vpop.permute.xlu0 %2628 }
 0x1c8   : > { %3078 = vmatmul.mubr.msk.bf16.vlgmr.msra.gmra.mrb[0].mxu0 %vm488_vm1, %v3076_v22  ;;  %3079 = vmatprep.subr.msk.bf16.mxu1 %vm492_vm6, %v2640_v25  ;;  %v2641_v27 = vsel %vm2636_vm13, %v2627_v14, %v2629_v13 }
 0x1c9   : > { %2714 = vmatpush1.bf16.msra.mxu1 %v2655_v26  ;;  %2786 = vmatprep.mubr.bf16.mxu0 %v3259_v20  ;;  %v2661_v32 = vsel %vm492_vm6, %v2641_v27, 0 }
 0x1cc   : > { %3080 = vmatmul.mubr.msk.bf16.vlgmr.msra.gmra.mrb[0].mxu1 %vm488_vm1, %v3076_v22 }
 0x1cd   : > { %2827 = vmatprep.mubr.bf16.mxu1 %v3259_v20 }
 0x1d2   : > { %v2633_v29 = vpop.permute.xlu0 %2632  ;;  %v2631_v37 = vpop.permute.xlu1 %2630 }
 0x1d3   : > { %v2642_v31 = vsel %vm2636_vm13, %v2629_v13, %v2631_v37  ;;  %v2643_v36 = vsel %vm2636_vm13, %v2631_v37, %v2633_v29 }
 0x1d4   : > { %3081 = vmatprep.subr.msk.bf16.mxu0 %vm492_vm6, %v2642_v31  ;;  %v2667_v44 = vsel %vm492_vm6, %v2643_v36, 0 }
 0x1d5   : > { %2755 = vmatpush1.bf16.msra.mxu0 %v2661_v32 }
 0x1d6   : > { %v2635_v38 = vpop.permute.xlu1 %2634 }
 0x1d7   : > { %v2644_v42 = vsel %vm2636_vm13, %v2633_v29, %v2635_v38 }
 0x1d8   : > { %3082 = vmatmul.mubr.msk.bf16.vlgmr.msra.gmra.mrb[4].mxu0 %vm488_vm1, %v3076_v22  ;;  %3083 = vmatprep.subr.msk.bf16.mxu1 %vm492_vm6, %v2644_v42 }
 0x1d9   : > { %2796 = vmatpush1.bf16.msra.mxu1 %v2667_v44 }
 0x1dc   : > { %3084 = vmatmul.mubr.msk.bf16.vlgmr.msra.gmra.mrb[4].mxu1 %vm488_vm1, %v3076_v22 }
 0x1e3   : > { %v2848_v20 = vpop.permute.xlu0 %2847 }
 0x1e7   : > { %v2862_v46 = vpop.permute.xlu1 %2861 }
 0x29b   : > { %v2706_v34 = vpop.f32.mrb[0].mxu0 }
 0x29c   : > { %v2850_v47 = vmul.f32 %v2848_v20, %v2706_v34  ;;  %v2708_v19 = vpop.f32.mrb[1].mxu0 }
 0x29d   : > { %v2851_v23 = vmul.f32 %v2848_v20, %v2708_v19  ;;  %v2710_v48 = vpop.f32.mrb[2].mxu0 }
 0x29e   : > { %v2864_v50 = vadd.f32 %v2862_v46, %v2850_v47  ;;  %v2711_v7 = vpop.f32.mrb[3].mxu0 }
 0x29f   : > { %v2865_v53 = vadd.f32 %v2862_v46, %v2851_v23  ;;  %v2747_v54 = vpop.f32.mrb[0].mxu1 }
 0x2a0   : > { %v2880_v24 = vmul.f32 0.01, %v2864_v50  ;;  %v2852_v28 = vmul.f32 %v2848_v20, %v2747_v54  ;;  %v2749_v55 = vpop.f32.mrb[1].mxu1  ;;  %vm2872_vm14 = vcmp.ge.f32.partialorder %v2864_v50, 0.0 }
 0x2a1   : > { %v2881_v17 = vmul.f32 0.01, %v2865_v53  ;;  %v2853_v39 = vmul.f32 %v2848_v20, %v2749_v55  ;;  %vm2873_vm15 = vcmp.ge.f32.partialorder %v2865_v53, 0.0  ;;  %v2751_v40 = vpop.f32.mrb[2].mxu1 }
 0x2a2   : > { %v2866_v57 = vadd.f32 %v2862_v46, %v2852_v28  ;;  %v2888_v58 = vsel %vm2872_vm14, %v2864_v50, %v2880_v24  ;;  %v2752_v33 = vpop.f32.mrb[3].mxu1 }
 0x2a3   : > { %v2867_v60 = vadd.f32 %v2862_v46, %v2853_v39  ;;  %v2889_v41 = vsel %vm2873_vm15, %v2865_v53, %v2881_v17 }
 0x2a4   : > { %vm2874_vm0 = vcmp.ge.f32.partialorder %v2866_v57, 0.0  ;;  %v2882_v61 = vmul.f32 0.01, %v2866_v57  ;;  %v2904_v16 = vcombine.low %v2888_v58, %v2889_v41 }
 0x2a5   : > { %vm2875_vm1 = vcmp.ge.f32.partialorder %v2867_v60, 0.0  ;;  %v2883_v0 = vmul.f32 0.01, %v2867_v60 }
 0x2a6   : > { %v2890_v49 = vsel %vm2874_vm0, %v2866_v57, %v2882_v61  ;;  %v2912_v1 = vrot.slane %v2904_v16, %v2911_v45 }
 0x2a7   : > { %v2891_v52 = vsel %vm2875_vm1, %v2867_v60, %v2883_v0 }
 0x2a8   : > { %v2905_v59 = vcombine.low %v2890_v49, %v2891_v52 }
 0x2aa   : > { %v2919_v4 = vrot.slane %v2905_v59, %v2911_v45 }
 0x2ab   : > { %v2788_v6 = vpop.f32.mrb[4].mxu0 }
 0x2ac   : > { %v2920_v8 = vcombine.low %v2912_v1, %v2919_v4  ;;  %v2854_v9 = vmul.f32 %v2848_v20, %v2788_v6  ;;  %v2790_v11 = vpop.f32.mrb[5].mxu0 }
 0x2ad   : > { %v2855_v12 = vmul.f32 %v2848_v20, %v2790_v11  ;;  %v2792_v56 = vpop.f32.mrb[6].mxu0 }
 0x2ae   : > { %2940 = vst [vmem:[%s3997_s25] sm:$0xff] %v2920_v8  ;;  %v2868_v35 = vadd.f32 %v2862_v46, %v2854_v9  ;;  %v2793_v3 = vpop.f32.mrb[7].mxu0 }
 0x2af   : > { %v2869_v43 = vadd.f32 %v2862_v46, %v2855_v12  ;;  %v2829_v5 = vpop.f32.mrb[4].mxu1 }
 0x2b0   : > { %vm2876_vm2 = vcmp.ge.f32.partialorder %v2868_v35, 0.0  ;;  %v2884_v15 = vmul.f32 0.01, %v2868_v35  ;;  %v2856_v62 = vmul.f32 %v2848_v20, %v2829_v5  ;;  %v2831_v18 = vpop.f32.mrb[5].mxu1 }
 0x2b1   : > { %vm2877_vm3 = vcmp.ge.f32.partialorder %v2869_v43, 0.0  ;;  %v2885_v2 = vmul.f32 0.01, %v2869_v43  ;;  %v2857_v63 = vmul.f32 %v2848_v20, %v2831_v18  ;;  %v2833_v21 = vpop.f32.mrb[6].mxu1 }
 0x2b2   : > { %v2892_v22 = vsel %vm2876_vm2, %v2868_v35, %v2884_v15  ;;  %v2870_v14 = vadd.f32 %v2862_v46, %v2856_v62  ;;  %v2834_v25 = vpop.f32.mrb[7].mxu1 }
 0x2b3   : > { %v2893_v26 = vsel %vm2877_vm3, %v2869_v43, %v2885_v2  ;;  %v2871_v13 = vadd.f32 %v2862_v46, %v2857_v63 }
 0x2b4   : > { %v2921_v27 = vcombine.low %v2892_v22, %v2893_v26  ;;  %vm2878_vm4 = vcmp.ge.f32.partialorder %v2870_v14, 0.0  ;;  %v2886_v29 = vmul.f32 0.01, %v2870_v14 }
 0x2b5   : > { %vm2879_vm5 = vcmp.ge.f32.partialorder %v2871_v13, 0.0  ;;  %v2887_v37 = vmul.f32 0.01, %v2871_v13 }
 0x2b6   : > { %v2894_v31 = vsel %vm2878_vm4, %v2870_v14, %v2886_v29  ;;  %v2929_v38 = vrot.slane %v2921_v27, %v2911_v45 }
 0x2b7   : > { %v2895_v32 = vsel %vm2879_vm5, %v2871_v13, %v2887_v37 }
 0x2b8   : > { %v2922_v36 = vcombine.low %v2894_v31, %v2895_v32 }
 0x2ba   : > { %v2936_v42 = vrot.slane %v2922_v36, %v2911_v45 }
 0x2bc   : > { %v2937_v44 = vcombine.low %v2929_v38, %v2936_v42 }
 0x2be   : > { %2941 = vst [vmem:[%s3997_s25 + $0x8] sm:$0xff] %v2937_v44 }
 0x2bf PF: > { %s16_s21 = sadd.s32 1, %s3251_s21  }
 0x2c0   : > { %p13_p4 = scmp.ge.s32.totalorder %s16_s21, 4  }
 0x2c2   :  { %15 = sbr.rel (!%p13_p4) target bundleno = 1 (0x1), region = 82 }

</bundles_post_ra>
